<compile_context>
chip_gen: v5e
topology: v5e:2x2
jax: 0.10.0
libtpu: 0.0.40
codegen_flags: <defaults>
</compile_context>

<pallas_src>
import functools
import numpy as np
import jax
import jax.numpy as jnp
from jax import lax
from jax.experimental import pallas as pl
from jax.experimental.pallas import tpu as pltpu

BN_EPS = 1e-5
_SUBLANE = 8          # f32 sublane tile; channel-padding target
_UNROLL_MAX_T = 4     # fully unroll the iteration loop up to this T
_TAP_DTYPE = jnp.bfloat16   # dtype of the masked taps / patch slab fed to the MXU


# --------------------------------- kernel ------------------------------------

def _csc_kernel(T, width, x_ref, m_ref, w1_ref, w1t_ref, w2_ref, w2t_ref,
                b1_ref, b2_ref, o_ref):
    x = x_ref[...]                          # (Cp, P) f32, pixels lane-major
    w1s, w1t = w1_ref[...], w1t_ref[...]    # bf16 im2col weights; c1 folded into w1s
    w2s, w2t = w2_ref[...], w2t_ref[...]    # c2 folded into w2s
    b1 = b1_ref[...]                        # (Cp, P) f32, pre-broadcast in wrapper
    b2 = b2_ref[...]
    Cp, P = x.shape

    # tap order (ky major, kx minor) matches the mask rows and the weight
    # matrix column layout produced in the wrapper.
    offs = tuple(dy * width + dx for dy in (-1, 0, 1) for dx in (-1, 0, 1))

    def conv(v, wmat):
        # 3x3 stride-1 SAME conv as ONE MXU matmul: (Cp, 9*Cp) @ (9*Cp, P).
        # Each rolled tap is cast to bf16 BEFORE the mask multiply and the
        # concatenate -> half-width patch slab / stores.  Masks are exact 0/1.
        cols = []
        for k, d in enumerate(offs):
            if d == 0:
                cols.append(v.astype(_TAP_DTYPE))            # centre tap: no mask
            else:
                r = pltpu.roll(v, (-d) % P, axis=1)          # r[:, p] = v[:, p + d]
                cols.append(r.astype(_TAP_DTYPE) * m_ref[k])  # zero out-of-image taps
        patches = jnp.concatenate(cols, axis=0)              # (9*Cp, P) bf16
        return jnp.dot(wmat, patches, preferred_element_type=jnp.float32)

    def bn(y):
        # training-mode BatchNorm2d (biased batch stats), centered two-pass form.
        inv_p = 1.0 / y.shape[-1]
        mean = jnp.sum(y, axis=-1, keepdims=True) * inv_p
        d = y - mean
        var = jnp.sum(d * d, axis=-1, keepdims=True) * inv_p
        return d * lax.rsqrt(var + BN_EPS)

    relu = lambda v: jnp.maximum(v, 0.0)

    # prologue: b1/b2 are dropped inside bn() (per-channel constants cancel under
    # the mean subtraction); c1/c2 are already folded into w1s/w2s.
    g1 = relu(bn(conv(x, w1s)))
    g2 = relu(bn(conv(g1, w2s)))

    def iteration(g2):
        t = conv(g2, w2t)                   # conv_transpose2d(g2, W2); shared (exact CSE)
        g1n = relu(t - conv(conv(t, w1t) - x, w1s) + b1)
        return relu(g2 - conv(t - g1n, w2s) + b2)

    if T <= _UNROLL_MAX_T:
        # full unroll: gives the LLO scheduler cross-iteration visibility.
        for _ in range(T):
            g2 = iteration(g2)
    else:
        g2 = lax.fori_loop(0, T, lambda _, v: iteration(v), g2)

    o_ref[...] = g2
    # TODO(synk): BatchNorm running-stat updates (a training-mode side effect of
    # the PyTorch module) are not modeled; they do not affect the forward value.


# --------------------------------- wrapper -----------------------------------

def _pad_w(w, co_p, ci_p):
    """Zero-pad a (Co, Ci, 3, 3) conv weight to (co_p, ci_p, 3, 3)."""
    co, ci = w.shape[0], w.shape[1]
    return jnp.zeros((co_p, ci_p, 3, 3), jnp.float32).at[:co, :ci].set(
        w.astype(jnp.float32))


def _fwd_mat(w):
    """conv2d weight (Co, Ci, 3, 3) -> im2col matrix (Co, 9*Ci), tap-major."""
    co, ci = w.shape[0], w.shape[1]
    return jnp.transpose(w, (0, 2, 3, 1)).reshape(co, 9 * ci)


def _bwd_mat(w):
    """conv_transpose2d weight (Cout_fwd, Cin_fwd, 3, 3) -> equivalent SAME-conv
    im2col matrix (Cin_fwd, 9*Cout_fwd): spatial flip + in/out channel swap."""
    cof, cif = w.shape[0], w.shape[1]
    wf = w[:, :, ::-1, ::-1]
    return jnp.transpose(wf, (1, 2, 3, 0)).reshape(cif, 9 * cof)


def _tap_masks(n, h, w, c_pad, dtype):
    """(9, c_pad, n*h*w) validity masks for the 9 taps of a zero-padded 3x3 conv,
    pre-broadcast across channels so the kernel never emits broadcast_in_dim."""
    yy, xx = np.meshgrid(np.arange(h), np.arange(w), indexing="ij")
    rows = []
    for dy in (-1, 0, 1):
        for dx in (-1, 0, 1):
            ok = (yy + dy >= 0) & (yy + dy < h) & (xx + dx >= 0) & (xx + dx < w)
            rows.append(np.tile(ok.reshape(-1), n))
    m = np.stack(rows, axis=0).astype(np.float32)                       # (9, P)
    m = np.ascontiguousarray(np.broadcast_to(m[:, None, :], (9, c_pad, m.shape[-1])))
    return jnp.asarray(m, dtype=dtype)


def csc_block(x_nchw, W1, W2, c1, c2, b1, b2, T=1):
    N, Ci, H, W = x_nchw.shape
    Cm, Co = W1.shape[0], W2.shape[0]
    P = N * H * W
    Cp = ((max(Ci, Cm, Co) + _SUBLANE - 1) // _SUBLANE) * _SUBLANE

    # channels on sublanes (padded to 8), pixels (N*H*W) on lanes -> lane-dense.
    x_cp = jnp.zeros((Cp, P), jnp.float32).at[:Ci].set(
        jnp.transpose(x_nchw, (1, 0, 2, 3)).reshape(Ci, P).astype(jnp.float32))

    c1s = jnp.asarray(c1, jnp.float32).reshape(())
    c2s = jnp.asarray(c2, jnp.float32).reshape(())
    W1p = _pad_w(W1, Cp, Cp)
    W2p = _pad_w(W2, Cp, Cp)
    # fold c1/c2 into the FORWARD weights (in f32, before the bf16 cast); the
    # conv_transpose weights stay unscaled (the transpose conv has no c factor).
    w1m = _fwd_mat(c1s * W1p).astype(jnp.bfloat16)    # (Cp, 9*Cp)
    w1tm = _bwd_mat(W1p).astype(jnp.bfloat16)         # (Cp, 9*Cp)
    w2m = _fwd_mat(c2s * W2p).astype(jnp.bfloat16)
    w2tm = _bwd_mat(W2p).astype(jnp.bfloat16)

    # biases pre-broadcast to (Cp, P): no narrow (C,1) loads / broadcasts in-kernel.
    b1v = jnp.zeros((Cp, P), jnp.float32).at[:Cm, :].set(
        jnp.reshape(b1, (Cm, 1)).astype(jnp.float32))
    b2v = jnp.zeros((Cp, P), jnp.float32).at[:Co, :].set(
        jnp.reshape(b2, (Co, 1)).astype(jnp.float32))

    masks = _tap_masks(N, H, W, Cp, _TAP_DTYPE)

    vmem = pl.BlockSpec(memory_space=pltpu.MemorySpace.VMEM)
    # TODO(synk): production CSCUNet++ resolutions need a pixel-tiled grid with a
    # 1-row halo (parallel axis for the 2 TCs on v7x), a two-pass cross-tile
    # BatchNorm reduction, and per-tile masks; the 32 MiB vmem limit is the v7x
    # scoped ceiling -- on v5e/v6e it can be raised well past 32 MiB for bigger
    # pixel tiles.  At these test sizes whole-array VMEM residency is best.
    out_cp = pl.pallas_call(
        functools.partial(_csc_kernel, T, W),
        out_shape=jax.ShapeDtypeStruct((Cp, P), jnp.float32),
        in_specs=[vmem] * 8,
        out_specs=vmem,
        compiler_params=pltpu.CompilerParams(vmem_limit_bytes=32 * 1024 * 1024),
    )(x_cp, masks, w1m, w1tm, w2m, w2tm, b1v, b2v)

    return jnp.transpose(out_cp[:Co].reshape(Co, N, H, W), (1, 0, 2, 3))   # NCHW


# ------------------------- pure-JAX reference (check) -------------------------

def _conv_ref(x_nhwc, w_oihw):
    w = jnp.transpose(w_oihw, (2, 3, 1, 0))                           # HWIO
    return lax.conv_general_dilated(x_nhwc, w, (1, 1), 'SAME',
                                    dimension_numbers=('NHWC', 'HWIO', 'NHWC'))


def _convT_ref(y_nhwc, w_oihw):
    """True conv_transpose2d(stride=1, padding=1): the adjoint (vjp) of conv2d
    w.r.t. its input -- independent of the flipped-kernel fold used in-kernel."""
    n, h, w, _ = y_nhwc.shape
    x0 = jnp.zeros((n, h, w, w_oihw.shape[1]), y_nhwc.dtype)
    _, vjp = jax.vjp(lambda x: _conv_ref(x, w_oihw), x0)
    return vjp(y_nhwc)[0]


def _ref_forward(x_nhwc, W1, W2, c1, c2, b1, b2, T=1):
    bn = lambda y: (y - jnp.mean(y, axis=(0, 1, 2), keepdims=True)) / \
                   jnp.sqrt(jnp.var(y, axis=(0, 1, 2), keepdims=True) + BN_EPS)
    relu = jax.nn.relu
    c1s, c2s = c1.reshape(()), c2.reshape(())
    b1r, b2r = b1.reshape(1, 1, 1, -1), b2.reshape(1, 1, 1, -1)
    g1 = relu(bn(c1s * _conv_ref(x_nhwc, W1) + b1r))
    g2 = relu(bn(c2s * _conv_ref(g1, W2) + b2r))
    for _ in range(T):
        g1 = _convT_ref(g2, W2)
        g1 = relu(g1 - c1s * _conv_ref(_convT_ref(g1, W1) - x_nhwc, W1) + b1r)
        g2 = relu(g2 - c2s * _conv_ref(_convT_ref(g2, W2) - g1, W2) + b2r)
    return g2


# ----------------------------------- main -------------------------------------

if __name__ == "__main__":
    N, Ci, Cm, Co, H, W, T = 2, 4, 8, 4, 16, 16, 1
    key = jax.random.PRNGKey(0)
    k1, k2, k3, k4, k5 = jax.random.split(key, 5)

    # deterministic parameters consistent with the module's __init__ scaling;
    # c/b are perturbed from their (trivial) init so those paths are exercised.
    W1 = (0.1 / np.sqrt(Ci * 9)) * jax.random.normal(k1, (Cm, Ci, 3, 3), jnp.float32)
    W2 = (0.1 / np.sqrt(Cm * 9)) * jax.random.normal(k2, (Co, Cm, 3, 3), jnp.float32)
    c1 = jnp.full((1, 1, 1, 1), 1.1, jnp.float32)
    c2 = jnp.full((1, 1, 1, 1), 0.9, jnp.float32)
    b1 = 0.05 * jax.random.normal(k4, (1, Cm, 1, 1), jnp.float32)
    b2 = 0.05 * jax.random.normal(k5, (1, Co, 1, 1), jnp.float32)
    x = jax.random.normal(k3, (N, Ci, H, W), jnp.float32)

    out = jax.block_until_ready(csc_block(x, W1, W2, c1, c2, b1, b2, T=T))

    ref = _ref_forward(jnp.transpose(x, (0, 2, 3, 1)), W1, W2, c1, c2, b1, b2, T=T)
    ref = jnp.transpose(ref, (0, 3, 1, 2))
    max_err = float(jnp.max(jnp.abs(out - ref)))
    assert out.shape == (N, Co, H, W), out.shape
    # bf16 MXU operands + the 1/sigma BatchNorm amplification give an expected
    # worst-case deviation of ~1e-2 vs the f32 reference; structural bugs would
    # show up as O(0.1-1) errors, so 5e-2 still catches them.
    assert max_err < 5e-2, f"mismatch vs reference: max abs err {max_err}"

    print("KERNEL_OK")
</pallas_src>

<mosaic_0001>
module attributes {stable_mosaic.version = 11 : i64} {
  func.func @_csc_kernel(%arg0: memref<8x512xf32, #tpu.memory_space<vmem>>, %arg1: memref<9x8x512xbf16, #tpu.memory_space<vmem>>, %arg2: memref<8x72xbf16, #tpu.memory_space<vmem>>, %arg3: memref<8x72xbf16, #tpu.memory_space<vmem>>, %arg4: memref<8x72xbf16, #tpu.memory_space<vmem>>, %arg5: memref<8x72xbf16, #tpu.memory_space<vmem>>, %arg6: memref<8x512xf32, #tpu.memory_space<vmem>>, %arg7: memref<8x512xf32, #tpu.memory_space<vmem>>, %arg8: memref<8x512xf32, #tpu.memory_space<vmem>>) attributes {dimension_semantics = [], scalar_prefetch = 0 : i64, scratch_operands = 0 : i64, tpu.core_type = #tpu.core_type<tc>} {
    %c0 = arith.constant 0 : index
    %c0_0 = arith.constant 0 : index
    %0 = vector.load %arg0[%c0, %c0_0] : memref<8x512xf32, #tpu.memory_space<vmem>>, vector<8x512xf32>
    %c0_1 = arith.constant 0 : index
    %c0_2 = arith.constant 0 : index
    %1 = vector.load %arg2[%c0_1, %c0_2] : memref<8x72xbf16, #tpu.memory_space<vmem>>, vector<8x72xbf16>
    %c0_3 = arith.constant 0 : index
    %c0_4 = arith.constant 0 : index
    %2 = vector.load %arg3[%c0_3, %c0_4] : memref<8x72xbf16, #tpu.memory_space<vmem>>, vector<8x72xbf16>
    %c0_5 = arith.constant 0 : index
    %c0_6 = arith.constant 0 : index
    %3 = vector.load %arg4[%c0_5, %c0_6] : memref<8x72xbf16, #tpu.memory_space<vmem>>, vector<8x72xbf16>
    %c0_7 = arith.constant 0 : index
    %c0_8 = arith.constant 0 : index
    %4 = vector.load %arg5[%c0_7, %c0_8] : memref<8x72xbf16, #tpu.memory_space<vmem>>, vector<8x72xbf16>
    %c0_9 = arith.constant 0 : index
    %c0_10 = arith.constant 0 : index
    %5 = vector.load %arg6[%c0_9, %c0_10] : memref<8x512xf32, #tpu.memory_space<vmem>>, vector<8x512xf32>
    %c0_11 = arith.constant 0 : index
    %c0_12 = arith.constant 0 : index
    %6 = vector.load %arg7[%c0_11, %c0_12] : memref<8x512xf32, #tpu.memory_space<vmem>>, vector<8x512xf32>
    %c17_i32 = arith.constant 17 : i32
    %7 = tpu.dynamic_rotate %0 by %c17_i32 dim 1 : vector<8x512xf32>, i32 -> vector<8x512xf32>
    %8 = arith.truncf %7 : vector<8x512xf32> to vector<8x512xbf16>
    %c0_13 = arith.constant 0 : index
    %c0_14 = arith.constant 0 : index
    %c0_15 = arith.constant 0 : index
    %9 = vector.load %arg1[%c0_13, %c0_14, %c0_15] : memref<9x8x512xbf16, #tpu.memory_space<vmem>>, vector<1x8x512xbf16>
    %10 = vector.shape_cast %9 : vector<1x8x512xbf16> to vector<8x512xbf16>
    %11 = arith.mulf %8, %10 : vector<8x512xbf16>
    %c16_i32 = arith.constant 16 : i32
    %12 = tpu.dynamic_rotate %0 by %c16_i32 dim 1 : vector<8x512xf32>, i32 -> vector<8x512xf32>
    %13 = arith.truncf %12 : vector<8x512xf32> to vector<8x512xbf16>
    %c1 = arith.constant 1 : index
    %c0_16 = arith.constant 0 : index
    %c0_17 = arith.constant 0 : index
    %14 = vector.load %arg1[%c1, %c0_16, %c0_17] : memref<9x8x512xbf16, #tpu.memory_space<vmem>>, vector<1x8x512xbf16>
    %15 = vector.shape_cast %14 : vector<1x8x512xbf16> to vector<8x512xbf16>
    %16 = arith.mulf %13, %15 : vector<8x512xbf16>
    %c15_i32 = arith.constant 15 : i32
    %17 = tpu.dynamic_rotate %0 by %c15_i32 dim 1 : vector<8x512xf32>, i32 -> vector<8x512xf32>
    %18 = arith.truncf %17 : vector<8x512xf32> to vector<8x512xbf16>
    %c2 = arith.constant 2 : index
    %c0_18 = arith.constant 0 : index
    %c0_19 = arith.constant 0 : index
    %19 = vector.load %arg1[%c2, %c0_18, %c0_19] : memref<9x8x512xbf16, #tpu.memory_space<vmem>>, vector<1x8x512xbf16>
    %20 = vector.shape_cast %19 : vector<1x8x512xbf16> to vector<8x512xbf16>
    %21 = arith.mulf %18, %20 : vector<8x512xbf16>
    %c1_i32 = arith.constant 1 : i32
    %22 = tpu.dynamic_rotate %0 by %c1_i32 dim 1 : vector<8x512xf32>, i32 -> vector<8x512xf32>
    %23 = arith.truncf %22 : vector<8x512xf32> to vector<8x512xbf16>
    %c3 = arith.constant 3 : index
    %c0_20 = arith.constant 0 : index
    %c0_21 = arith.constant 0 : index
    %24 = vector.load %arg1[%c3, %c0_20, %c0_21] : memref<9x8x512xbf16, #tpu.memory_space<vmem>>, vector<1x8x512xbf16>
    %25 = vector.shape_cast %24 : vector<1x8x512xbf16> to vector<8x512xbf16>
    %26 = arith.mulf %23, %25 : vector<8x512xbf16>
    %27 = arith.truncf %0 : vector<8x512xf32> to vector<8x512xbf16>
    %c511_i32 = arith.constant 511 : i32
    %28 = tpu.dynamic_rotate %0 by %c511_i32 dim 1 : vector<8x512xf32>, i32 -> vector<8x512xf32>
    %29 = arith.truncf %28 : vector<8x512xf32> to vector<8x512xbf16>
    %c5 = arith.constant 5 : index
    %c0_22 = arith.constant 0 : index
    %c0_23 = arith.constant 0 : index
    %30 = vector.load %arg1[%c5, %c0_22, %c0_23] : memref<9x8x512xbf16, #tpu.memory_space<vmem>>, vector<1x8x512xbf16>
    %31 = vector.shape_cast %30 : vector<1x8x512xbf16> to vector<8x512xbf16>
    %32 = arith.mulf %29, %31 : vector<8x512xbf16>
    %c497_i32 = arith.constant 497 : i32
    %33 = tpu.dynamic_rotate %0 by %c497_i32 dim 1 : vector<8x512xf32>, i32 -> vector<8x512xf32>
    %34 = arith.truncf %33 : vector<8x512xf32> to vector<8x512xbf16>
    %c6 = arith.constant 6 : index
    %c0_24 = arith.constant 0 : index
    %c0_25 = arith.constant 0 : index
    %35 = vector.load %arg1[%c6, %c0_24, %c0_25] : memref<9x8x512xbf16, #tpu.memory_space<vmem>>, vector<1x8x512xbf16>
    %36 = vector.shape_cast %35 : vector<1x8x512xbf16> to vector<8x512xbf16>
    %37 = arith.mulf %34, %36 : vector<8x512xbf16>
    %c496_i32 = arith.constant 496 : i32
    %38 = tpu.dynamic_rotate %0 by %c496_i32 dim 1 : vector<8x512xf32>, i32 -> vector<8x512xf32>
    %39 = arith.truncf %38 : vector<8x512xf32> to vector<8x512xbf16>
    %c7 = arith.constant 7 : index
    %c0_26 = arith.constant 0 : index
    %c0_27 = arith.constant 0 : index
    %40 = vector.load %arg1[%c7, %c0_26, %c0_27] : memref<9x8x512xbf16, #tpu.memory_space<vmem>>, vector<1x8x512xbf16>
    %41 = vector.shape_cast %40 : vector<1x8x512xbf16> to vector<8x512xbf16>
    %42 = arith.mulf %39, %41 : vector<8x512xbf16>
    %c495_i32 = arith.constant 495 : i32
    %43 = tpu.dynamic_rotate %0 by %c495_i32 dim 1 : vector<8x512xf32>, i32 -> vector<8x512xf32>
    %44 = arith.truncf %43 : vector<8x512xf32> to vector<8x512xbf16>
    %c8 = arith.constant 8 : index
    %c0_28 = arith.constant 0 : index
    %c0_29 = arith.constant 0 : index
    %45 = vector.load %arg1[%c8, %c0_28, %c0_29] : memref<9x8x512xbf16, #tpu.memory_space<vmem>>, vector<1x8x512xbf16>
    %46 = vector.shape_cast %45 : vector<1x8x512xbf16> to vector<8x512xbf16>
    %47 = arith.mulf %44, %46 : vector<8x512xbf16>
    %48 = tpu.concatenate %11, %16, %21, %26, %27, %32, %37, %42, %47 in 0 : vector<8x512xbf16>, vector<8x512xbf16>, vector<8x512xbf16>, vector<8x512xbf16>, vector<8x512xbf16>, vector<8x512xbf16>, vector<8x512xbf16>, vector<8x512xbf16>, vector<8x512xbf16> -> vector<72x512xbf16>
    %cst = arith.constant dense<0.000000e+00> : vector<8x512xf32>
    %49 = tpu.matmul %1, %48, %cst {dimension_numbers = #tpu.dot_dimension_numbers<[1], [0], [0], [1], [0, 0, 1, 1], [], []>} : vector<8x72xbf16>, vector<72x512xbf16>, vector<8x512xf32> -> vector<8x512xf32>
    %cst_30 = arith.constant dense<0.000000e+00> : vector<8xf32>
    %50 = vector.multi_reduction <add>, %49, %cst_30 [1] : vector<8x512xf32> to vector<8xf32>
    %51 = vector.shape_cast %50 : vector<8xf32> to vector<8x1xf32>
    %cst_31 = arith.constant 0.001953125 : f32
    %52 = vector.broadcast %cst_31 : f32 to vector<8x1xf32>
    %53 = arith.mulf %51, %52 : vector<8x1xf32>
    %54 = vector.broadcast %53 : vector<8x1xf32> to vector<8x512xf32>
    %55 = arith.subf %49, %54 : vector<8x512xf32>
    %56 = arith.mulf %55, %55 : vector<8x512xf32>
    %cst_32 = arith.constant dense<0.000000e+00> : vector<8xf32>
    %57 = vector.multi_reduction <add>, %56, %cst_32 [1] : vector<8x512xf32> to vector<8xf32>
    %58 = vector.shape_cast %57 : vector<8xf32> to vector<8x1xf32>
    %cst_33 = arith.constant 0.001953125 : f32
    %59 = vector.broadcast %cst_33 : f32 to vector<8x1xf32>
    %60 = arith.mulf %58, %59 : vector<8x1xf32>
    %cst_34 = arith.constant 9.99999974E-6 : f32
    %61 = vector.broadcast %cst_34 : f32 to vector<8x1xf32>
    %62 = arith.addf %60, %61 : vector<8x1xf32>
    %63 = math.rsqrt %62 : vector<8x1xf32>
    %64 = vector.broadcast %63 : vector<8x1xf32> to vector<8x512xf32>
    %65 = arith.mulf %55, %64 : vector<8x512xf32>
    %cst_35 = arith.constant 0.000000e+00 : f32
    %66 = vector.broadcast %cst_35 : f32 to vector<8x512xf32>
    %67 = arith.maximumf %65, %66 : vector<8x512xf32>
    %c17_i32_36 = arith.constant 17 : i32
    %68 = tpu.dynamic_rotate %67 by %c17_i32_36 dim 1 : vector<8x512xf32>, i32 -> vector<8x512xf32>
    %69 = arith.truncf %68 : vector<8x512xf32> to vector<8x512xbf16>
    %c0_37 = arith.constant 0 : index
    %c0_38 = arith.constant 0 : index
    %c0_39 = arith.constant 0 : index
    %70 = vector.load %arg1[%c0_37, %c0_38, %c0_39] : memref<9x8x512xbf16, #tpu.memory_space<vmem>>, vector<1x8x512xbf16>
    %71 = vector.shape_cast %70 : vector<1x8x512xbf16> to vector<8x512xbf16>
    %72 = arith.mulf %69, %71 : vector<8x512xbf16>
    %c16_i32_40 = arith.constant 16 : i32
    %73 = tpu.dynamic_rotate %67 by %c16_i32_40 dim 1 : vector<8x512xf32>, i32 -> vector<8x512xf32>
    %74 = arith.truncf %73 : vector<8x512xf32> to vector<8x512xbf16>
    %c1_41 = arith.constant 1 : index
    %c0_42 = arith.constant 0 : index
    %c0_43 = arith.constant 0 : index
    %75 = vector.load %arg1[%c1_41, %c0_42, %c0_43] : memref<9x8x512xbf16, #tpu.memory_space<vmem>>, vector<1x8x512xbf16>
    %76 = vector.shape_cast %75 : vector<1x8x512xbf16> to vector<8x512xbf16>
    %77 = arith.mulf %74, %76 : vector<8x512xbf16>
    %c15_i32_44 = arith.constant 15 : i32
    %78 = tpu.dynamic_rotate %67 by %c15_i32_44 dim 1 : vector<8x512xf32>, i32 -> vector<8x512xf32>
    %79 = arith.truncf %78 : vector<8x512xf32> to vector<8x512xbf16>
    %c2_45 = arith.constant 2 : index
    %c0_46 = arith.constant 0 : index
    %c0_47 = arith.constant 0 : index
    %80 = vector.load %arg1[%c2_45, %c0_46, %c0_47] : memref<9x8x512xbf16, #tpu.memory_space<vmem>>, vector<1x8x512xbf16>
    %81 = vector.shape_cast %80 : vector<1x8x512xbf16> to vector<8x512xbf16>
    %82 = arith.mulf %79, %81 : vector<8x512xbf16>
    %c1_i32_48 = arith.constant 1 : i32
    %83 = tpu.dynamic_rotate %67 by %c1_i32_48 dim 1 : vector<8x512xf32>, i32 -> vector<8x512xf32>
    %84 = arith.truncf %83 : vector<8x512xf32> to vector<8x512xbf16>
    %c3_49 = arith.constant 3 : index
    %c0_50 = arith.constant 0 : index
    %c0_51 = arith.constant 0 : index
    %85 = vector.load %arg1[%c3_49, %c0_50, %c0_51] : memref<9x8x512xbf16, #tpu.memory_space<vmem>>, vector<1x8x512xbf16>
    %86 = vector.shape_cast %85 : vector<1x8x512xbf16> to vector<8x512xbf16>
    %87 = arith.mulf %84, %86 : vector<8x512xbf16>
    %88 = arith.truncf %67 : vector<8x512xf32> to vector<8x512xbf16>
    %c511_i32_52 = arith.constant 511 : i32
    %89 = tpu.dynamic_rotate %67 by %c511_i32_52 dim 1 : vector<8x512xf32>, i32 -> vector<8x512xf32>
    %90 = arith.truncf %89 : vector<8x512xf32> to vector<8x512xbf16>
    %c5_53 = arith.constant 5 : index
    %c0_54 = arith.constant 0 : index
    %c0_55 = arith.constant 0 : index
    %91 = vector.load %arg1[%c5_53, %c0_54, %c0_55] : memref<9x8x512xbf16, #tpu.memory_space<vmem>>, vector<1x8x512xbf16>
    %92 = vector.shape_cast %91 : vector<1x8x512xbf16> to vector<8x512xbf16>
    %93 = arith.mulf %90, %92 : vector<8x512xbf16>
    %c497_i32_56 = arith.constant 497 : i32
    %94 = tpu.dynamic_rotate %67 by %c497_i32_56 dim 1 : vector<8x512xf32>, i32 -> vector<8x512xf32>
    %95 = arith.truncf %94 : vector<8x512xf32> to vector<8x512xbf16>
    %c6_57 = arith.constant 6 : index
    %c0_58 = arith.constant 0 : index
    %c0_59 = arith.constant 0 : index
    %96 = vector.load %arg1[%c6_57, %c0_58, %c0_59] : memref<9x8x512xbf16, #tpu.memory_space<vmem>>, vector<1x8x512xbf16>
    %97 = vector.shape_cast %96 : vector<1x8x512xbf16> to vector<8x512xbf16>
    %98 = arith.mulf %95, %97 : vector<8x512xbf16>
    %c496_i32_60 = arith.constant 496 : i32
    %99 = tpu.dynamic_rotate %67 by %c496_i32_60 dim 1 : vector<8x512xf32>, i32 -> vector<8x512xf32>
    %100 = arith.truncf %99 : vector<8x512xf32> to vector<8x512xbf16>
    %c7_61 = arith.constant 7 : index
    %c0_62 = arith.constant 0 : index
    %c0_63 = arith.constant 0 : index
    %101 = vector.load %arg1[%c7_61, %c0_62, %c0_63] : memref<9x8x512xbf16, #tpu.memory_space<vmem>>, vector<1x8x512xbf16>
    %102 = vector.shape_cast %101 : vector<1x8x512xbf16> to vector<8x512xbf16>
    %103 = arith.mulf %100, %102 : vector<8x512xbf16>
    %c495_i32_64 = arith.constant 495 : i32
    %104 = tpu.dynamic_rotate %67 by %c495_i32_64 dim 1 : vector<8x512xf32>, i32 -> vector<8x512xf32>
    %105 = arith.truncf %104 : vector<8x512xf32> to vector<8x512xbf16>
    %c8_65 = arith.constant 8 : index
    %c0_66 = arith.constant 0 : index
    %c0_67 = arith.constant 0 : index
    %106 = vector.load %arg1[%c8_65, %c0_66, %c0_67] : memref<9x8x512xbf16, #tpu.memory_space<vmem>>, vector<1x8x512xbf16>
    %107 = vector.shape_cast %106 : vector<1x8x512xbf16> to vector<8x512xbf16>
    %108 = arith.mulf %105, %107 : vector<8x512xbf16>
    %109 = tpu.concatenate %72, %77, %82, %87, %88, %93, %98, %103, %108 in 0 : vector<8x512xbf16>, vector<8x512xbf16>, vector<8x512xbf16>, vector<8x512xbf16>, vector<8x512xbf16>, vector<8x512xbf16>, vector<8x512xbf16>, vector<8x512xbf16>, vector<8x512xbf16> -> vector<72x512xbf16>
    %cst_68 = arith.constant dense<0.000000e+00> : vector<8x512xf32>
    %110 = tpu.matmul %3, %109, %cst_68 {dimension_numbers = #tpu.dot_dimension_numbers<[1], [0], [0], [1], [0, 0, 1, 1], [], []>} : vector<8x72xbf16>, vector<72x512xbf16>, vector<8x512xf32> -> vector<8x512xf32>
    %cst_69 = arith.constant dense<0.000000e+00> : vector<8xf32>
    %111 = vector.multi_reduction <add>, %110, %cst_69 [1] : vector<8x512xf32> to vector<8xf32>
    %112 = vector.shape_cast %111 : vector<8xf32> to vector<8x1xf32>
    %cst_70 = arith.constant 0.001953125 : f32
    %113 = vector.broadcast %cst_70 : f32 to vector<8x1xf32>
    %114 = arith.mulf %112, %113 : vector<8x1xf32>
    %115 = vector.broadcast %114 : vector<8x1xf32> to vector<8x512xf32>
    %116 = arith.subf %110, %115 : vector<8x512xf32>
    %117 = arith.mulf %116, %116 : vector<8x512xf32>
    %cst_71 = arith.constant dense<0.000000e+00> : vector<8xf32>
    %118 = vector.multi_reduction <add>, %117, %cst_71 [1] : vector<8x512xf32> to vector<8xf32>
    %119 = vector.shape_cast %118 : vector<8xf32> to vector<8x1xf32>
    %cst_72 = arith.constant 0.001953125 : f32
    %120 = vector.broadcast %cst_72 : f32 to vector<8x1xf32>
    %121 = arith.mulf %119, %120 : vector<8x1xf32>
    %cst_73 = arith.constant 9.99999974E-6 : f32
    %122 = vector.broadcast %cst_73 : f32 to vector<8x1xf32>
    %123 = arith.addf %121, %122 : vector<8x1xf32>
    %124 = math.rsqrt %123 : vector<8x1xf32>
    %125 = vector.broadcast %124 : vector<8x1xf32> to vector<8x512xf32>
    %126 = arith.mulf %116, %125 : vector<8x512xf32>
    %cst_74 = arith.constant 0.000000e+00 : f32
    %127 = vector.broadcast %cst_74 : f32 to vector<8x512xf32>
    %128 = arith.maximumf %126, %127 : vector<8x512xf32>
    %c17_i32_75 = arith.constant 17 : i32
    %129 = tpu.dynamic_rotate %128 by %c17_i32_75 dim 1 : vector<8x512xf32>, i32 -> vector<8x512xf32>
    %130 = arith.truncf %129 : vector<8x512xf32> to vector<8x512xbf16>
    %c0_76 = arith.constant 0 : index
    %c0_77 = arith.constant 0 : index
    %c0_78 = arith.constant 0 : index
    %131 = vector.load %arg1[%c0_76, %c0_77, %c0_78] : memref<9x8x512xbf16, #tpu.memory_space<vmem>>, vector<1x8x512xbf16>
    %132 = vector.shape_cast %131 : vector<1x8x512xbf16> to vector<8x512xbf16>
    %133 = arith.mulf %130, %132 : vector<8x512xbf16>
    %c16_i32_79 = arith.constant 16 : i32
    %134 = tpu.dynamic_rotate %128 by %c16_i32_79 dim 1 : vector<8x512xf32>, i32 -> vector<8x512xf32>
    %135 = arith.truncf %134 : vector<8x512xf32> to vector<8x512xbf16>
    %c1_80 = arith.constant 1 : index
    %c0_81 = arith.constant 0 : index
    %c0_82 = arith.constant 0 : index
    %136 = vector.load %arg1[%c1_80, %c0_81, %c0_82] : memref<9x8x512xbf16, #tpu.memory_space<vmem>>, vector<1x8x512xbf16>
    %137 = vector.shape_cast %136 : vector<1x8x512xbf16> to vector<8x512xbf16>
    %138 = arith.mulf %135, %137 : vector<8x512xbf16>
    %c15_i32_83 = arith.constant 15 : i32
    %139 = tpu.dynamic_rotate %128 by %c15_i32_83 dim 1 : vector<8x512xf32>, i32 -> vector<8x512xf32>
    %140 = arith.truncf %139 : vector<8x512xf32> to vector<8x512xbf16>
    %c2_84 = arith.constant 2 : index
    %c0_85 = arith.constant 0 : index
    %c0_86 = arith.constant 0 : index
    %141 = vector.load %arg1[%c2_84, %c0_85, %c0_86] : memref<9x8x512xbf16, #tpu.memory_space<vmem>>, vector<1x8x512xbf16>
    %142 = vector.shape_cast %141 : vector<1x8x512xbf16> to vector<8x512xbf16>
    %143 = arith.mulf %140, %142 : vector<8x512xbf16>
    %c1_i32_87 = arith.constant 1 : i32
    %144 = tpu.dynamic_rotate %128 by %c1_i32_87 dim 1 : vector<8x512xf32>, i32 -> vector<8x512xf32>
    %145 = arith.truncf %144 : vector<8x512xf32> to vector<8x512xbf16>
    %c3_88 = arith.constant 3 : index
    %c0_89 = arith.constant 0 : index
    %c0_90 = arith.constant 0 : index
    %146 = vector.load %arg1[%c3_88, %c0_89, %c0_90] : memref<9x8x512xbf16, #tpu.memory_space<vmem>>, vector<1x8x512xbf16>
    %147 = vector.shape_cast %146 : vector<1x8x512xbf16> to vector<8x512xbf16>
    %148 = arith.mulf %145, %147 : vector<8x512xbf16>
    %149 = arith.truncf %128 : vector<8x512xf32> to vector<8x512xbf16>
    %c511_i32_91 = arith.constant 511 : i32
    %150 = tpu.dynamic_rotate %128 by %c511_i32_91 dim 1 : vector<8x512xf32>, i32 -> vector<8x512xf32>
    %151 = arith.truncf %150 : vector<8x512xf32> to vector<8x512xbf16>
    %c5_92 = arith.constant 5 : index
    %c0_93 = arith.constant 0 : index
    %c0_94 = arith.constant 0 : index
    %152 = vector.load %arg1[%c5_92, %c0_93, %c0_94] : memref<9x8x512xbf16, #tpu.memory_space<vmem>>, vector<1x8x512xbf16>
    %153 = vector.shape_cast %152 : vector<1x8x512xbf16> to vector<8x512xbf16>
    %154 = arith.mulf %151, %153 : vector<8x512xbf16>
    %c497_i32_95 = arith.constant 497 : i32
    %155 = tpu.dynamic_rotate %128 by %c497_i32_95 dim 1 : vector<8x512xf32>, i32 -> vector<8x512xf32>
    %156 = arith.truncf %155 : vector<8x512xf32> to vector<8x512xbf16>
    %c6_96 = arith.constant 6 : index
    %c0_97 = arith.constant 0 : index
    %c0_98 = arith.constant 0 : index
    %157 = vector.load %arg1[%c6_96, %c0_97, %c0_98] : memref<9x8x512xbf16, #tpu.memory_space<vmem>>, vector<1x8x512xbf16>
    %158 = vector.shape_cast %157 : vector<1x8x512xbf16> to vector<8x512xbf16>
    %159 = arith.mulf %156, %158 : vector<8x512xbf16>
    %c496_i32_99 = arith.constant 496 : i32
    %160 = tpu.dynamic_rotate %128 by %c496_i32_99 dim 1 : vector<8x512xf32>, i32 -> vector<8x512xf32>
    %161 = arith.truncf %160 : vector<8x512xf32> to vector<8x512xbf16>
    %c7_100 = arith.constant 7 : index
    %c0_101 = arith.constant 0 : index
    %c0_102 = arith.constant 0 : index
    %162 = vector.load %arg1[%c7_100, %c0_101, %c0_102] : memref<9x8x512xbf16, #tpu.memory_space<vmem>>, vector<1x8x512xbf16>
    %163 = vector.shape_cast %162 : vector<1x8x512xbf16> to vector<8x512xbf16>
    %164 = arith.mulf %161, %163 : vector<8x512xbf16>
    %c495_i32_103 = arith.constant 495 : i32
    %165 = tpu.dynamic_rotate %128 by %c495_i32_103 dim 1 : vector<8x512xf32>, i32 -> vector<8x512xf32>
    %166 = arith.truncf %165 : vector<8x512xf32> to vector<8x512xbf16>
    %c8_104 = arith.constant 8 : index
    %c0_105 = arith.constant 0 : index
    %c0_106 = arith.constant 0 : index
    %167 = vector.load %arg1[%c8_104, %c0_105, %c0_106] : memref<9x8x512xbf16, #tpu.memory_space<vmem>>, vector<1x8x512xbf16>
    %168 = vector.shape_cast %167 : vector<1x8x512xbf16> to vector<8x512xbf16>
    %169 = arith.mulf %166, %168 : vector<8x512xbf16>
    %170 = tpu.concatenate %133, %138, %143, %148, %149, %154, %159, %164, %169 in 0 : vector<8x512xbf16>, vector<8x512xbf16>, vector<8x512xbf16>, vector<8x512xbf16>, vector<8x512xbf16>, vector<8x512xbf16>, vector<8x512xbf16>, vector<8x512xbf16>, vector<8x512xbf16> -> vector<72x512xbf16>
    %cst_107 = arith.constant dense<0.000000e+00> : vector<8x512xf32>
    %171 = tpu.matmul %4, %170, %cst_107 {dimension_numbers = #tpu.dot_dimension_numbers<[1], [0], [0], [1], [0, 0, 1, 1], [], []>} : vector<8x72xbf16>, vector<72x512xbf16>, vector<8x512xf32> -> vector<8x512xf32>
    %c17_i32_108 = arith.constant 17 : i32
    %172 = tpu.dynamic_rotate %171 by %c17_i32_108 dim 1 : vector<8x512xf32>, i32 -> vector<8x512xf32>
    %173 = arith.truncf %172 : vector<8x512xf32> to vector<8x512xbf16>
    %c0_109 = arith.constant 0 : index
    %c0_110 = arith.constant 0 : index
    %c0_111 = arith.constant 0 : index
    %174 = vector.load %arg1[%c0_109, %c0_110, %c0_111] : memref<9x8x512xbf16, #tpu.memory_space<vmem>>, vector<1x8x512xbf16>
    %175 = vector.shape_cast %174 : vector<1x8x512xbf16> to vector<8x512xbf16>
    %176 = arith.mulf %173, %175 : vector<8x512xbf16>
    %c16_i32_112 = arith.constant 16 : i32
    %177 = tpu.dynamic_rotate %171 by %c16_i32_112 dim 1 : vector<8x512xf32>, i32 -> vector<8x512xf32>
    %178 = arith.truncf %177 : vector<8x512xf32> to vector<8x512xbf16>
    %c1_113 = arith.constant 1 : index
    %c0_114 = arith.constant 0 : index
    %c0_115 = arith.constant 0 : index
    %179 = vector.load %arg1[%c1_113, %c0_114, %c0_115] : memref<9x8x512xbf16, #tpu.memory_space<vmem>>, vector<1x8x512xbf16>
    %180 = vector.shape_cast %179 : vector<1x8x512xbf16> to vector<8x512xbf16>
    %181 = arith.mulf %178, %180 : vector<8x512xbf16>
    %c15_i32_116 = arith.constant 15 : i32
    %182 = tpu.dynamic_rotate %171 by %c15_i32_116 dim 1 : vector<8x512xf32>, i32 -> vector<8x512xf32>
    %183 = arith.truncf %182 : vector<8x512xf32> to vector<8x512xbf16>
    %c2_117 = arith.constant 2 : index
    %c0_118 = arith.constant 0 : index
    %c0_119 = arith.constant 0 : index
    %184 = vector.load %arg1[%c2_117, %c0_118, %c0_119] : memref<9x8x512xbf16, #tpu.memory_space<vmem>>, vector<1x8x512xbf16>
    %185 = vector.shape_cast %184 : vector<1x8x512xbf16> to vector<8x512xbf16>
    %186 = arith.mulf %183, %185 : vector<8x512xbf16>
    %c1_i32_120 = arith.constant 1 : i32
    %187 = tpu.dynamic_rotate %171 by %c1_i32_120 dim 1 : vector<8x512xf32>, i32 -> vector<8x512xf32>
    %188 = arith.truncf %187 : vector<8x512xf32> to vector<8x512xbf16>
    %c3_121 = arith.constant 3 : index
    %c0_122 = arith.constant 0 : index
    %c0_123 = arith.constant 0 : index
    %189 = vector.load %arg1[%c3_121, %c0_122, %c0_123] : memref<9x8x512xbf16, #tpu.memory_space<vmem>>, vector<1x8x512xbf16>
    %190 = vector.shape_cast %189 : vector<1x8x512xbf16> to vector<8x512xbf16>
    %191 = arith.mulf %188, %190 : vector<8x512xbf16>
    %192 = arith.truncf %171 : vector<8x512xf32> to vector<8x512xbf16>
    %c511_i32_124 = arith.constant 511 : i32
    %193 = tpu.dynamic_rotate %171 by %c511_i32_124 dim 1 : vector<8x512xf32>, i32 -> vector<8x512xf32>
    %194 = arith.truncf %193 : vector<8x512xf32> to vector<8x512xbf16>
    %c5_125 = arith.constant 5 : index
    %c0_126 = arith.constant 0 : index
    %c0_127 = arith.constant 0 : index
    %195 = vector.load %arg1[%c5_125, %c0_126, %c0_127] : memref<9x8x512xbf16, #tpu.memory_space<vmem>>, vector<1x8x512xbf16>
    %196 = vector.shape_cast %195 : vector<1x8x512xbf16> to vector<8x512xbf16>
    %197 = arith.mulf %194, %196 : vector<8x512xbf16>
    %c497_i32_128 = arith.constant 497 : i32
    %198 = tpu.dynamic_rotate %171 by %c497_i32_128 dim 1 : vector<8x512xf32>, i32 -> vector<8x512xf32>
    %199 = arith.truncf %198 : vector<8x512xf32> to vector<8x512xbf16>
    %c6_129 = arith.constant 6 : index
    %c0_130 = arith.constant 0 : index
    %c0_131 = arith.constant 0 : index
    %200 = vector.load %arg1[%c6_129, %c0_130, %c0_131] : memref<9x8x512xbf16, #tpu.memory_space<vmem>>, vector<1x8x512xbf16>
    %201 = vector.shape_cast %200 : vector<1x8x512xbf16> to vector<8x512xbf16>
    %202 = arith.mulf %199, %201 : vector<8x512xbf16>
    %c496_i32_132 = arith.constant 496 : i32
    %203 = tpu.dynamic_rotate %171 by %c496_i32_132 dim 1 : vector<8x512xf32>, i32 -> vector<8x512xf32>
    %204 = arith.truncf %203 : vector<8x512xf32> to vector<8x512xbf16>
    %c7_133 = arith.constant 7 : index
    %c0_134 = arith.constant 0 : index
    %c0_135 = arith.constant 0 : index
    %205 = vector.load %arg1[%c7_133, %c0_134, %c0_135] : memref<9x8x512xbf16, #tpu.memory_space<vmem>>, vector<1x8x512xbf16>
    %206 = vector.shape_cast %205 : vector<1x8x512xbf16> to vector<8x512xbf16>
    %207 = arith.mulf %204, %206 : vector<8x512xbf16>
    %c495_i32_136 = arith.constant 495 : i32
    %208 = tpu.dynamic_rotate %171 by %c495_i32_136 dim 1 : vector<8x512xf32>, i32 -> vector<8x512xf32>
    %209 = arith.truncf %208 : vector<8x512xf32> to vector<8x512xbf16>
    %c8_137 = arith.constant 8 : index
    %c0_138 = arith.constant 0 : index
    %c0_139 = arith.constant 0 : index
    %210 = vector.load %arg1[%c8_137, %c0_138, %c0_139] : memref<9x8x512xbf16, #tpu.memory_space<vmem>>, vector<1x8x512xbf16>
    %211 = vector.shape_cast %210 : vector<1x8x512xbf16> to vector<8x512xbf16>
    %212 = arith.mulf %209, %211 : vector<8x512xbf16>
    %213 = tpu.concatenate %176, %181, %186, %191, %192, %197, %202, %207, %212 in 0 : vector<8x512xbf16>, vector<8x512xbf16>, vector<8x512xbf16>, vector<8x512xbf16>, vector<8x512xbf16>, vector<8x512xbf16>, vector<8x512xbf16>, vector<8x512xbf16>, vector<8x512xbf16> -> vector<72x512xbf16>
    %cst_140 = arith.constant dense<0.000000e+00> : vector<8x512xf32>
    %214 = tpu.matmul %2, %213, %cst_140 {dimension_numbers = #tpu.dot_dimension_numbers<[1], [0], [0], [1], [0, 0, 1, 1], [], []>} : vector<8x72xbf16>, vector<72x512xbf16>, vector<8x512xf32> -> vector<8x512xf32>
    %215 = arith.subf %214, %0 : vector<8x512xf32>
    %c17_i32_141 = arith.constant 17 : i32
    %216 = tpu.dynamic_rotate %215 by %c17_i32_141 dim 1 : vector<8x512xf32>, i32 -> vector<8x512xf32>
    %217 = arith.truncf %216 : vector<8x512xf32> to vector<8x512xbf16>
    %c0_142 = arith.constant 0 : index
    %c0_143 = arith.constant 0 : index
    %c0_144 = arith.constant 0 : index
    %218 = vector.load %arg1[%c0_142, %c0_143, %c0_144] : memref<9x8x512xbf16, #tpu.memory_space<vmem>>, vector<1x8x512xbf16>
    %219 = vector.shape_cast %218 : vector<1x8x512xbf16> to vector<8x512xbf16>
    %220 = arith.mulf %217, %219 : vector<8x512xbf16>
    %c16_i32_145 = arith.constant 16 : i32
    %221 = tpu.dynamic_rotate %215 by %c16_i32_145 dim 1 : vector<8x512xf32>, i32 -> vector<8x512xf32>
    %222 = arith.truncf %221 : vector<8x512xf32> to vector<8x512xbf16>
    %c1_146 = arith.constant 1 : index
    %c0_147 = arith.constant 0 : index
    %c0_148 = arith.constant 0 : index
    %223 = vector.load %arg1[%c1_146, %c0_147, %c0_148] : memref<9x8x512xbf16, #tpu.memory_space<vmem>>, vector<1x8x512xbf16>
    %224 = vector.shape_cast %223 : vector<1x8x512xbf16> to vector<8x512xbf16>
    %225 = arith.mulf %222, %224 : vector<8x512xbf16>
    %c15_i32_149 = arith.constant 15 : i32
    %226 = tpu.dynamic_rotate %215 by %c15_i32_149 dim 1 : vector<8x512xf32>, i32 -> vector<8x512xf32>
    %227 = arith.truncf %226 : vector<8x512xf32> to vector<8x512xbf16>
    %c2_150 = arith.constant 2 : index
    %c0_151 = arith.constant 0 : index
    %c0_152 = arith.constant 0 : index
    %228 = vector.load %arg1[%c2_150, %c0_151, %c0_152] : memref<9x8x512xbf16, #tpu.memory_space<vmem>>, vector<1x8x512xbf16>
    %229 = vector.shape_cast %228 : vector<1x8x512xbf16> to vector<8x512xbf16>
    %230 = arith.mulf %227, %229 : vector<8x512xbf16>
    %c1_i32_153 = arith.constant 1 : i32
    %231 = tpu.dynamic_rotate %215 by %c1_i32_153 dim 1 : vector<8x512xf32>, i32 -> vector<8x512xf32>
    %232 = arith.truncf %231 : vector<8x512xf32> to vector<8x512xbf16>
    %c3_154 = arith.constant 3 : index
    %c0_155 = arith.constant 0 : index
    %c0_156 = arith.constant 0 : index
    %233 = vector.load %arg1[%c3_154, %c0_155, %c0_156] : memref<9x8x512xbf16, #tpu.memory_space<vmem>>, vector<1x8x512xbf16>
    %234 = vector.shape_cast %233 : vector<1x8x512xbf16> to vector<8x512xbf16>
    %235 = arith.mulf %232, %234 : vector<8x512xbf16>
    %236 = arith.truncf %215 : vector<8x512xf32> to vector<8x512xbf16>
    %c511_i32_157 = arith.constant 511 : i32
    %237 = tpu.dynamic_rotate %215 by %c511_i32_157 dim 1 : vector<8x512xf32>, i32 -> vector<8x512xf32>
    %238 = arith.truncf %237 : vector<8x512xf32> to vector<8x512xbf16>
    %c5_158 = arith.constant 5 : index
    %c0_159 = arith.constant 0 : index
    %c0_160 = arith.constant 0 : index
    %239 = vector.load %arg1[%c5_158, %c0_159, %c0_160] : memref<9x8x512xbf16, #tpu.memory_space<vmem>>, vector<1x8x512xbf16>
    %240 = vector.shape_cast %239 : vector<1x8x512xbf16> to vector<8x512xbf16>
    %241 = arith.mulf %238, %240 : vector<8x512xbf16>
    %c497_i32_161 = arith.constant 497 : i32
    %242 = tpu.dynamic_rotate %215 by %c497_i32_161 dim 1 : vector<8x512xf32>, i32 -> vector<8x512xf32>
    %243 = arith.truncf %242 : vector<8x512xf32> to vector<8x512xbf16>
    %c6_162 = arith.constant 6 : index
    %c0_163 = arith.constant 0 : index
    %c0_164 = arith.constant 0 : index
    %244 = vector.load %arg1[%c6_162, %c0_163, %c0_164] : memref<9x8x512xbf16, #tpu.memory_space<vmem>>, vector<1x8x512xbf16>
    %245 = vector.shape_cast %244 : vector<1x8x512xbf16> to vector<8x512xbf16>
    %246 = arith.mulf %243, %245 : vector<8x512xbf16>
    %c496_i32_165 = arith.constant 496 : i32
    %247 = tpu.dynamic_rotate %215 by %c496_i32_165 dim 1 : vector<8x512xf32>, i32 -> vector<8x512xf32>
    %248 = arith.truncf %247 : vector<8x512xf32> to vector<8x512xbf16>
    %c7_166 = arith.constant 7 : index
    %c0_167 = arith.constant 0 : index
    %c0_168 = arith.constant 0 : index
    %249 = vector.load %arg1[%c7_166, %c0_167, %c0_168] : memref<9x8x512xbf16, #tpu.memory_space<vmem>>, vector<1x8x512xbf16>
    %250 = vector.shape_cast %249 : vector<1x8x512xbf16> to vector<8x512xbf16>
    %251 = arith.mulf %248, %250 : vector<8x512xbf16>
    %c495_i32_169 = arith.constant 495 : i32
    %252 = tpu.dynamic_rotate %215 by %c495_i32_169 dim 1 : vector<8x512xf32>, i32 -> vector<8x512xf32>
    %253 = arith.truncf %252 : vector<8x512xf32> to vector<8x512xbf16>
    %c8_170 = arith.constant 8 : index
    %c0_171 = arith.constant 0 : index
    %c0_172 = arith.constant 0 : index
    %254 = vector.load %arg1[%c8_170, %c0_171, %c0_172] : memref<9x8x512xbf16, #tpu.memory_space<vmem>>, vector<1x8x512xbf16>
    %255 = vector.shape_cast %254 : vector<1x8x512xbf16> to vector<8x512xbf16>
    %256 = arith.mulf %253, %255 : vector<8x512xbf16>
    %257 = tpu.concatenate %220, %225, %230, %235, %236, %241, %246, %251, %256 in 0 : vector<8x512xbf16>, vector<8x512xbf16>, vector<8x512xbf16>, vector<8x512xbf16>, vector<8x512xbf16>, vector<8x512xbf16>, vector<8x512xbf16>, vector<8x512xbf16>, vector<8x512xbf16> -> vector<72x512xbf16>
    %cst_173 = arith.constant dense<0.000000e+00> : vector<8x512xf32>
    %258 = tpu.matmul %1, %257, %cst_173 {dimension_numbers = #tpu.dot_dimension_numbers<[1], [0], [0], [1], [0, 0, 1, 1], [], []>} : vector<8x72xbf16>, vector<72x512xbf16>, vector<8x512xf32> -> vector<8x512xf32>
    %259 = arith.subf %171, %258 : vector<8x512xf32>
    %260 = arith.addf %259, %5 : vector<8x512xf32>
    %cst_174 = arith.constant 0.000000e+00 : f32
    %261 = vector.broadcast %cst_174 : f32 to vector<8x512xf32>
    %262 = arith.maximumf %260, %261 : vector<8x512xf32>
    %263 = arith.subf %171, %262 : vector<8x512xf32>
    %c17_i32_175 = arith.constant 17 : i32
    %264 = tpu.dynamic_rotate %263 by %c17_i32_175 dim 1 : vector<8x512xf32>, i32 -> vector<8x512xf32>
    %265 = arith.truncf %264 : vector<8x512xf32> to vector<8x512xbf16>
    %c0_176 = arith.constant 0 : index
    %c0_177 = arith.constant 0 : index
    %c0_178 = arith.constant 0 : index
    %266 = vector.load %arg1[%c0_176, %c0_177, %c0_178] : memref<9x8x512xbf16, #tpu.memory_space<vmem>>, vector<1x8x512xbf16>
    %267 = vector.shape_cast %266 : vector<1x8x512xbf16> to vector<8x512xbf16>
    %268 = arith.mulf %265, %267 : vector<8x512xbf16>
    %c16_i32_179 = arith.constant 16 : i32
    %269 = tpu.dynamic_rotate %263 by %c16_i32_179 dim 1 : vector<8x512xf32>, i32 -> vector<8x512xf32>
    %270 = arith.truncf %269 : vector<8x512xf32> to vector<8x512xbf16>
    %c1_180 = arith.constant 1 : index
    %c0_181 = arith.constant 0 : index
    %c0_182 = arith.constant 0 : index
    %271 = vector.load %arg1[%c1_180, %c0_181, %c0_182] : memref<9x8x512xbf16, #tpu.memory_space<vmem>>, vector<1x8x512xbf16>
    %272 = vector.shape_cast %271 : vector<1x8x512xbf16> to vector<8x512xbf16>
    %273 = arith.mulf %270, %272 : vector<8x512xbf16>
    %c15_i32_183 = arith.constant 15 : i32
    %274 = tpu.dynamic_rotate %263 by %c15_i32_183 dim 1 : vector<8x512xf32>, i32 -> vector<8x512xf32>
    %275 = arith.truncf %274 : vector<8x512xf32> to vector<8x512xbf16>
    %c2_184 = arith.constant 2 : index
    %c0_185 = arith.constant 0 : index
    %c0_186 = arith.constant 0 : index
    %276 = vector.load %arg1[%c2_184, %c0_185, %c0_186] : memref<9x8x512xbf16, #tpu.memory_space<vmem>>, vector<1x8x512xbf16>
    %277 = vector.shape_cast %276 : vector<1x8x512xbf16> to vector<8x512xbf16>
    %278 = arith.mulf %275, %277 : vector<8x512xbf16>
    %c1_i32_187 = arith.constant 1 : i32
    %279 = tpu.dynamic_rotate %263 by %c1_i32_187 dim 1 : vector<8x512xf32>, i32 -> vector<8x512xf32>
    %280 = arith.truncf %279 : vector<8x512xf32> to vector<8x512xbf16>
    %c3_188 = arith.constant 3 : index
    %c0_189 = arith.constant 0 : index
    %c0_190 = arith.constant 0 : index
    %281 = vector.load %arg1[%c3_188, %c0_189, %c0_190] : memref<9x8x512xbf16, #tpu.memory_space<vmem>>, vector<1x8x512xbf16>
    %282 = vector.shape_cast %281 : vector<1x8x512xbf16> to vector<8x512xbf16>
    %283 = arith.mulf %280, %282 : vector<8x512xbf16>
    %284 = arith.truncf %263 : vector<8x512xf32> to vector<8x512xbf16>
    %c511_i32_191 = arith.constant 511 : i32
    %285 = tpu.dynamic_rotate %263 by %c511_i32_191 dim 1 : vector<8x512xf32>, i32 -> vector<8x512xf32>
    %286 = arith.truncf %285 : vector<8x512xf32> to vector<8x512xbf16>
    %c5_192 = arith.constant 5 : index
    %c0_193 = arith.constant 0 : index
    %c0_194 = arith.constant 0 : index
    %287 = vector.load %arg1[%c5_192, %c0_193, %c0_194] : memref<9x8x512xbf16, #tpu.memory_space<vmem>>, vector<1x8x512xbf16>
    %288 = vector.shape_cast %287 : vector<1x8x512xbf16> to vector<8x512xbf16>
    %289 = arith.mulf %286, %288 : vector<8x512xbf16>
    %c497_i32_195 = arith.constant 497 : i32
    %290 = tpu.dynamic_rotate %263 by %c497_i32_195 dim 1 : vector<8x512xf32>, i32 -> vector<8x512xf32>
    %291 = arith.truncf %290 : vector<8x512xf32> to vector<8x512xbf16>
    %c6_196 = arith.constant 6 : index
    %c0_197 = arith.constant 0 : index
    %c0_198 = arith.constant 0 : index
    %292 = vector.load %arg1[%c6_196, %c0_197, %c0_198] : memref<9x8x512xbf16, #tpu.memory_space<vmem>>, vector<1x8x512xbf16>
    %293 = vector.shape_cast %292 : vector<1x8x512xbf16> to vector<8x512xbf16>
    %294 = arith.mulf %291, %293 : vector<8x512xbf16>
    %c496_i32_199 = arith.constant 496 : i32
    %295 = tpu.dynamic_rotate %263 by %c496_i32_199 dim 1 : vector<8x512xf32>, i32 -> vector<8x512xf32>
    %296 = arith.truncf %295 : vector<8x512xf32> to vector<8x512xbf16>
    %c7_200 = arith.constant 7 : index
    %c0_201 = arith.constant 0 : index
    %c0_202 = arith.constant 0 : index
    %297 = vector.load %arg1[%c7_200, %c0_201, %c0_202] : memref<9x8x512xbf16, #tpu.memory_space<vmem>>, vector<1x8x512xbf16>
    %298 = vector.shape_cast %297 : vector<1x8x512xbf16> to vector<8x512xbf16>
    %299 = arith.mulf %296, %298 : vector<8x512xbf16>
    %c495_i32_203 = arith.constant 495 : i32
    %300 = tpu.dynamic_rotate %263 by %c495_i32_203 dim 1 : vector<8x512xf32>, i32 -> vector<8x512xf32>
    %301 = arith.truncf %300 : vector<8x512xf32> to vector<8x512xbf16>
    %c8_204 = arith.constant 8 : index
    %c0_205 = arith.constant 0 : index
    %c0_206 = arith.constant 0 : index
    %302 = vector.load %arg1[%c8_204, %c0_205, %c0_206] : memref<9x8x512xbf16, #tpu.memory_space<vmem>>, vector<1x8x512xbf16>
    %303 = vector.shape_cast %302 : vector<1x8x512xbf16> to vector<8x512xbf16>
    %304 = arith.mulf %301, %303 : vector<8x512xbf16>
    %305 = tpu.concatenate %268, %273, %278, %283, %284, %289, %294, %299, %304 in 0 : vector<8x512xbf16>, vector<8x512xbf16>, vector<8x512xbf16>, vector<8x512xbf16>, vector<8x512xbf16>, vector<8x512xbf16>, vector<8x512xbf16>, vector<8x512xbf16>, vector<8x512xbf16> -> vector<72x512xbf16>
    %cst_207 = arith.constant dense<0.000000e+00> : vector<8x512xf32>
    %306 = tpu.matmul %3, %305, %cst_207 {dimension_numbers = #tpu.dot_dimension_numbers<[1], [0], [0], [1], [0, 0, 1, 1], [], []>} : vector<8x72xbf16>, vector<72x512xbf16>, vector<8x512xf32> -> vector<8x512xf32>
    %307 = arith.subf %128, %306 : vector<8x512xf32>
    %308 = arith.addf %307, %6 : vector<8x512xf32>
    %cst_208 = arith.constant 0.000000e+00 : f32
    %309 = vector.broadcast %cst_208 : f32 to vector<8x512xf32>
    %310 = arith.maximumf %308, %309 : vector<8x512xf32>
    %c0_209 = arith.constant 0 : index
    %c0_210 = arith.constant 0 : index
    %311 = vector.load %arg8[%c0_209, %c0_210] : memref<8x512xf32, #tpu.memory_space<vmem>>, vector<8x512xf32>
    tpu.vector_store %arg8[%c0_209, %c0_210], %310 {strides = array<i32>} : memref<8x512xf32, #tpu.memory_space<vmem>>, vector<8x512xf32>,
    return
  }
}

</mosaic_0001>

<bundles_post_ra>
// kernel: tpu_custom_call.1
= control target key start
LH: loop header
LB: loop body
LE: loop exit
PB: predicated region body
PF: predicated region fallthrough
CT: control target
= control target key end

     0   :  { %13 = vsyncpa [#allocation3], 0  ;;  %s5038_s0 = inlined_call_operand.hbm [shape: f32[8,512], index: 0, kind: input, shape index: {}]   ;;  %s5039_s1 = inlined_call_operand.hbm [shape: bf16[9,8,512], index: 1, kind: input, shape index: {}]   ;;  %s5040_s2 = inlined_call_operand.hbm [shape: bf16[8,72], index: 2, kind: input, shape index: {}]   ;;  %s5041_s3 = inlined_call_operand.hbm [shape: bf16[8,72], index: 3, kind: input, shape index: {}]   ;;  %s5042_s4 = inlined_call_operand.hbm [shape: bf16[8,72], index: 4, kind: input, shape index: {}]   ;;  %s5043_s5 = inlined_call_operand.vmem [shape: bf16[8,72], index: 5, kind: input, shape index: {}]   ;;  %s5044_s6 = inlined_call_operand.hbm [shape: f32[8,512], index: 6, kind: input, shape index: {}]   ;;  %s5045_s7 = inlined_call_operand.hbm [shape: f32[8,512], index: 7, kind: input, shape index: {}]   ;;  %s5046_s8 = inlined_call_operand.hbm [shape: f32[8,512], index: 8, kind: output, shape index: {}]  }
   0x1   :  { %14 = vsyncpa [#allocation6], 0 }
   0x2   :  { %15 = vsyncpa [#allocation9], 0 }
   0x3   :  { %16 = vsyncpa [#allocation12], 0  ;;  %s33_s29 = sshll.u32 %s5039_s1, 4  ;;  %s34_s29 = int_to_ptr.hbm [resolvable:$true] %s33_s29 }
   0x4   :  { %17 = vsyncpa [#allocation4], 0  ;;  %s3492_s30 = smov [#allocation5]   ;;  %s58_s12 = sshll.u32 %s5041_s3, 4  ;;  %s59_s12 = int_to_ptr.hbm [resolvable:$true] %s58_s12 }
   0x5   :  { %s35_s9 = sshll.u32 %s3492_s30, 4  ;;  %s3493_s13 = smov 256   ;;  %s36_s9 = int_to_ptr.vmem [resolvable:$true] %s35_s9 }
   0x6   :  { %s3494_s14 = smov 16   ;;  %s3495_s15 = smov [#allocation8]  }
   0x7   :  { %41 = dma.hbm_to_vmem [thread:$0]  %s34_s29, 2304, %s36_s9, [#allocation6], %s3493_s13, %s3493_s13, %s3494_s14  }
   0x8   :  { %s60_s16 = sshll.u32 %s3495_s15, 4  ;;  %s82_s1 = sshll.u32 %s5044_s6, 4  ;;  %s61_s16 = int_to_ptr.vmem [resolvable:$true] %s60_s16  ;;  %s83_s1 = int_to_ptr.hbm [resolvable:$true] %s82_s1 }
   0x9   :  { %63 = dma.hbm_to_vmem [thread:$0]  %s59_s12, 64, %s61_s16, [#allocation9]  }
   0xa   :  { %s23_s21 = sshll.u32 %s5038_s0, 4  ;;  %s3496_s22 = smov [#allocation11]   ;;  %s24_s21 = int_to_ptr.hbm [resolvable:$true] %s23_s21 }
   0xb   :  { %s84_s3 = sshll.u32 %s3496_s22, 4  ;;  %s3497_s23 = smov [#allocation2]   ;;  %s85_s3 = int_to_ptr.vmem [resolvable:$true] %s84_s3 }
   0xc   :  { %87 = dma.hbm_to_vmem [thread:$0]  %s83_s1, 512, %s85_s3, [#allocation12]  }
   0xd   :  { %s25_s24 = sshll.u32 %s3497_s23, 4  ;;  %s47_s27 = sshll.u32 %s5040_s2, 4  ;;  %s26_s24 = int_to_ptr.vmem [resolvable:$true] %s25_s24  ;;  %s48_s27 = int_to_ptr.hbm [resolvable:$true] %s47_s27 }
   0xe   :  { %28 = dma.hbm_to_vmem [thread:$0]  %s24_s21, 512, %s26_s24, [#allocation3]  }
   0xf   :  { %s69_s29 = sshll.u32 %s5042_s4, 4  ;;  %s3498_s30 = smov [#allocation7]   ;;  %s70_s29 = int_to_ptr.hbm [resolvable:$true] %s69_s29 }
  0x10   :  { %s49_s0 = sshll.u32 %s3498_s30, 4  ;;  %s3499_s9 = smov [#allocation10]   ;;  %s50_s0 = int_to_ptr.vmem [resolvable:$true] %s49_s0 }
  0x11   :  { %52 = dma.hbm_to_vmem [thread:$0]  %s48_s27, 64, %s50_s0, [#allocation6]  }
  0x12   :  { %s71_s10 = sshll.u32 %s3499_s9, 4  ;;  %s93_s13 = sshll.u32 %s5045_s7, 4  ;;  %s72_s10 = int_to_ptr.vmem [resolvable:$true] %s71_s10  ;;  %s94_s13 = int_to_ptr.hbm [resolvable:$true] %s93_s13 }
  0x13   :  { %74 = dma.hbm_to_vmem [thread:$0]  %s70_s29, 64, %s72_s10, [#allocation9]  }
  0x14   :  { %s3500_s2 = smov [#allocation13]  }
  0x15   :  { %s95_s15 = sshll.u32 %s3500_s2, 4  ;;  %s96_s15 = int_to_ptr.vmem [resolvable:$true] %s95_s15 }
  0x16   :  { %98 = dma.hbm_to_vmem [thread:$0]  %s94_s13, 512, %s96_s15, [#allocation12]  }
  0x17   :  { %3482 = dma.done.wait [#allocation3], 512  }
  0x18   :  { %3483 = vsyncadd [#allocation3], 4294966784 }
  0x19   :  { %3484 = dma.done.wait [#allocation6], 2368  }
  0x1a   :  { %3485 = vsyncadd [#allocation6], 4294964928 }
  0x1b   :  { %3486 = dma.done.wait [#allocation9], 128  }
  0x1c   :  { %3487 = vsyncadd [#allocation9], 4294967168 }
  0x1d   :  { %3488 = dma.done.wait [#allocation12], 1024  }
  0x1e   :  { %3489 = vsyncadd [#allocation12], 4294966272  ;;  %v3576_v0 = vld [vmem:[#allocation2] sm:$0xff]  ;;  %v3578_v1 = vld [vmem:[#allocation2 + $0x10] sm:$0xff]  ;;  %s3501_s4 = smov 113   ;;  %s3502_s7 = smov 111   ;;  %v152_v9 = vlaneseq }
  0x1f   :  { %v2880_v2 = vpack.i.bf16 %v3578_v1, %v3576_v0  ;;  %v3584_v3 = vld [vmem:[#allocation2 + $0x8] sm:$0xff]  ;;  %v3586_v4 = vld [vmem:[#allocation2 + $0x18] sm:$0xff]  ;;  %s3503_s16 = smov 112   ;;  %s3504_s17 = smov 127   ;;  %v355_v22 = vld [vmem:[#allocation5 + $0x70] sm:$0xff]  ;;  %vm493_vm6 = vcmask 1043456  }
  0x20   :  { %v2885_v5 = vpack.i.bf16 %v3584_v3, %v3586_v4  ;;  %v2910_v6 = vpack.i.bf16 %v3578_v1, %v3584_v3  ;;  %s3505_s18 = smov 15   ;;  %v2915_v7 = vpack.i.bf16 %v3576_v0, %v3586_v4  ;;  %s3506_s1 = smov 1   ;;  %v3611_v10 = vand.u32 127, %v152_v9  ;;  %v356_v24 = vld [vmem:[#allocation5 + $0x78] sm:$0xff]  ;;  %v387_v38 = vld [vmem:[#allocation5 + $0x80] sm:$0xff]  ;;  %v388_v39 = vld [vmem:[#allocation5 + $0x88] sm:$0xff] }
  0x21   :  { %2881 = vrot.lane.b32.xlu1 %v2880_v2, %s3501_s4  ;;  %2871 = vrot.lane.b32.xlu0 %v2880_v2, %s3502_s7  ;;  %s3507_s19 = smov 17   ;;  %v3622_v23 = vunpack.c.l.bf16 %v355_v22  ;;  %v3624_v29 = vunpack.c.h.bf16 %v355_v22  ;;  %v3626_v30 = vunpack.c.l.bf16 %v356_v24  ;;  %v3631_v33 = vunpack.c.h.bf16 %v356_v24  ;;  %v323_v40 = vld [vmem:[#allocation5 + $0x60] sm:$0xff]  ;;  %v324_v48 = vld [vmem:[#allocation5 + $0x68] sm:$0xff]  ;;  %v291_v63 = vld [vmem:[#allocation5 + $0x50] sm:$0xff]  ;;  %s2816_s23 = sshll.u32 %s5046_s8, 4  ;;  %s2817_s23 = int_to_ptr.hbm [resolvable:$true] %s2816_s23 }
  0x22   :  { %2891 = vrot.lane.b32.xlu2 %v2880_v2, %s3503_s16  ;;  %vm347_vm0 = vcmp.lt.s32.totalorder %v3611_v10, 112  ;;  %vm315_vm1 = vcmp.lt.s32.totalorder %v3611_v10, 113  ;;  %vm379_vm2 = vcmp.lt.s32.totalorder %v3611_v10, 111  ;;  %vm217_vm3 = vcmp.lt.s32.totalorder %v3611_v10, 15 }
  0x23   :  { %5089 = vst [vmem:[#allocation20_spill] sm:$0xff] %v3622_v23  ;;  %v3643_v49 = vunpack.c.l.bf16 %v387_v38  ;;  %v3645_v50 = vunpack.c.h.bf16 %v387_v38  ;;  %vm249_vm4 = vcmp.lt.s32.totalorder %v3611_v10, 1  ;;  %v3648_v51 = vunpack.c.l.bf16 %v388_v39 }
  0x24   :  { %5090 = vst [vmem:[#allocation21_spill] sm:$0xff] %v3624_v29  ;;  %v3650_v52 = vunpack.c.h.bf16 %v388_v39  ;;  %v3652_v53 = vunpack.c.l.bf16 %v323_v40  ;;  %v3656_v55 = vunpack.c.h.bf16 %v323_v40  ;;  %v3658_v56 = vunpack.c.l.bf16 %v324_v48 }
  0x25   :  { %5091 = vst [vmem:[#allocation22_spill] sm:$0xff] %v3626_v30  ;;  %v3672_v62 = vunpack.c.h.bf16 %v324_v48  ;;  %vm283_vm5 = vcmp.lt.s32.totalorder %v3611_v10, 127  ;;  %vm154_vm7 = vcmp.lt.s32.totalorder %v3611_v10, 17  ;;  %vm185_vm8 = vcmp.lt.s32.totalorder %v3611_v10, 16 }
  0x26   :  { %5092 = vst [vmem:[#allocation23_spill] sm:$0xff] %v3631_v33  ;;  %vm558_vm9 = vcmask 588800  }
  0x27   :  { %5093 = vst [vmem:[#allocation24_spill] sm:$0xff] %v3650_v52 }
  0x28   :  { %5094 = vst [vmem:[#allocation25_spill] sm:$0xff] %v3652_v53 }
  0x29   :  { %2886 = vrot.lane.b32.xlu1 %v2885_v5, %s3501_s4  ;;  %2876 = vrot.lane.b32.xlu0 %v2885_v5, %s3502_s7  ;;  %5095 = vst [vmem:[#allocation26_spill] sm:$0xff] %v3656_v55 }
  0x2a   :  { %2896 = vrot.lane.b32.xlu2 %v2885_v5, %s3503_s16  ;;  %5096 = vst [vmem:[#allocation27_spill] sm:$0xff] %v3658_v56 }
  0x2b   :  { %5097 = vst [vmem:[#allocation28_spill] sm:$0xff] %v3672_v62 }
  0x31   :  { %2906 = vrot.lane.b32.xlu1 %v2885_v5, %s3504_s17  ;;  %2901 = vrot.lane.b32.xlu0 %v2880_v2, %s3504_s17 }
  0x32   :  { %2911 = vrot.lane.b32.xlu2 %v2910_v6, %s3505_s18 }
  0x39   :  { %2921 = vrot.lane.b32.xlu1 %v2910_v6, %s3506_s1  ;;  %2916 = vrot.lane.b32.xlu0 %v2915_v7, %s3505_s18 }
  0x3a   :  { %2926 = vrot.lane.b32.xlu2 %v2915_v7, %s3506_s1 }
  0x41   :  { %2936 = vrot.lane.b32.xlu1 %v2915_v7, %s3507_s19  ;;  %2931 = vrot.lane.b32.xlu0 %v2910_v6, %s3507_s19 }
  0x42   :  { %2941 = vrot.lane.b32.xlu2 %v2910_v6, %s3494_s14 }
  0x49   :  { %177 = vrot.lane.b32.xlu1 %v3576_v0, %s3494_s14  ;;  %183 = vrot.lane.b32.xlu0 %v3586_v4, %s3494_s14 }
  0x7c   :  { %v2892_v8 = vpop.permute.xlu2 %2891 }
  0x7d   :  { %v2894_v11 = vunpack.i.h.bf16 %v2892_v8  ;;  %v2893_v12 = vunpack.i.l.bf16 %v2892_v8  ;;  %v292_v8 = vld [vmem:[#allocation5 + $0x58] sm:$0xff] }
  0x7e   :  { %v3691_v22 = vunpack.c.l.bf16 %v292_v8 }
  0x84   :  { %v2897_v13 = vpop.permute.xlu2 %2896 }
  0x85   :  { %v2899_v14 = vunpack.i.h.bf16 %v2897_v13  ;;  %v2898_v15 = vunpack.i.l.bf16 %v2897_v13  ;;  %v274_v13 = vpack.c.bf16 %v3586_v4, %v3578_v1 }
  0x87   :  { %v348_v16 = vsel %vm347_vm0, %v2894_v11, %v2898_v15  ;;  %v349_v17 = vsel %vm347_vm0, %v2899_v14, %v2894_v11  ;;  %v350_v18 = vsel %vm347_vm0, %v2893_v12, %v2899_v14  ;;  %v351_v19 = vsel %vm347_vm0, %v2898_v15, %v2893_v12 }
  0x88   :  { %v352_v20 = vpack.c.bf16 %v349_v17, %v350_v18  ;;  %v353_v21 = vpack.c.bf16 %v351_v19, %v348_v16  ;;  %v273_v12 = vpack.c.bf16 %v3584_v3, %v3576_v0  ;;  %v3686_v16 = vunpack.c.l.bf16 %v291_v63 }
  0x89   :  { %v3688_v17 = vunpack.c.h.bf16 %v291_v63  ;;  %v3693_v0 = vunpack.c.h.bf16 %v292_v8 }
  0x8a   :  { %v357_v25 = vunpack.c.l.bf16 %v352_v20  ;;  %v358_v26 = vunpack.c.h.bf16 %v352_v20  ;;  %v359_v27 = vunpack.c.l.bf16 %v353_v21  ;;  %v360_v28 = vunpack.c.h.bf16 %v353_v21 }
  0x8b   :  { %v445_v20 = vunpack.c.l.b16 %v273_v12  ;;  %v446_v21 = vunpack.c.h.b16 %v273_v12 }
  0x8c   :  { %v3628_v31 = vpop.permute.xlu2 %2911  ;;  %v365_v32 = vmul.f32 %v3622_v23, %v357_v25  ;;  %v366_v34 = vmul.f32 %v3624_v29, %v358_v26  ;;  %v367_v35 = vmul.f32 %v3626_v30, %v359_v27  ;;  %v368_v36 = vmul.f32 %v3631_v33, %v360_v28 }
  0x8d   :  { %v2914_v44 = vunpack.i.h.bf16 %v3628_v31  ;;  %v2913_v45 = vunpack.i.l.bf16 %v3628_v31  ;;  %v3703_v26 = vpack.c.b16 %v445_v20, %v445_v20  ;;  %v447_v27 = vunpack.c.l.b16 %v274_v13 }
  0x8e   :  { %v369_v37 = vpack.c.bf16 %v366_v34, %v365_v32  ;;  %v370_v41 = vpack.c.bf16 %v368_v36, %v367_v35  ;;  %v448_v28 = vunpack.c.h.b16 %v274_v13 }
  0x8f   :  { %v3666_v59 = vsel %vm217_vm3, %v2913_v45, %v2914_v44 }
  0x90   :  { %v475_v46 = vunpack.c.l.b16 %v369_v37  ;;  %v476_v47 = vunpack.c.h.b16 %v369_v37  ;;  %v477_v57 = vunpack.c.l.b16 %v370_v41  ;;  %v478_v58 = vunpack.c.h.b16 %v370_v41  ;;  %v3717_v41 = vld [vmem:[#allocation5 + $0x20] sm:$0xff] }
  0x91   :  { %v3727_v8 = vpack.c.b16 %v448_v28, %v448_v28 }
  0x92   :  { %v3668_v60 = vpack.c.b16 %v475_v46, %v475_v46  ;;  %v3670_v61 = vpack.c.b16 %v476_v47, %v476_v47  ;;  %v3682_v14 = vpack.c.b16 %v477_v57, %v477_v57  ;;  %v3684_v15 = vpack.c.b16 %v478_v58, %v478_v58 }
  0x93   :  { %v2882_v42 = vpop.permute.xlu1 %2881  ;;  %v3636_v43 = vpop.permute.xlu0 %2871  ;;  %v3723_v46 = vpack.c.b16 %v446_v21, %v446_v21  ;;  %v3725_v47 = vpack.c.b16 %v447_v27, %v447_v27 }
  0x94   :  { %v3654_v54 = vpop.permute.xlu2 %2926  ;;  %v2884_v2 = vunpack.i.h.bf16 %v2882_v42  ;;  %v2883_v5 = vunpack.i.l.bf16 %v2882_v42  ;;  %v2874_v6 = vunpack.i.h.bf16 %v3636_v43  ;;  %v2873_v7 = vunpack.i.l.bf16 %v3636_v43 }
  0x95   :  { %v2929_v9 = vunpack.i.h.bf16 %v3654_v54  ;;  %v2928_v11 = vunpack.i.l.bf16 %v3654_v54 }
  0x97   :  { %v3701_v25 = vsel %vm249_vm4, %v2928_v11, %v2929_v9 }
  0x9b   :  { %v2887_v18 = vpop.permute.xlu1 %2886  ;;  %v2877_v19 = vpop.permute.xlu0 %2876 }
  0x9c   :  { %v2889_v3 = vunpack.i.h.bf16 %v2887_v18  ;;  %v2888_v1 = vunpack.i.l.bf16 %v2887_v18  ;;  %v2879_v4 = vunpack.i.h.bf16 %v2877_v19  ;;  %v2878_v24 = vunpack.i.l.bf16 %v2877_v19 }
  0x9e   :  { %v316_v32 = vsel %vm315_vm1, %v2884_v2, %v2888_v1  ;;  %v317_v34 = vsel %vm315_vm1, %v2889_v3, %v2884_v2  ;;  %v318_v35 = vsel %vm315_vm1, %v2883_v5, %v2889_v3  ;;  %v319_v36 = vsel %vm315_vm1, %v2888_v1, %v2883_v5 }
  0x9f   :  { %v320_v37 = vpack.c.bf16 %v317_v34, %v318_v35  ;;  %v321_v38 = vpack.c.bf16 %v319_v36, %v316_v32  ;;  %v380_v39 = vsel %vm379_vm2, %v2874_v6, %v2878_v24  ;;  %v381_v40 = vsel %vm379_vm2, %v2879_v4, %v2874_v6 }
  0xa0   :  { %v382_v42 = vsel %vm379_vm2, %v2873_v7, %v2879_v4  ;;  %v383_v43 = vsel %vm379_vm2, %v2878_v24, %v2873_v7  ;;  %v3730_v6 = vunpack.c.l.bf16 %v3717_v41 }
  0xa1   :  { %v325_v48 = vunpack.c.l.bf16 %v320_v37  ;;  %v326_v57 = vunpack.c.h.bf16 %v320_v37  ;;  %v327_v58 = vunpack.c.l.bf16 %v321_v38  ;;  %v328_v63 = vunpack.c.h.bf16 %v321_v38 }
  0xa2   :  { %v384_v2 = vpack.c.bf16 %v381_v40, %v382_v42  ;;  %v385_v5 = vpack.c.bf16 %v383_v43, %v380_v39 }
  0xa3   :  { %v2907_v12 = vpop.permute.xlu1 %2906  ;;  %v2902_v13 = vpop.permute.xlu0 %2901  ;;  %v333_v18 = vmul.f32 %v3652_v53, %v325_v48  ;;  %v334_v7 = vmul.f32 %v3656_v55, %v326_v57  ;;  %v335_v19 = vmul.f32 %v3658_v56, %v327_v58  ;;  %v336_v20 = vmul.f32 %v3672_v62, %v328_v63 }
  0xa4   :  { %v2909_v21 = vunpack.i.h.bf16 %v2907_v12  ;;  %v2908_v3 = vunpack.i.l.bf16 %v2907_v12  ;;  %v2904_v1 = vunpack.i.h.bf16 %v2902_v13  ;;  %v2903_v4 = vunpack.i.l.bf16 %v2902_v13 }
  0xa5   :  { %v389_v24 = vunpack.c.l.bf16 %v384_v2  ;;  %v390_v27 = vunpack.c.h.bf16 %v384_v2  ;;  %v391_v28 = vunpack.c.l.bf16 %v385_v5  ;;  %v392_v32 = vunpack.c.h.bf16 %v385_v5 }
  0xa6   :  { %v284_v34 = vsel %vm283_vm5, %v2904_v1, %v2908_v3  ;;  %v285_v35 = vsel %vm283_vm5, %v2909_v21, %v2904_v1  ;;  %v286_v36 = vsel %vm283_vm5, %v2903_v4, %v2909_v21  ;;  %v287_v37 = vsel %vm283_vm5, %v2908_v3, %v2903_v4 }
  0xa7   :  { %v288_v38 = vpack.c.bf16 %v285_v35, %v286_v36  ;;  %v3744_v39 = vpack.c.bf16 %v287_v37, %v284_v34  ;;  %v397_v40 = vmul.f32 %v3643_v49, %v389_v24  ;;  %v398_v42 = vmul.f32 %v3645_v50, %v390_v27 }
  0xa8   :  { %v399_v43 = vmul.f32 %v3648_v51, %v391_v28  ;;  %v400_v48 = vmul.f32 %v3650_v52, %v392_v32  ;;  %v337_v57 = vpack.c.bf16 %v334_v7, %v333_v18  ;;  %v338_v58 = vpack.c.bf16 %v336_v20, %v335_v19 }
  0xa9   :  { %v293_v63 = vunpack.c.l.bf16 %v288_v38  ;;  %v294_v2 = vunpack.c.h.bf16 %v288_v38  ;;  %v295_v5 = vunpack.c.l.bf16 %v3744_v39  ;;  %v296_v12 = vunpack.c.h.bf16 %v3744_v39 }
  0xaa   :  { %v401_v13 = vpack.c.bf16 %v398_v42, %v397_v40  ;;  %v402_v21 = vpack.c.bf16 %v400_v48, %v399_v43  ;;  %v465_v3 = vunpack.c.l.b16 %v337_v57  ;;  %v466_v1 = vunpack.c.h.b16 %v337_v57 }
  0xab   :  { %v2922_v4 = vpop.permute.xlu1 %2921  ;;  %v2917_v24 = vpop.permute.xlu0 %2916  ;;  %v467_v27 = vunpack.c.l.b16 %v338_v58  ;;  %v468_v34 = vunpack.c.h.b16 %v338_v58  ;;  %v301_v28 = vmul.f32 %v3686_v16, %v293_v63  ;;  %v302_v32 = vmul.f32 %v3688_v17, %v294_v2 }
  0xac   :  { %v2924_v18 = vunpack.i.h.bf16 %v2922_v4  ;;  %v2923_v7 = vunpack.i.l.bf16 %v2922_v4  ;;  %v2919_v19 = vunpack.i.h.bf16 %v2917_v24  ;;  %v2918_v20 = vunpack.i.l.bf16 %v2917_v24 }
  0xad   :  { %v485_v35 = vunpack.c.l.b16 %v401_v13  ;;  %v486_v36 = vunpack.c.h.b16 %v401_v13  ;;  %v487_v37 = vunpack.c.l.b16 %v402_v21  ;;  %v488_v38 = vunpack.c.h.b16 %v402_v21  ;;  %v2942_v21 = vpop.permute.xlu2 %2941 }
  0xae   :  { %v250_v40 = vsel %vm249_vm4, %v2924_v18, %v2928_v11  ;;  %v251_v42 = vsel %vm249_vm4, %v2923_v7, %v2924_v18  ;;  %v252_v43 = vsel %vm249_vm4, %v2929_v9, %v2923_v7  ;;  %v220_v48 = vsel %vm217_vm3, %v2919_v19, %v2913_v45 }
  0xaf   :  { %v3770_v57 = vpack.c.bf16 %v252_v43, %v3701_v25  ;;  %v3772_v58 = vpack.c.bf16 %v250_v40, %v251_v42  ;;  %v218_v11 = vsel %vm217_vm3, %v2914_v44, %v2918_v20  ;;  %v221_v54 = vsel %vm217_vm3, %v2918_v20, %v2919_v19 }
  0xb0   :  { %v3780_v63 = vpack.c.bf16 %v220_v48, %v221_v54  ;;  %v3783_v9 = vpack.c.bf16 %v218_v11, %v3666_v59  ;;  %v489_v2 = vpack.c.b16 %v485_v35, %v485_v35  ;;  %v490_v45 = vpack.c.b16 %v486_v36, %v486_v36 }
  0xb1   :  { %v259_v25 = vunpack.c.l.bf16 %v3770_v57  ;;  %v260_v13 = vunpack.c.h.bf16 %v3770_v57  ;;  %v491_v19 = vpack.c.b16 %v487_v37, %v487_v37  ;;  %v492_v20 = vpack.c.b16 %v488_v38, %v488_v38 }
  0xb2   :  { %v227_v44 = vunpack.c.l.bf16 %v3780_v63  ;;  %v228_v4 = vunpack.c.h.bf16 %v3780_v63  ;;  %v229_v24 = vunpack.c.l.bf16 %v3783_v9  ;;  %v230_v18 = vunpack.c.h.bf16 %v3783_v9 }
  0xb3   :  { %v563_v59 = vsel %vm493_vm6, %v489_v2, 0  ;;  %v566_v7 = vsel %vm493_vm6, %v490_v45, 0  ;;  %v2937_v35 = vpop.permute.xlu1 %2936  ;;  %v2932_v36 = vpop.permute.xlu0 %2931  ;;  %v469_v40 = vpack.c.b16 %v465_v3, %v465_v3  ;;  %v470_v42 = vpack.c.b16 %v466_v1, %v466_v1 }
  0xb4   :  { %577 = vmatpush.bf16.msra.mxu0 %v563_v59  ;;  %590 = vmatpush.bf16.msra.mxu1 %v566_v7  ;;  %v471_v43 = vpack.c.b16 %v467_v27, %v467_v27  ;;  %v2939_v48 = vunpack.i.h.bf16 %v2937_v35  ;;  %v569_v11 = vsel %vm493_vm6, %v491_v19, 0  ;;  %v572_v54 = vsel %vm493_vm6, %v492_v20, 0 }
  0xb5   :  { %v472_v31 = vpack.c.b16 %v468_v34, %v468_v34  ;;  %v2938_v2 = vunpack.i.l.bf16 %v2937_v35  ;;  %603 = vmatpush.bf16.msra.mxu2 %v569_v11  ;;  %616 = vmatpush.bf16.msra.mxu3 %v572_v54  ;;  %v544_v37 = vsel %vm493_vm6, %v469_v40, %v3668_v60  ;;  %v548_v38 = vsel %vm493_vm6, %v470_v42, %v3670_v61  ;;  %v194_v42 = vld [vmem:[#allocation5 + $0x18] sm:$0xff] }
  0xb6   :  { %v552_v3 = vsel %vm493_vm6, %v471_v43, %v3682_v14  ;;  %v2934_v1 = vunpack.i.h.bf16 %v2932_v36  ;;  %v2933_v45 = vunpack.i.l.bf16 %v2932_v36  ;;  %v305_v59 = vpack.c.bf16 %v302_v32, %v301_v28 }
  0xb7   :  { %v556_v27 = vsel %vm493_vm6, %v472_v31, %v3684_v15  ;;  %v158_v34 = vsel %vm154_vm7, %v2938_v2, %v2939_v48  ;;  %v303_v61 = vmul.f32 %v3691_v22, %v295_v5  ;;  %v304_v14 = vmul.f32 %v3693_v0, %v296_v12  ;;  %v193_v15 = vld [vmem:[#allocation5 + $0x10] sm:$0xff] }
  0xb8   :  { %578 = vmatpush.bf16.msra.mxu0 %v544_v37  ;;  %591 = vmatpush.bf16.msra.mxu1 %v548_v38  ;;  %v155_v60 = vsel %vm154_vm7, %v2934_v1, %v2938_v2  ;;  %v2944_v7 = vunpack.i.h.bf16 %v2942_v21  ;;  %v156_v31 = vsel %vm154_vm7, %v2933_v45, %v2934_v1  ;;  %v157_v28 = vsel %vm154_vm7, %v2939_v48, %v2933_v45 }
  0xb9   :  { %v455_v32 = vunpack.c.l.b16 %v305_v59  ;;  %v456_v19 = vunpack.c.h.b16 %v305_v59  ;;  %604 = vmatpush.bf16.msra.mxu2 %v552_v3  ;;  %617 = vmatpush.bf16.msra.mxu3 %v556_v27  ;;  %v3820_v20 = vpack.c.bf16 %v157_v28, %v158_v34  ;;  %v3822_v35 = vpack.c.bf16 %v155_v60, %v156_v31 }
  0xba   :  { %v306_v5 = vpack.c.bf16 %v304_v14, %v303_v61  ;;  %v2943_v39 = vunpack.i.l.bf16 %v2942_v21  ;;  %v3824_v43 = vunpack.c.l.bf16 %v193_v15  ;;  %v3826_v11 = vunpack.c.h.bf16 %v193_v15  ;;  %v257_v61 = vld [vmem:[#allocation5 + $0x30] sm:$0xff] }
  0xbb   :  { %v459_v36 = vpack.c.b16 %v455_v32, %v455_v32  ;;  %v460_v12 = vpack.c.b16 %v456_v19, %v456_v19  ;;  %v178_v40 = vpop.permute.xlu1 %177  ;;  %v163_v48 = vunpack.c.l.bf16 %v3820_v20  ;;  %v164_v54 = vunpack.c.h.bf16 %v3820_v20  ;;  %v184_v38 = vpop.permute.xlu0 %183 }
  0xbc   :  { %v165_v2 = vunpack.c.l.bf16 %v3822_v35  ;;  %v166_v37 = vunpack.c.h.bf16 %v3822_v35  ;;  %v457_v1 = vunpack.c.l.b16 %v306_v5  ;;  %v458_v27 = vunpack.c.h.b16 %v306_v5  ;;  %v226_v5 = vld [vmem:[#allocation5 + $0x28] sm:$0xff] }
  0xbd   :  { %v528_v21 = vsel %vm493_vm6, %v3703_v26, %v459_v36  ;;  %v532_v3 = vsel %vm493_vm6, %v3723_v46, %v460_v12  ;;  %v188_v34 = vsel %vm185_vm8, %v178_v40, %v2943_v39  ;;  %v187_v45 = vsel %vm185_vm8, %v2943_v39, %v2944_v7 }
  0xbe   :  { %579 = vmatpush.bf16.msra.mxu0 %v528_v21  ;;  %592 = vmatpush.bf16.msra.mxu1 %v532_v3  ;;  %v3840_v59 = vunpack.c.l.bf16 %v194_v42  ;;  %v3842_v60 = vunpack.c.h.bf16 %v194_v42  ;;  %v461_v14 = vpack.c.b16 %v457_v1, %v457_v1  ;;  %v462_v26 = vpack.c.b16 %v458_v27, %v458_v27  ;;  %v258_v3 = vld [vmem:[#allocation5 + $0x38] sm:$0xff]  ;;  %v161_v1 = vld [vmem:[#allocation5] sm:$0xff] }
  0xbf   :  { %v186_v46 = vsel %vm185_vm8, %v2944_v7, %v184_v38  ;;  %v189_v15 = vsel %vm185_vm8, %v184_v38, %v178_v40  ;;  %v3849_v32 = vunpack.c.h.bf16 %v3717_v41  ;;  %v235_v19 = vmul.f32 %v3730_v6, %v227_v44 }
  0xc0   :  { %v190_v31 = vpack.c.bf16 %v188_v34, %v189_v15  ;;  %v191_v28 = vpack.c.bf16 %v186_v46, %v187_v45  ;;  %v536_v39 = vsel %vm493_vm6, %v3725_v47, %v461_v14  ;;  %v540_v36 = vsel %vm493_vm6, %v3727_v8, %v462_v26 }
  0xc1   :  { %v3858_v7 = vunpack.c.l.bf16 %v257_v61  ;;  %v3860_v12 = vunpack.c.h.bf16 %v257_v61  ;;  %605 = vmatpush.bf16.msra.mxu2 %v536_v39  ;;  %618 = vmatpush.bf16.msra.mxu3 %v540_v36  ;;  %v236_v44 = vmul.f32 %v3849_v32, %v228_v4  ;;  %v3871_v21 = vunpack.c.l.bf16 %v226_v5 }
  0xc2   :  { %v195_v40 = vunpack.c.l.bf16 %v190_v31  ;;  %v196_v41 = vunpack.c.h.bf16 %v190_v31  ;;  %v197_v42 = vunpack.c.l.bf16 %v191_v28  ;;  %v198_v38 = vunpack.c.h.bf16 %v191_v28 }
  0xc3   :  { %5098 = vst [vmem:[#allocation29_spill] sm:$0xff] %v3858_v7  ;;  %v267_v47 = vmul.f32 %v3858_v7, %v259_v25  ;;  %v268_v8 = vmul.f32 %v3860_v12, %v260_v13  ;;  %v239_v45 = vpack.c.bf16 %v236_v44, %v235_v19  ;;  %v3877_v14 = vunpack.c.h.bf16 %v226_v5 }
  0xc4   :  { %5099 = vst [vmem:[#allocation30_spill] sm:$0xff] %v3860_v12  ;;  %v203_v27 = vmul.f32 %v3824_v43, %v195_v40  ;;  %v204_v34 = vmul.f32 %v3826_v11, %v196_v41  ;;  %v205_v63 = vmul.f32 %v3840_v59, %v197_v42  ;;  %v206_v4 = vmul.f32 %v3842_v60, %v198_v38  ;;  %v162_v42 = vld [vmem:[#allocation5 + $0x8] sm:$0xff] }
  0xc5   :  { %v271_v61 = vpack.c.bf16 %v268_v8, %v267_v47  ;;  %v237_v57 = vmul.f32 %v3871_v21, %v229_v24  ;;  %v3882_v25 = vunpack.c.l.bf16 %v258_v3  ;;  %v3884_v13 = vunpack.c.h.bf16 %v258_v3 }
  0xc6   :  { %v3886_v26 = vunpack.c.l.bf16 %v161_v1  ;;  %v3888_v46 = vunpack.c.h.bf16 %v161_v1  ;;  %v425_v15 = vunpack.c.l.b16 %v239_v45  ;;  %v426_v28 = vunpack.c.h.b16 %v239_v45 }
  0xc7   :  { %5100 = vst [vmem:[#allocation31_spill] sm:$0xff] %v3884_v13  ;;  %v435_v31 = vunpack.c.l.b16 %v271_v61  ;;  %v436_v39 = vunpack.c.h.b16 %v271_v61  ;;  %v238_v19 = vmul.f32 %v3877_v14, %v230_v18  ;;  %v5101_v5 = vunpack.c.l.bf16 %v3772_v58 }
  0xc8   :  { %v5102_v36 = vunpack.c.h.bf16 %v3772_v58  ;;  %v171_v41 = vmul.f32 %v3886_v26, %v163_v48  ;;  %v429_v38 = vpack.c.b16 %v425_v15, %v425_v15  ;;  %v430_v47 = vpack.c.b16 %v426_v28, %v426_v28 }
  0xc9   :  { %v269_v24 = vmul.f32 %v3882_v25, %v5101_v5  ;;  %v439_v44 = vpack.c.b16 %v435_v31, %v435_v31  ;;  %v440_v8 = vpack.c.b16 %v436_v39, %v436_v39  ;;  %v240_v3 = vpack.c.bf16 %v238_v19, %v237_v57 }
  0xca   :  { %v270_v40 = vmul.f32 %v3884_v13, %v5102_v36  ;;  %v172_v9 = vmul.f32 %v3888_v46, %v164_v54  ;;  %v207_v18 = vpack.c.bf16 %v204_v34, %v203_v27  ;;  %v3905_v61 = vunpack.c.l.bf16 %v162_v42 }
  0xcb   :  { %v512_v45 = vsel %vm493_vm6, %v429_v38, %v439_v44  ;;  %v516_v58 = vsel %vm493_vm6, %v430_v47, %v440_v8  ;;  %v3907_v5 = vunpack.c.h.bf16 %v162_v42  ;;  %v427_v48 = vunpack.c.l.b16 %v240_v3 }
  0xcc   :  { %v272_v1 = vpack.c.bf16 %v270_v40, %v269_v24  ;;  %580 = vmatpush.bf16.msra.mxu0 %v512_v45  ;;  %593 = vmatpush.bf16.msra.mxu1 %v516_v58  ;;  %v428_v31 = vunpack.c.h.b16 %v240_v3  ;;  %v175_v28 = vpack.c.bf16 %v172_v9, %v171_v41  ;;  %v415_v39 = vunpack.c.l.b16 %v207_v18 }
  0xcd   :  { %v416_v20 = vunpack.c.h.b16 %v207_v18  ;;  %v173_v54 = vmul.f32 %v3905_v61, %v165_v2  ;;  %v431_v27 = vpack.c.b16 %v427_v48, %v427_v48  ;;  %v174_v41 = vmul.f32 %v3907_v5, %v166_v37  ;;  %v132_v37 = vld [vmem:[#allocation7] sm:$0xf] }
  0xce   :  { %v437_v15 = vunpack.c.l.b16 %v272_v1  ;;  %v438_v57 = vunpack.c.h.b16 %v272_v1  ;;  %v432_v19 = vpack.c.b16 %v428_v31, %v428_v31  ;;  %v405_v36 = vunpack.c.l.b16 %v175_v28 }
  0xcf   :  { %v419_v40 = vpack.c.b16 %v415_v39, %v415_v39  ;;  %v406_v42 = vunpack.c.h.b16 %v175_v28  ;;  %v420_v38 = vpack.c.b16 %v416_v20, %v416_v20  ;;  %v208_v8 = vpack.c.bf16 %v206_v4, %v205_v63 }
  0xd0   :  { %v441_v34 = vpack.c.b16 %v437_v15, %v437_v15  ;;  %v442_v24 = vpack.c.b16 %v438_v57, %v438_v57  ;;  %v409_v2 = vpack.c.b16 %v405_v36, %v405_v36  ;;  %v176_v1 = vpack.c.bf16 %v174_v41, %v173_v54 }
  0xd1   :  { %v410_v3 = vpack.c.b16 %v406_v42, %v406_v42  ;;  %v417_v9 = vunpack.c.l.b16 %v208_v8  ;;  %v418_v18 = vunpack.c.h.b16 %v208_v8 }
  0xd2   :  { %v520_v44 = vsel %vm493_vm6, %v431_v27, %v441_v34  ;;  %v524_v47 = vsel %vm493_vm6, %v432_v19, %v442_v24  ;;  %v496_v45 = vsel %vm493_vm6, %v409_v2, %v419_v40  ;;  %v407_v48 = vunpack.c.l.b16 %v176_v1 }
  0xd3   :  { %606 = vmatpush.bf16.msra.mxu2 %v520_v44  ;;  %619 = vmatpush.bf16.msra.mxu3 %v524_v47  ;;  %v500_v58 = vsel %vm493_vm6, %v410_v3, %v420_v38  ;;  %v421_v15 = vpack.c.b16 %v417_v9, %v417_v9  ;;  %v408_v35 = vunpack.c.h.b16 %v176_v1  ;;  %v422_v31 = vpack.c.b16 %v418_v18, %v418_v18 }
  0xd4   :  { %581 = vmatpush.bf16.msra.mxu0 %v496_v45  ;;  %594 = vmatpush.bf16.msra.mxu1 %v500_v58  ;;  %v411_v63 = vpack.c.b16 %v407_v48, %v407_v48 }
  0xd5   :  { %v412_v4 = vpack.c.b16 %v408_v35, %v408_v35 }
  0xd6   :  { %v504_v57 = vsel %vm493_vm6, %v411_v63, %v421_v15 }
  0xd7   :  { %2829 = vmatmul.msk.bf16.vlgmr.msra.gmra.mxu0 %vm558_vm9, %v132_v37  ;;  %2830 = vmatmul.msk.bf16.vlgmr.msra.gmra.mxu1 %vm558_vm9, %v132_v37  ;;  %v508_v28 = vsel %vm493_vm6, %v412_v4, %v422_v31 }
  0xd8   :  { %607 = vmatpush.bf16.msra.mxu2 %v504_v57  ;;  %620 = vmatpush.bf16.msra.mxu3 %v508_v28 }
  0xdb   :  { %2831 = vmatmul.msk.bf16.vlgmr.msra.gmra.mxu2 %vm558_vm9, %v132_v37  ;;  %2832 = vmatmul.msk.bf16.vlgmr.msra.gmra.mxu3 %vm558_vm9, %v132_v37 }
 0x154   :  { %v583_v39 = vpop.f32.mrf.mxu0  ;;  %v596_v20 = vpop.f32.mrf.mxu1 }
 0x155   :  { %v626_v54 = vadd.f32 %v596_v20, %v583_v39 }
 0x15c   :  { %v585_v27 = vpop.f32.mrf.mxu0  ;;  %v598_v34 = vpop.f32.mrf.mxu1 }
 0x15e   :  { %v609_v19 = vpop.f32.mrf.mxu2  ;;  %v622_v24 = vpop.f32.mrf.mxu3 }
 0x15f   :  { %v627_v36 = vadd.f32 %v626_v54, %v609_v19 }
 0x161   :  { %v628_v40 = vadd.f32 %v627_v36, %v622_v24 }
 0x163   :  { %629 = vadd.xlane.f32.xlu2 %v628_v40 }
 0x166   :  { %v611_v42 = vpop.f32.mrf.mxu2  ;;  %v624_v38 = vpop.f32.mrf.mxu3 }
 0x1d6   :  { %v630_v44 = vpop.xlane.xlu2 %629 }
 0x1d7   :  { %v631_v47 = vmul.f32 0.001953125, %v630_v44 }
 0x1d9   :  { %v632_v41 = vsub.f32 %v583_v39, %v631_v47  ;;  %v633_v8 = vsub.f32 %v596_v20, %v631_v47  ;;  %v634_v2 = vsub.f32 %v609_v19, %v631_v47  ;;  %v635_v3 = vsub.f32 %v622_v24, %v631_v47 }
 0x1db   :  { %v636_v1 = vmul.f32 %v632_v41, %v632_v41  ;;  %v637_v9 = vmul.f32 %v633_v8, %v633_v8  ;;  %v638_v18 = vmul.f32 %v634_v2, %v634_v2  ;;  %v639_v58 = vmul.f32 %v635_v3, %v635_v3 }
 0x1dd   :  { %v640_v45 = vadd.f32 %v637_v9, %v636_v1 }
 0x1df   :  { %v641_v48 = vadd.f32 %v640_v45, %v638_v18 }
 0x1e1   :  { %v642_v15 = vadd.f32 %v641_v48, %v639_v58 }
 0x1e3   :  { %643 = vadd.xlane.f32.xlu0 %v642_v15 }
 0x256   :  { %v644_v35 = vpop.xlane.xlu0 %643 }
 0x257   :  { %v645_v31 = vmul.f32 0.001953125, %v644_v35 }
 0x259   :  { %v646_v37 = vadd.f32 1e-05, %v645_v31 }
 0x25b   :  { %3280 = vrsqrt.f32 %v646_v37  ;;  %vm653_vm11 = vweird.f32 %v646_v37 }
 0x261   :  { %v3281_v63 = vpop.eup %3280 }
 0x262   :  { %v648_v4 = vmul.f32 %v3281_v63, %v646_v37  ;;  %vm654_vm10 = vweird.f32 %v3281_v63 }
 0x263   :  { %vm655_vm12 = vmor %vm653_vm11, %vm654_vm10 }
 0x264   :  { %v649_v57 = vmul.f32 %v3281_v63, %v648_v4 }
 0x266   :  { %v650_v28 = vmul.f32 0.5, %v649_v57 }
 0x268   :  { %v651_v39 = vsub.f32 1.5, %v650_v28 }
 0x26a   :  { %v652_v20 = vmul.f32 %v3281_v63, %v651_v39 }
 0x26c   :  { %v656_v54 = vsel %vm655_vm12, %v3281_v63, %v652_v20 }
 0x26d   :  { %v657_v27 = vmul.f32 %v656_v54, %v632_v41  ;;  %v658_v34 = vmul.f32 %v656_v54, %v633_v8  ;;  %v659_v19 = vmul.f32 %v656_v54, %v634_v2  ;;  %v660_v24 = vmul.f32 %v656_v54, %v635_v3 }
 0x26f   :  { %v661_v36 = vmax.f32 %v657_v27, 0.0  ;;  %v662_v40 = vmax.f32 %v658_v34, 0.0  ;;  %v3925_v42 = vmax.f32 %v659_v19, 0.0  ;;  %v3927_v38 = vmax.f32 %v660_v24, 0.0 }
 0x271   :  { %v2980_v44 = vpack.i.bf16 %v662_v40, %v3927_v38  ;;  %v2945_v47 = vpack.i.bf16 %v3925_v42, %v661_v36  ;;  %v3005_v41 = vpack.i.bf16 %v3925_v42, %v662_v40  ;;  %v3935_v8 = vpack.c.bf16 %v662_v40, %v661_v36 }
 0x272   :  { %v3000_v2 = vpack.i.bf16 %v661_v36, %v3927_v38 }
 0x273   :  { %2981 = vrot.lane.b32.xlu0 %v2980_v44, %s3504_s17  ;;  %2971 = vrot.lane.b32.xlu2 %v2980_v44, %s3503_s16 }
 0x274   :  { %2946 = vrot.lane.b32.xlu1 %v2945_v47, %s3502_s7 }
 0x27b   :  { %2996 = vrot.lane.b32.xlu2 %v3005_v41, %s3506_s1  ;;  %3001 = vrot.lane.b32.xlu0 %v3000_v2, %s3506_s1 }
 0x27c   :  { %2951 = vrot.lane.b32.xlu1 %v2980_v44, %s3502_s7 }
 0x283   :  { %3011 = vrot.lane.b32.xlu2 %v3000_v2, %s3507_s19  ;;  %3016 = vrot.lane.b32.xlu0 %v3005_v41, %s3494_s14 }
 0x284   :  { %2956 = vrot.lane.b32.xlu1 %v2945_v47, %s3501_s4 }
 0x28b   :  { %689 = vrot.lane.b32.xlu2 %v661_v36, %s3494_s14 }
 0x28c   :  { %2961 = vrot.lane.b32.xlu1 %v2980_v44, %s3501_s4 }
 0x294   :  { %2966 = vrot.lane.b32.xlu1 %v2945_v47, %s3503_s16 }
 0x29c   :  { %2976 = vrot.lane.b32.xlu1 %v2945_v47, %s3504_s17 }
 0x2a4   :  { %2986 = vrot.lane.b32.xlu1 %v3005_v41, %s3505_s18 }
 0x2ac   :  { %2991 = vrot.lane.b32.xlu1 %v3000_v2, %s3505_s18 }
 0x2b4   :  { %3006 = vrot.lane.b32.xlu1 %v3005_v41, %s3507_s19 }
 0x2bc   :  { %695 = vrot.lane.b32.xlu1 %v3927_v38, %s3494_s14 }
 0x2cd   :  { %v3963_v57 = vpop.permute.xlu2 %2971 }
 0x2e5   :  { %v3961_v37 = vpop.permute.xlu0 %2981 }
 0x2e6   :  { %v2947_v3 = vpop.permute.xlu1 %2946 }
 0x2e7   :  { %v2949_v9 = vunpack.i.h.bf16 %v2947_v3  ;;  %v2948_v58 = vunpack.i.l.bf16 %v2947_v3 }
 0x2ed   :  { %v3002_v2 = vpop.permute.xlu0 %3001 }
 0x2ee   :  { %v2952_v1 = vpop.permute.xlu1 %2951 }
 0x2ef   :  { %v2954_v18 = vunpack.i.h.bf16 %v2952_v1  ;;  %v2953_v45 = vunpack.i.l.bf16 %v2952_v1 }
 0x2f1   :  { %v843_v48 = vsel %vm379_vm2, %v2949_v9, %v2953_v45  ;;  %v844_v15 = vsel %vm379_vm2, %v2954_v18, %v2949_v9  ;;  %v845_v35 = vsel %vm379_vm2, %v2948_v58, %v2954_v18  ;;  %v846_v31 = vsel %vm379_vm2, %v2953_v45, %v2948_v58 }
 0x2f2   :  { %v847_v63 = vpack.c.bf16 %v844_v15, %v845_v35  ;;  %v848_v4 = vpack.c.bf16 %v846_v31, %v843_v48 }
 0x2f4   :  { %v849_v39 = vunpack.c.l.bf16 %v847_v63  ;;  %v850_v20 = vunpack.c.h.bf16 %v847_v63  ;;  %v851_v54 = vunpack.c.l.bf16 %v848_v4  ;;  %v852_v27 = vunpack.c.h.bf16 %v848_v4  ;;  %v2997_v4 = vpop.permute.xlu2 %2996 }
 0x2f6   :  { %v2957_v28 = vpop.permute.xlu1 %2956  ;;  %v853_v34 = vmul.f32 %v849_v39, %v3643_v49  ;;  %v854_v19 = vmul.f32 %v850_v20, %v3645_v50  ;;  %v855_v24 = vmul.f32 %v851_v54, %v3648_v51  ;;  %v856_v36 = vmul.f32 %v852_v27, %v3650_v52 }
 0x2f7   :  { %v2959_v9 = vunpack.i.h.bf16 %v2957_v28  ;;  %v2958_v18 = vunpack.i.l.bf16 %v2957_v28  ;;  %v3004_v39 = vunpack.i.h.bf16 %v3002_v2  ;;  %v3003_v20 = vunpack.i.l.bf16 %v3002_v2 }
 0x2f8   :  { %v857_v40 = vpack.c.bf16 %v854_v19, %v853_v34  ;;  %v858_v44 = vpack.c.bf16 %v856_v36, %v855_v24 }
 0x2fa   :  { %v941_v47 = vunpack.c.l.b16 %v857_v40  ;;  %v942_v41 = vunpack.c.h.b16 %v857_v40  ;;  %v943_v3 = vunpack.c.l.b16 %v858_v44  ;;  %v944_v1 = vunpack.c.h.b16 %v858_v44 }
 0x2fc   :  { %v945_v58 = vpack.c.b16 %v941_v47, %v941_v47  ;;  %v946_v48 = vpack.c.b16 %v942_v41, %v942_v41  ;;  %v947_v31 = vpack.c.b16 %v943_v3, %v943_v3  ;;  %v948_v63 = vpack.c.b16 %v944_v1, %v944_v1 }
 0x2fd   :  { %v2998_v41 = vunpack.i.l.bf16 %v2997_v4 }
 0x2fe   :  { %v2962_v45 = vpop.permute.xlu1 %2961  ;;  %v1017_v54 = vsel %vm493_vm6, %v945_v58, 0  ;;  %v1020_v27 = vsel %vm493_vm6, %v946_v48, 0  ;;  %v1023_v44 = vsel %vm493_vm6, %v947_v31, 0  ;;  %v1026_v47 = vsel %vm493_vm6, %v948_v63, 0 }
 0x2ff   :  { %v2964_v15 = vunpack.i.h.bf16 %v2962_v45  ;;  %v2963_v35 = vunpack.i.l.bf16 %v2962_v45  ;;  %1031 = vmatpush.bf16.msrb.mxu0 %v1017_v54  ;;  %1044 = vmatpush.bf16.msrb.mxu1 %v1020_v27  ;;  %v2974_v45 = vunpack.i.h.bf16 %v3963_v57  ;;  %v748_v58 = vsel %vm249_vm4, %v3003_v20, %v3004_v39 }
 0x300   :  { %1057 = vmatpush.bf16.msrb.mxu2 %v1023_v44  ;;  %1070 = vmatpush.bf16.msrb.mxu3 %v1026_v47  ;;  %v3988_v48 = vpack.c.bf16 %v3927_v38, %v3925_v42 }
 0x301   :  { %v795_v34 = vsel %vm315_vm1, %v2959_v9, %v2963_v35  ;;  %v796_v28 = vsel %vm315_vm1, %v2964_v15, %v2959_v9  ;;  %v797_v19 = vsel %vm315_vm1, %v2958_v18, %v2964_v15  ;;  %v798_v24 = vsel %vm315_vm1, %v2963_v35, %v2958_v18 }
 0x302   :  { %v799_v36 = vpack.c.bf16 %v796_v28, %v797_v19  ;;  %v800_v40 = vpack.c.bf16 %v798_v24, %v795_v34  ;;  %v747_v18 = vsel %vm249_vm4, %v3004_v39, %v2998_v41  ;;  %v2973_v15 = vunpack.i.l.bf16 %v3963_v57 }
 0x303   :  { %v2999_v35 = vunpack.i.h.bf16 %v2997_v4  ;;  %v3995_v24 = vpack.c.bf16 %v747_v18, %v748_v58 }
 0x304   :  { %v801_v2 = vunpack.c.l.bf16 %v799_v36  ;;  %v802_v3 = vunpack.c.h.bf16 %v799_v36  ;;  %v803_v1 = vunpack.c.l.bf16 %v800_v40  ;;  %v804_v9 = vunpack.c.h.bf16 %v800_v40 }
 0x305   :  { %v746_v44 = vsel %vm249_vm4, %v2998_v41, %v2999_v35  ;;  %v745_v47 = vsel %vm249_vm4, %v2999_v35, %v3003_v20  ;;  %v751_v41 = vunpack.c.l.bf16 %v3995_v24 }
 0x306   :  { %v2967_v31 = vpop.permute.xlu1 %2966  ;;  %v805_v63 = vmul.f32 %v801_v2, %v3652_v53  ;;  %v806_v54 = vmul.f32 %v802_v3, %v3656_v55  ;;  %v807_v28 = vmul.f32 %v803_v1, %v3658_v56  ;;  %v808_v19 = vmul.f32 %v804_v9, %v3672_v62 }
 0x307   :  { %v2969_v27 = vunpack.i.h.bf16 %v2967_v31  ;;  %v2968_v34 = vunpack.i.l.bf16 %v2967_v31  ;;  %v2984_v1 = vunpack.i.h.bf16 %v3961_v37 }
 0x308   :  { %v809_v39 = vpack.c.bf16 %v806_v54, %v805_v63  ;;  %v810_v58 = vpack.c.bf16 %v808_v19, %v807_v28 }
 0x309   :  { %v819_v57 = vsel %vm347_vm0, %v2969_v27, %v2973_v15  ;;  %v820_v4 = vsel %vm347_vm0, %v2974_v45, %v2969_v27  ;;  %v821_v36 = vsel %vm347_vm0, %v2968_v34, %v2974_v45  ;;  %v822_v40 = vsel %vm347_vm0, %v2973_v15, %v2968_v34 }
 0x30a   :  { %v823_v2 = vpack.c.bf16 %v820_v4, %v821_v36  ;;  %v824_v3 = vpack.c.bf16 %v822_v40, %v819_v57  ;;  %v921_v9 = vunpack.c.l.b16 %v809_v39  ;;  %v922_v18 = vunpack.c.h.b16 %v809_v39 }
 0x30b   :  { %v2983_v27 = vunpack.i.l.bf16 %v3961_v37  ;;  %v4013_v15 = vpack.c.bf16 %v745_v47, %v746_v44  ;;  %v752_v34 = vunpack.c.h.bf16 %v3995_v24  ;;  %v923_v36 = vunpack.c.l.b16 %v810_v58 }
 0x30c   :  { %v825_v31 = vunpack.c.l.bf16 %v823_v2  ;;  %v826_v63 = vunpack.c.h.bf16 %v823_v2  ;;  %v827_v54 = vunpack.c.l.bf16 %v824_v3  ;;  %v828_v45 = vunpack.c.h.bf16 %v824_v3 }
 0x30d   :  { %v924_v40 = vunpack.c.h.b16 %v810_v58  ;;  %v925_v44 = vpack.c.b16 %v921_v9, %v921_v9  ;;  %v926_v47 = vpack.c.b16 %v922_v18, %v922_v18 }
 0x30e   :  { %v2977_v20 = vpop.permute.xlu1 %2976  ;;  %v829_v35 = vmul.f32 %v825_v31, %v3622_v23  ;;  %v830_v57 = vmul.f32 %v826_v63, %v3624_v29  ;;  %v831_v39 = vmul.f32 %v827_v54, %v3626_v30  ;;  %v832_v28 = vmul.f32 %v828_v45, %v3631_v33 }
 0x30f   :  { %v2979_v19 = vunpack.i.h.bf16 %v2977_v20  ;;  %v2978_v4 = vunpack.i.l.bf16 %v2977_v20  ;;  %v928_v18 = vpack.c.b16 %v924_v40, %v924_v40 }
 0x310   :  { %v833_v37 = vpack.c.bf16 %v830_v57, %v829_v35  ;;  %v834_v2 = vpack.c.bf16 %v832_v28, %v831_v39  ;;  %v927_v35 = vpack.c.b16 %v923_v36, %v923_v36 }
 0x311   :  { %v771_v24 = vsel %vm283_vm5, %v2979_v19, %v2983_v27  ;;  %v772_v3 = vsel %vm283_vm5, %v2984_v1, %v2979_v19  ;;  %v773_v31 = vsel %vm283_vm5, %v2978_v4, %v2984_v1  ;;  %v774_v63 = vsel %vm283_vm5, %v2983_v27, %v2978_v4 }
 0x312   :  { %v775_v54 = vpack.c.bf16 %v772_v3, %v773_v31  ;;  %v776_v45 = vpack.c.bf16 %v774_v63, %v771_v24  ;;  %v931_v20 = vunpack.c.l.b16 %v833_v37  ;;  %v932_v58 = vunpack.c.h.b16 %v833_v37 }
 0x313   :  { %v933_v9 = vunpack.c.l.b16 %v834_v2  ;;  %v934_v57 = vunpack.c.h.b16 %v834_v2  ;;  %v903_v2 = vunpack.c.l.b16 %v3988_v48  ;;  %v904_v24 = vunpack.c.h.b16 %v3988_v48 }
 0x314   :  { %v777_v39 = vunpack.c.l.bf16 %v775_v54  ;;  %v778_v28 = vunpack.c.h.bf16 %v775_v54  ;;  %v779_v38 = vunpack.c.l.bf16 %v776_v45  ;;  %v780_v42 = vunpack.c.h.bf16 %v776_v45 }
 0x315   :  { %v935_v33 = vpack.c.b16 %v931_v20, %v931_v20  ;;  %v936_v19 = vpack.c.b16 %v932_v58, %v932_v58  ;;  %v937_v30 = vpack.c.b16 %v933_v9, %v933_v9  ;;  %v938_v29 = vpack.c.b16 %v934_v57, %v934_v57 }
 0x316   :  { %v2987_v1 = vpop.permute.xlu1 %2986  ;;  %v781_v23 = vmul.f32 %v777_v39, %v3686_v16  ;;  %v782_v27 = vmul.f32 %v778_v28, %v3688_v17  ;;  %v783_v4 = vmul.f32 %v779_v38, %v3691_v22  ;;  %v784_v36 = vmul.f32 %v780_v42, %v3693_v0  ;;  %v3012_v39 = vpop.permute.xlu2 %3011 }
 0x317   :  { %v999_v40 = vsel %vm493_vm6, %v925_v44, %v935_v33  ;;  %v1003_v37 = vsel %vm493_vm6, %v926_v47, %v936_v19  ;;  %v753_v3 = vunpack.c.l.bf16 %v4013_v15  ;;  %v1007_v31 = vsel %vm493_vm6, %v927_v35, %v937_v30  ;;  %v4050_v28 = vpop.permute.xlu0 %3016 }
 0x318   :  { %1032 = vmatpush.bf16.msrb.mxu0 %v999_v40  ;;  %1045 = vmatpush.bf16.msrb.mxu1 %v1003_v37  ;;  %v1011_v63 = vsel %vm493_vm6, %v928_v18, %v938_v29  ;;  %v785_v54 = vpack.c.bf16 %v782_v27, %v781_v23  ;;  %v754_v38 = vunpack.c.h.bf16 %v4013_v15  ;;  %v5103_v33 = vunpack.c.l.b16 %v3935_v8 }
 0x319   :  { %1058 = vmatpush.bf16.msrb.mxu2 %v1007_v31  ;;  %1071 = vmatpush.bf16.msrb.mxu3 %v1011_v63  ;;  %v786_v44 = vpack.c.bf16 %v784_v36, %v783_v4  ;;  %v755_v45 = vmul.f32 %v751_v41, %v3858_v7  ;;  %v756_v20 = vmul.f32 %v752_v34, %v3860_v12  ;;  %v5104_v30 = vunpack.c.h.b16 %v3935_v8 }
 0x31a   :  { %v905_v42 = vpack.c.b16 %v5103_v33, %v5103_v33  ;;  %v911_v47 = vunpack.c.l.b16 %v785_v54  ;;  %v912_v48 = vunpack.c.h.b16 %v785_v54  ;;  %v907_v23 = vpack.c.b16 %v903_v2, %v903_v2 }
 0x31b   :  { %v906_v29 = vpack.c.b16 %v5104_v30, %v5104_v30  ;;  %v913_v58 = vunpack.c.l.b16 %v786_v44  ;;  %v914_v15 = vunpack.c.h.b16 %v786_v44  ;;  %v908_v18 = vpack.c.b16 %v904_v24, %v904_v24 }
 0x31c   :  { %v915_v35 = vpack.c.b16 %v911_v47, %v911_v47  ;;  %v916_v9 = vpack.c.b16 %v912_v48, %v912_v48  ;;  %v757_v57 = vmul.f32 %v753_v3, %v3882_v25  ;;  %v2989_v19 = vunpack.i.h.bf16 %v2987_v1 }
 0x31d   :  { %v2988_v27 = vunpack.i.l.bf16 %v2987_v1  ;;  %v917_v41 = vpack.c.b16 %v913_v58, %v913_v58  ;;  %v918_v4 = vpack.c.b16 %v914_v15, %v914_v15  ;;  %v759_v40 = vpack.c.bf16 %v756_v20, %v755_v45 }
 0x31e   :  { %v2992_v34 = vpop.permute.xlu1 %2991  ;;  %v983_v8 = vsel %vm493_vm6, %v905_v42, %v915_v35  ;;  %v987_v36 = vsel %vm493_vm6, %v906_v29, %v916_v9  ;;  %v758_v37 = vmul.f32 %v754_v38, %v3884_v13  ;;  %v3014_v63 = vunpack.i.h.bf16 %v3012_v39 }
 0x31f   :  { %v2994_v2 = vunpack.i.h.bf16 %v2992_v34  ;;  %v2993_v31 = vunpack.i.l.bf16 %v2992_v34  ;;  %1033 = vmatpush.bf16.msrb.mxu0 %v983_v8  ;;  %1046 = vmatpush.bf16.msrb.mxu1 %v987_v36  ;;  %v991_v24 = vsel %vm493_vm6, %v907_v23, %v917_v41  ;;  %v995_v3 = vsel %vm493_vm6, %v908_v18, %v918_v4  ;;  %v690_v41 = vpop.permute.xlu2 %689 }
 0x320   :  { %v3013_v1 = vunpack.i.l.bf16 %v3012_v39  ;;  %v3019_v54 = vunpack.i.h.bf16 %v4050_v28  ;;  %v3018_v33 = vunpack.i.l.bf16 %v4050_v28  ;;  %1059 = vmatpush.bf16.msrb.mxu2 %v991_v24  ;;  %1072 = vmatpush.bf16.msrb.mxu3 %v995_v3  ;;  %v722_v42 = vsel %vm217_vm3, %v2988_v27, %v2989_v19 }
 0x321   :  { %v721_v38 = vsel %vm217_vm3, %v2989_v19, %v2993_v31  ;;  %v723_v44 = vsel %vm217_vm3, %v2994_v2, %v2988_v27  ;;  %v724_v47 = vsel %vm217_vm3, %v2993_v31, %v2994_v2  ;;  %v891_v20 = vunpack.c.l.b16 %v759_v40 }
 0x322   :  { %v725_v48 = vpack.c.bf16 %v723_v44, %v724_v47  ;;  %v726_v45 = vpack.c.bf16 %v721_v38, %v722_v42  ;;  %v760_v30 = vpack.c.bf16 %v758_v37, %v757_v57  ;;  %v676_v35 = vsel %vm154_vm7, %v3013_v1, %v3014_v63 }
 0x323   :  { %v698_v9 = vsel %vm185_vm8, %v3018_v33, %v3019_v54  ;;  %v892_v18 = vunpack.c.h.b16 %v759_v40  ;;  %v699_v37 = vsel %vm185_vm8, %v690_v41, %v3018_v33  ;;  %v895_v31 = vpack.c.b16 %v891_v20, %v891_v20 }
 0x324   :  { %v727_v29 = vunpack.c.l.bf16 %v725_v48  ;;  %v728_v23 = vunpack.c.h.bf16 %v725_v48  ;;  %v729_v58 = vunpack.c.l.bf16 %v726_v45  ;;  %v730_v15 = vunpack.c.h.bf16 %v726_v45 }
 0x325   :  { %v893_v8 = vunpack.c.l.b16 %v760_v30  ;;  %v894_v36 = vunpack.c.h.b16 %v760_v30  ;;  %v896_v38 = vpack.c.b16 %v892_v18, %v892_v18 }
 0x326   :  { %v3007_v39 = vpop.permute.xlu1 %3006  ;;  %v731_v28 = vmul.f32 %v727_v29, %v3730_v6  ;;  %v732_v19 = vmul.f32 %v728_v23, %v3849_v32  ;;  %v733_v27 = vmul.f32 %v729_v58, %v3871_v21  ;;  %v734_v57 = vmul.f32 %v730_v15, %v3877_v14 }
 0x327   :  { %v3009_v4 = vunpack.i.h.bf16 %v3007_v39  ;;  %v3008_v34 = vunpack.i.l.bf16 %v3007_v39  ;;  %v897_v29 = vpack.c.b16 %v893_v8, %v893_v8  ;;  %v898_v23 = vpack.c.b16 %v894_v36, %v894_v36 }
 0x328   :  { %v735_v2 = vpack.c.bf16 %v732_v19, %v731_v28  ;;  %v736_v40 = vpack.c.bf16 %v734_v57, %v733_v27 }
 0x329   :  { %v673_v24 = vsel %vm154_vm7, %v3009_v4, %v3013_v1  ;;  %v674_v3 = vsel %vm154_vm7, %v3008_v34, %v3009_v4  ;;  %v675_v42 = vsel %vm154_vm7, %v3014_v63, %v3008_v34 }
 0x32a   :  { %v677_v44 = vpack.c.bf16 %v675_v42, %v676_v35  ;;  %v678_v47 = vpack.c.bf16 %v673_v24, %v674_v3  ;;  %v881_v48 = vunpack.c.l.b16 %v735_v2  ;;  %v882_v45 = vunpack.c.h.b16 %v735_v2 }
 0x32b   :  { %v883_v30 = vunpack.c.l.b16 %v736_v40  ;;  %v884_v33 = vunpack.c.h.b16 %v736_v40 }
 0x32c   :  { %v679_v20 = vunpack.c.l.bf16 %v677_v44  ;;  %v680_v58 = vunpack.c.h.bf16 %v677_v44  ;;  %v681_v15 = vunpack.c.l.bf16 %v678_v47  ;;  %v682_v39 = vunpack.c.h.bf16 %v678_v47 }
 0x32d   :  { %v885_v1 = vpack.c.b16 %v881_v48, %v881_v48  ;;  %v886_v28 = vpack.c.b16 %v882_v45, %v882_v45  ;;  %v887_v19 = vpack.c.b16 %v883_v30, %v883_v30  ;;  %v888_v27 = vpack.c.b16 %v884_v33, %v884_v33 }
 0x32e   :  { %v696_v57 = vpop.permute.xlu1 %695  ;;  %v683_v63 = vmul.f32 %v679_v20, %v3886_v26  ;;  %v684_v35 = vmul.f32 %v680_v58, %v3888_v46  ;;  %v685_v18 = vmul.f32 %v681_v15, %v3905_v61  ;;  %v686_v4 = vmul.f32 %v682_v39, %v3907_v5 }
 0x32f   :  { %v697_v34 = vsel %vm185_vm8, %v3019_v54, %v696_v57  ;;  %v700_v8 = vsel %vm185_vm8, %v696_v57, %v690_v41  ;;  %v967_v36 = vsel %vm493_vm6, %v885_v1, %v895_v31  ;;  %v971_v2 = vsel %vm493_vm6, %v886_v28, %v896_v38 }
 0x330   :  { %v701_v40 = vpack.c.bf16 %v699_v37, %v700_v8  ;;  %v702_v24 = vpack.c.bf16 %v697_v34, %v698_v9  ;;  %1034 = vmatpush.bf16.msrb.mxu0 %v967_v36  ;;  %1047 = vmatpush.bf16.msrb.mxu1 %v971_v2  ;;  %v975_v3 = vsel %vm493_vm6, %v887_v19, %v897_v29 }
 0x331   :  { %1060 = vmatpush.bf16.msrb.mxu2 %v975_v3  ;;  %v979_v42 = vsel %vm493_vm6, %v888_v27, %v898_v23  ;;  %v687_v44 = vpack.c.bf16 %v684_v35, %v683_v63  ;;  %v688_v47 = vpack.c.bf16 %v686_v4, %v685_v18 }
 0x332   :  { %v703_v48 = vunpack.c.l.bf16 %v701_v40  ;;  %v704_v54 = vunpack.c.h.bf16 %v701_v40  ;;  %v705_v45 = vunpack.c.l.bf16 %v702_v24  ;;  %v706_v30 = vunpack.c.h.bf16 %v702_v24  ;;  %1073 = vmatpush.bf16.msrb.mxu3 %v979_v42  ;;  %v134_v24 = vld [vmem:[#allocation10] sm:$0xf] }
 0x333   :  { %v861_v38 = vunpack.c.l.b16 %v687_v44  ;;  %v862_v29 = vunpack.c.h.b16 %v687_v44  ;;  %v863_v33 = vunpack.c.l.b16 %v688_v47  ;;  %v864_v20 = vunpack.c.h.b16 %v688_v47 }
 0x334   :  { %v707_v41 = vmul.f32 %v703_v48, %v3824_v43  ;;  %v708_v31 = vmul.f32 %v704_v54, %v3826_v11  ;;  %v709_v9 = vmul.f32 %v705_v45, %v3840_v59  ;;  %v710_v37 = vmul.f32 %v706_v30, %v3842_v60 }
 0x335   :  { %v865_v19 = vpack.c.b16 %v861_v38, %v861_v38  ;;  %v866_v27 = vpack.c.b16 %v862_v29, %v862_v29  ;;  %v867_v57 = vpack.c.b16 %v863_v33, %v863_v33  ;;  %v868_v63 = vpack.c.b16 %v864_v20, %v864_v20 }
 0x336   :  { %v711_v23 = vpack.c.bf16 %v708_v31, %v707_v41  ;;  %v712_v58 = vpack.c.bf16 %v710_v37, %v709_v9 }
 0x338   :  { %v871_v15 = vunpack.c.l.b16 %v711_v23  ;;  %v872_v39 = vunpack.c.h.b16 %v711_v23  ;;  %v873_v1 = vunpack.c.l.b16 %v712_v58  ;;  %v874_v28 = vunpack.c.h.b16 %v712_v58 }
 0x33a   :  { %v875_v35 = vpack.c.b16 %v871_v15, %v871_v15  ;;  %v876_v18 = vpack.c.b16 %v872_v39, %v872_v39  ;;  %v877_v4 = vpack.c.b16 %v873_v1, %v873_v1  ;;  %v878_v34 = vpack.c.b16 %v874_v28, %v874_v28 }
 0x33c   :  { %v951_v8 = vsel %vm493_vm6, %v865_v19, %v875_v35  ;;  %v955_v36 = vsel %vm493_vm6, %v866_v27, %v876_v18  ;;  %v959_v2 = vsel %vm493_vm6, %v867_v57, %v877_v4  ;;  %v963_v40 = vsel %vm493_vm6, %v868_v63, %v878_v34 }
 0x33d   :  { %1035 = vmatpush.bf16.msrb.mxu0 %v951_v8  ;;  %1048 = vmatpush.bf16.msrb.mxu1 %v955_v36 }
 0x33e   :  { %1061 = vmatpush.bf16.msrb.mxu2 %v959_v2  ;;  %1074 = vmatpush.bf16.msrb.mxu3 %v963_v40 }
 0x340   :  { %2833 = vmatmul.msk.bf16.vlgmr.msrb.gmra.mxu0 %vm558_vm9, %v134_v24  ;;  %2834 = vmatmul.msk.bf16.vlgmr.msrb.gmra.mxu1 %vm558_vm9, %v134_v24 }
 0x341   :  { %2835 = vmatmul.msk.bf16.vlgmr.msrb.gmra.mxu2 %vm558_vm9, %v134_v24  ;;  %2836 = vmatmul.msk.bf16.vlgmr.msrb.gmra.mxu3 %vm558_vm9, %v134_v24 }
 0x3bd   :  { %v1037_v3 = vpop.f32.mrf.mxu0  ;;  %v1050_v42 = vpop.f32.mrf.mxu1 }
 0x3be   :  { %v1080_v44 = vadd.f32 %v1050_v42, %v1037_v3 }
 0x3c4   :  { %v1063_v47 = vpop.f32.mrf.mxu2  ;;  %v1076_v48 = vpop.f32.mrf.mxu3 }
 0x3c5   :  { %v1081_v54 = vadd.f32 %v1080_v44, %v1063_v47  ;;  %v1039_v45 = vpop.f32.mrf.mxu0  ;;  %v1052_v30 = vpop.f32.mrf.mxu1 }
 0x3c7   :  { %v1082_v41 = vadd.f32 %v1081_v54, %v1076_v48 }
 0x3c9   :  { %1083 = vadd.xlane.f32.xlu0 %v1082_v41 }
 0x3cc   :  { %v1065_v31 = vpop.f32.mrf.mxu2  ;;  %v1078_v9 = vpop.f32.mrf.mxu3 }
 0x43c   :  { %v1084_v37 = vpop.xlane.xlu0 %1083 }
 0x43d   :  { %v1085_v38 = vmul.f32 0.001953125, %v1084_v37 }
 0x43f   :  { %v1086_v29 = vsub.f32 %v1037_v3, %v1085_v38  ;;  %v1087_v33 = vsub.f32 %v1050_v42, %v1085_v38  ;;  %v1088_v20 = vsub.f32 %v1063_v47, %v1085_v38  ;;  %v1089_v23 = vsub.f32 %v1076_v48, %v1085_v38 }
 0x441   :  { %v1090_v58 = vmul.f32 %v1086_v29, %v1086_v29  ;;  %v1091_v15 = vmul.f32 %v1087_v33, %v1087_v33  ;;  %v1092_v39 = vmul.f32 %v1088_v20, %v1088_v20  ;;  %v1093_v28 = vmul.f32 %v1089_v23, %v1089_v23 }
 0x443   :  { %v1094_v1 = vadd.f32 %v1091_v15, %v1090_v58 }
 0x445   :  { %v1095_v19 = vadd.f32 %v1094_v1, %v1092_v39 }
 0x447   :  { %v1096_v27 = vadd.f32 %v1095_v19, %v1093_v28 }
 0x449   :  { %1097 = vadd.xlane.f32.xlu1 %v1096_v27 }
 0x4bc   :  { %v1098_v57 = vpop.xlane.xlu1 %1097 }
 0x4bd   :  { %v1099_v63 = vmul.f32 0.001953125, %v1098_v57 }
 0x4bf   :  { %v1100_v35 = vadd.f32 1e-05, %v1099_v63 }
 0x4c1   :  { %3282 = vrsqrt.f32 %v1100_v35  ;;  %vm1107_vm14 = vweird.f32 %v1100_v35 }
 0x4c7   :  { %v3283_v18 = vpop.eup %3282 }
 0x4c8   :  { %v1102_v4 = vmul.f32 %v3283_v18, %v1100_v35  ;;  %vm1108_vm13 = vweird.f32 %v3283_v18 }
 0x4c9   :  { %vm1109_vm15 = vmor %vm1107_vm14, %vm1108_vm13 }
 0x4ca   :  { %v1103_v34 = vmul.f32 %v3283_v18, %v1102_v4 }
 0x4cc   :  { %v1104_v8 = vmul.f32 0.5, %v1103_v34 }
 0x4ce   :  { %v1105_v36 = vsub.f32 1.5, %v1104_v8 }
 0x4d0   :  { %v1106_v2 = vmul.f32 %v3283_v18, %v1105_v36 }
 0x4d2   :  { %v1110_v40 = vsel %vm1109_vm15, %v3283_v18, %v1106_v2 }
 0x4d3   :  { %v1111_v24 = vmul.f32 %v1110_v40, %v1086_v29  ;;  %v1112_v3 = vmul.f32 %v1110_v40, %v1087_v33  ;;  %v1113_v42 = vmul.f32 %v1110_v40, %v1088_v20  ;;  %v1114_v44 = vmul.f32 %v1110_v40, %v1089_v23 }
 0x4d5   :  { %v4107_v47 = vmax.f32 %v1111_v24, 0.0  ;;  %v4109_v48 = vmax.f32 %v1112_v3, 0.0  ;;  %v4111_v54 = vmax.f32 %v1113_v42, 0.0  ;;  %v4113_v45 = vmax.f32 %v1114_v44, 0.0 }
 0x4d7   :  { %5105 = vst [vmem:[#allocation32_spill] sm:$0xff] %v4107_v47  ;;  %v3055_v30 = vpack.i.bf16 %v4109_v48, %v4113_v45  ;;  %v3020_v41 = vpack.i.bf16 %v4111_v54, %v4107_v47  ;;  %v3075_v31 = vpack.i.bf16 %v4111_v54, %v4109_v48  ;;  %v3065_v9 = vpack.i.bf16 %v4107_v47, %v4113_v45 }
 0x4d8   :  { %5106 = vst [vmem:[#allocation33_spill] sm:$0xff] %v4109_v48 }
 0x4d9   :  { %5107 = vst [vmem:[#allocation34_spill] sm:$0xff] %v4111_v54  ;;  %3056 = vrot.lane.b32.xlu1 %v3055_v30, %s3504_s17  ;;  %3046 = vrot.lane.b32.xlu0 %v3055_v30, %s3503_s16 }
 0x4da   :  { %5108 = vst [vmem:[#allocation35_spill] sm:$0xff] %v4113_v45  ;;  %3021 = vrot.lane.b32.xlu2 %v3020_v41, %s3502_s7 }
 0x4e1   :  { %3076 = vrot.lane.b32.xlu1 %v3075_v31, %s3507_s19  ;;  %3071 = vrot.lane.b32.xlu0 %v3075_v31, %s3506_s1 }
 0x4e2   :  { %3026 = vrot.lane.b32.xlu2 %v3055_v30, %s3502_s7 }
 0x4e9   :  { %1149 = vrot.lane.b32.xlu1 %v4113_v45, %s3494_s14  ;;  %1125 = vrot.lane.b32.xlu0 %v4113_v45, %s3507_s19 }
 0x4ea   :  { %3031 = vrot.lane.b32.xlu2 %v3020_v41, %s3501_s4 }
 0x4f1   :  { %1143 = vrot.lane.b32.xlu1 %v4107_v47, %s3494_s14  ;;  %1191 = vrot.lane.b32.xlu0 %v4107_v47, %s3506_s1 }
 0x4f2   :  { %3036 = vrot.lane.b32.xlu2 %v3055_v30, %s3501_s4 }
 0x4fa   :  { %3041 = vrot.lane.b32.xlu2 %v3020_v41, %s3503_s16 }
 0x502   :  { %3051 = vrot.lane.b32.xlu2 %v3020_v41, %s3504_s17 }
 0x50a   :  { %3061 = vrot.lane.b32.xlu2 %v3075_v31, %s3505_s18 }
 0x512   :  { %3066 = vrot.lane.b32.xlu2 %v3065_v9, %s3505_s18 }
 0x51a   :  { %1197 = vrot.lane.b32.xlu2 %v4113_v45, %s3506_s1 }
 0x522   :  { %3081 = vrot.lane.b32.xlu2 %v3075_v31, %s3494_s14 }
 0x52a   :  { %1119 = vrot.lane.b32.xlu2 %v4107_v47, %s3507_s19 }
 0x534   :  { %v3022_v37 = vpop.permute.xlu2 %3021 }
 0x535   :  { %v3024_v29 = vunpack.i.h.bf16 %v3022_v37  ;;  %v3023_v33 = vunpack.i.l.bf16 %v3022_v37 }
 0x53c   :  { %v3027_v38 = vpop.permute.xlu2 %3026 }
 0x53d   :  { %v3029_v20 = vunpack.i.h.bf16 %v3027_v38  ;;  %v3028_v23 = vunpack.i.l.bf16 %v3027_v38 }
 0x53f   :  { %v1297_v58 = vsel %vm379_vm2, %v3024_v29, %v3028_v23  ;;  %v1298_v15 = vsel %vm379_vm2, %v3029_v20, %v3024_v29  ;;  %v1299_v39 = vsel %vm379_vm2, %v3023_v33, %v3029_v20  ;;  %v1300_v1 = vsel %vm379_vm2, %v3028_v23, %v3023_v33 }
 0x540   :  { %v1301_v28 = vpack.c.bf16 %v1298_v15, %v1299_v39  ;;  %v1302_v19 = vpack.c.bf16 %v1300_v1, %v1297_v58 }
 0x542   :  { %v1303_v27 = vunpack.c.l.bf16 %v1301_v28  ;;  %v1304_v57 = vunpack.c.h.bf16 %v1301_v28  ;;  %v1305_v63 = vunpack.c.l.bf16 %v1302_v19  ;;  %v1306_v35 = vunpack.c.h.bf16 %v1302_v19 }
 0x544   :  { %v3032_v18 = vpop.permute.xlu2 %3031  ;;  %v1307_v4 = vmul.f32 %v1303_v27, %v3643_v49  ;;  %v1308_v34 = vmul.f32 %v1304_v57, %v3645_v50  ;;  %v1309_v8 = vmul.f32 %v1305_v63, %v3648_v51  ;;  %v1310_v36 = vmul.f32 %v1306_v35, %v3650_v52 }
 0x545   :  { %v3034_v37 = vunpack.i.h.bf16 %v3032_v18  ;;  %v3033_v38 = vunpack.i.l.bf16 %v3032_v18 }
 0x546   :  { %v1311_v2 = vpack.c.bf16 %v1308_v34, %v1307_v4  ;;  %v1312_v40 = vpack.c.bf16 %v1310_v36, %v1309_v8 }
 0x548   :  { %v1395_v24 = vunpack.c.l.b16 %v1311_v2  ;;  %v1396_v3 = vunpack.c.h.b16 %v1311_v2  ;;  %v1397_v42 = vunpack.c.l.b16 %v1312_v40  ;;  %v1398_v44 = vunpack.c.h.b16 %v1312_v40 }
 0x54a   :  { %v1399_v30 = vpack.c.b16 %v1395_v24, %v1395_v24  ;;  %v1400_v41 = vpack.c.b16 %v1396_v3, %v1396_v3  ;;  %v1401_v31 = vpack.c.b16 %v1397_v42, %v1397_v42  ;;  %v1402_v9 = vpack.c.b16 %v1398_v44, %v1398_v44 }
 0x54b   :  { %v3047_v35 = vpop.permute.xlu0 %3046 }
 0x54c   :  { %v3037_v29 = vpop.permute.xlu2 %3036  ;;  %v1471_v23 = vsel %vm493_vm6, %v1399_v30, 0  ;;  %v1474_v58 = vsel %vm493_vm6, %v1400_v41, 0  ;;  %v1477_v15 = vsel %vm493_vm6, %v1401_v31, 0  ;;  %v1480_v39 = vsel %vm493_vm6, %v1402_v9, 0 }
 0x54d   :  { %v3039_v33 = vunpack.i.h.bf16 %v3037_v29  ;;  %v3038_v20 = vunpack.i.l.bf16 %v3037_v29  ;;  %1485 = vmatpush.bf16.msra.mxu0 %v1471_v23  ;;  %1498 = vmatpush.bf16.msra.mxu1 %v1474_v58  ;;  %v3049_v36 = vunpack.i.h.bf16 %v3047_v35  ;;  %v3048_v2 = vunpack.i.l.bf16 %v3047_v35  ;;  %v3057_v29 = vpop.permute.xlu1 %3056 }
 0x54e   :  { %1511 = vmatpush.bf16.msra.mxu2 %v1477_v15  ;;  %1524 = vmatpush.bf16.msra.mxu3 %v1480_v39  ;;  %v4186_v23 = vpack.c.bf16 %v4109_v48, %v4107_v47 }
 0x54f   :  { %v1249_v1 = vsel %vm315_vm1, %v3034_v37, %v3038_v20  ;;  %v1250_v28 = vsel %vm315_vm1, %v3039_v33, %v3034_v37  ;;  %v1251_v19 = vsel %vm315_vm1, %v3033_v38, %v3039_v33  ;;  %v1252_v27 = vsel %vm315_vm1, %v3038_v20, %v3033_v38 }
 0x550   :  { %v1253_v57 = vpack.c.bf16 %v1250_v28, %v1251_v19  ;;  %v1254_v63 = vpack.c.bf16 %v1252_v27, %v1249_v1 }
 0x552   :  { %v1255_v18 = vunpack.c.l.bf16 %v1253_v57  ;;  %v1256_v4 = vunpack.c.h.bf16 %v1253_v57  ;;  %v1257_v34 = vunpack.c.l.bf16 %v1254_v63  ;;  %v1258_v8 = vunpack.c.h.bf16 %v1254_v63 }
 0x553   :  { %v4188_v19 = vpop.permute.xlu0 %3071  ;;  %v4192_v57 = vpack.c.bf16 %v4113_v45, %v4111_v54  ;;  %v3059_v63 = vunpack.i.h.bf16 %v3057_v29 }
 0x554   :  { %v3042_v40 = vpop.permute.xlu2 %3041  ;;  %v1259_v42 = vmul.f32 %v1255_v18, %v3652_v53  ;;  %v1260_v44 = vmul.f32 %v1256_v4, %v3656_v55  ;;  %v1261_v30 = vmul.f32 %v1257_v34, %v3658_v56  ;;  %v1262_v41 = vmul.f32 %v1258_v8, %v3672_v62  ;;  %v5109_v18 = vld [vmem:[#allocation20_spill] sm:$0xff]  ;;  %v5110_v34 = vld [vmem:[#allocation21_spill] sm:$0xff] }
 0x555   :  { %v3044_v24 = vunpack.i.h.bf16 %v3042_v40  ;;  %v3043_v3 = vunpack.i.l.bf16 %v3042_v40 }
 0x556   :  { %v1263_v58 = vpack.c.bf16 %v1260_v44, %v1259_v42  ;;  %v1264_v27 = vpack.c.bf16 %v1262_v41, %v1261_v30  ;;  %v5112_v41 = vld [vmem:[#allocation23_spill] sm:$0xff] }
 0x557   :  { %v1273_v31 = vsel %vm347_vm0, %v3044_v24, %v3048_v2  ;;  %v1274_v9 = vsel %vm347_vm0, %v3049_v36, %v3044_v24  ;;  %v1275_v37 = vsel %vm347_vm0, %v3043_v3, %v3049_v36  ;;  %v1276_v38 = vsel %vm347_vm0, %v3048_v2, %v3043_v3 }
 0x558   :  { %v1277_v33 = vpack.c.bf16 %v1274_v9, %v1275_v37  ;;  %v1278_v20 = vpack.c.bf16 %v1276_v38, %v1273_v31  ;;  %v1355_v36 = vunpack.c.l.b16 %v4186_v23  ;;  %v3058_v2 = vunpack.i.l.bf16 %v3057_v29  ;;  %v5111_v31 = vld [vmem:[#allocation22_spill] sm:$0xff] }
 0x559   :  { %v1375_v3 = vunpack.c.l.b16 %v1263_v58  ;;  %v1376_v44 = vunpack.c.h.b16 %v1263_v58 }
 0x55a   :  { %v1279_v15 = vunpack.c.l.bf16 %v1277_v33  ;;  %v1280_v39 = vunpack.c.h.bf16 %v1277_v33  ;;  %v1281_v1 = vunpack.c.l.bf16 %v1278_v20  ;;  %v1282_v28 = vunpack.c.h.bf16 %v1278_v20 }
 0x55b   :  { %v1377_v33 = vunpack.c.l.b16 %v1264_v27  ;;  %v1356_v20 = vunpack.c.h.b16 %v4186_v23  ;;  %v1380_v54 = vpack.c.b16 %v1376_v44, %v1376_v44  ;;  %v4216_v44 = vpop.permute.xlu0 %1125 }
 0x55c   :  { %v3052_v35 = vpop.permute.xlu2 %3051  ;;  %v1283_v4 = vmul.f32 %v1279_v15, %v5109_v18  ;;  %v1284_v8 = vmul.f32 %v1280_v39, %v5110_v34  ;;  %v1285_v30 = vmul.f32 %v1281_v1, %v5111_v31  ;;  %v1286_v9 = vmul.f32 %v1282_v28, %v5112_v41 }
 0x55d   :  { %v3054_v40 = vunpack.i.h.bf16 %v3052_v35  ;;  %v3053_v24 = vunpack.i.l.bf16 %v3052_v35  ;;  %v1379_v28 = vpack.c.b16 %v1375_v3, %v1375_v3  ;;  %v1358_v3 = vunpack.c.h.b16 %v4192_v57 }
 0x55e   :  { %v1287_v42 = vpack.c.bf16 %v1284_v8, %v1283_v4  ;;  %v1378_v4 = vunpack.c.h.b16 %v1264_v27  ;;  %v4208_v8 = vpop.permute.xlu1 %3076  ;;  %v1288_v48 = vpack.c.bf16 %v1286_v9, %v1285_v30 }
 0x55f   :  { %v1225_v37 = vsel %vm283_vm5, %v3054_v40, %v3058_v2  ;;  %v1226_v38 = vsel %vm283_vm5, %v3059_v63, %v3054_v40  ;;  %v1227_v29 = vsel %vm283_vm5, %v3053_v24, %v3059_v63  ;;  %v1228_v15 = vsel %vm283_vm5, %v3058_v2, %v3053_v24 }
 0x560   :  { %v1385_v58 = vunpack.c.l.b16 %v1287_v42  ;;  %v1386_v39 = vunpack.c.h.b16 %v1287_v42  ;;  %v1229_v1 = vpack.c.bf16 %v1226_v38, %v1227_v29  ;;  %v1230_v35 = vpack.c.bf16 %v1228_v15, %v1225_v37 }
 0x561   :  { %v1357_v24 = vunpack.c.l.b16 %v4192_v57  ;;  %v3079_v27 = vunpack.i.h.bf16 %v4208_v8  ;;  %v3078_v42 = vunpack.i.l.bf16 %v4208_v8  ;;  %v1387_v30 = vunpack.c.l.b16 %v1288_v48 }
 0x562   :  { %v1389_v45 = vpack.c.b16 %v1385_v58, %v1385_v58  ;;  %v1390_v40 = vpack.c.b16 %v1386_v39, %v1386_v39  ;;  %v1231_v47 = vunpack.c.l.bf16 %v1229_v1  ;;  %v1232_v23 = vunpack.c.h.bf16 %v1229_v1 }
 0x563   :  { %v1233_v41 = vunpack.c.l.bf16 %v1230_v35  ;;  %v1234_v31 = vunpack.c.h.bf16 %v1230_v35  ;;  %v1388_v9 = vunpack.c.h.b16 %v1288_v48  ;;  %v1381_v29 = vpack.c.b16 %v1377_v33, %v1377_v33 }
 0x564   :  { %v3062_v63 = vpop.permute.xlu2 %3061  ;;  %v1453_v62 = vsel %vm493_vm6, %v1379_v28, %v1389_v45  ;;  %v1457_v2 = vsel %vm493_vm6, %v1380_v54, %v1390_v40  ;;  %v1235_v37 = vmul.f32 %v1231_v47, %v3686_v16  ;;  %v1236_v45 = vmul.f32 %v1232_v23, %v3688_v17 }
 0x565   :  { %1486 = vmatpush.bf16.msra.mxu0 %v1453_v62  ;;  %1499 = vmatpush.bf16.msra.mxu1 %v1457_v2  ;;  %v1237_v54 = vmul.f32 %v1233_v41, %v3691_v22  ;;  %v1238_v38 = vmul.f32 %v1234_v31, %v3693_v0  ;;  %v1391_v57 = vpack.c.b16 %v1387_v30, %v1387_v30  ;;  %v3064_v48 = vunpack.i.h.bf16 %v3062_v63 }
 0x566   :  { %v1382_v15 = vpack.c.b16 %v1378_v4, %v1378_v4  ;;  %v1392_v58 = vpack.c.b16 %v1388_v9, %v1388_v9  ;;  %v1127_v39 = vsel %vm154_vm7, %v3079_v27, %v4216_v44  ;;  %v1239_v62 = vpack.c.bf16 %v1236_v45, %v1235_v37 }
 0x567   :  { %v1359_v1 = vpack.c.b16 %v1355_v36, %v1355_v36  ;;  %v1240_v35 = vpack.c.bf16 %v1238_v38, %v1237_v54  ;;  %v3063_v28 = vunpack.i.l.bf16 %v3062_v63  ;;  %v1461_v47 = vsel %vm493_vm6, %v1381_v29, %v1391_v57 }
 0x568   :  { %v1465_v40 = vsel %vm493_vm6, %v1382_v15, %v1392_v58  ;;  %1512 = vmatpush.bf16.msra.mxu2 %v1461_v47  ;;  %v1365_v31 = vunpack.c.l.b16 %v1239_v62  ;;  %v1366_v41 = vunpack.c.h.b16 %v1239_v62  ;;  %v1128_v23 = vsel %vm154_vm7, %v3078_v42, %v3079_v27  ;;  %v4233_v58 = vpop.permute.xlu1 %1149 }
 0x569   :  { %1525 = vmatpush.bf16.msra.mxu3 %v1465_v40  ;;  %v1367_v33 = vunpack.c.l.b16 %v1240_v35  ;;  %v1368_v4 = vunpack.c.h.b16 %v1240_v35  ;;  %v1360_v2 = vpack.c.b16 %v1356_v20, %v1356_v20  ;;  %v1361_v36 = vpack.c.b16 %v1357_v24, %v1357_v24 }
 0x56a   :  { %v1362_v30 = vpack.c.b16 %v1358_v3, %v1358_v3  ;;  %v1369_v63 = vpack.c.b16 %v1365_v31, %v1365_v31  ;;  %v1370_v37 = vpack.c.b16 %v1366_v41, %v1366_v41  ;;  %v1132_v38 = vpack.c.bf16 %v1127_v39, %v1128_v23  ;;  %v1192_v41 = vpop.permute.xlu0 %1191 }
 0x56b   :  { %v1371_v45 = vpack.c.b16 %v1367_v33, %v1367_v33  ;;  %v1372_v54 = vpack.c.b16 %v1368_v4, %v1368_v4  ;;  %v1176_v29 = vsel %vm217_vm3, %v3063_v28, %v3064_v48  ;;  %v3073_v31 = vunpack.i.l.bf16 %v4188_v19 }
 0x56c   :  { %v3067_v9 = vpop.permute.xlu2 %3066  ;;  %v1437_v62 = vsel %vm493_vm6, %v1359_v1, %v1369_v63  ;;  %v1441_v27 = vsel %vm493_vm6, %v1360_v2, %v1370_v37  ;;  %v3074_v1 = vunpack.i.h.bf16 %v4188_v19  ;;  %v1135_v2 = vunpack.c.l.bf16 %v1132_v38 }
 0x56d   :  { %v3069_v57 = vunpack.i.h.bf16 %v3067_v9  ;;  %v3068_v15 = vunpack.i.l.bf16 %v3067_v9  ;;  %v1445_v20 = vsel %vm493_vm6, %v1361_v36, %v1371_v45  ;;  %v1449_v24 = vsel %vm493_vm6, %v1362_v30, %v1372_v54  ;;  %1487 = vmatpush.bf16.msra.mxu0 %v1437_v62  ;;  %1500 = vmatpush.bf16.msra.mxu1 %v1441_v27 }
 0x56e   :  { %1513 = vmatpush.bf16.msra.mxu2 %v1445_v20  ;;  %1526 = vmatpush.bf16.msra.mxu3 %v1449_v24  ;;  %v1201_v45 = vsel %vm249_vm4, %v1192_v41, %v3073_v31  ;;  %v1200_v19 = vsel %vm249_vm4, %v3073_v31, %v3074_v1  ;;  %v1139_v62 = vmul.f32 %v1135_v2, %v3905_v61 }
 0x56f   :  { %v1175_v3 = vsel %vm217_vm3, %v3064_v48, %v3068_v15  ;;  %v1177_v39 = vsel %vm217_vm3, %v3069_v57, %v3063_v28  ;;  %v1178_v35 = vsel %vm217_vm3, %v3068_v15, %v3069_v57  ;;  %v1136_v28 = vunpack.c.h.bf16 %v1132_v38 }
 0x570   :  { %v1179_v47 = vpack.c.bf16 %v1177_v39, %v1178_v35  ;;  %v1180_v40 = vpack.c.bf16 %v1175_v3, %v1176_v29  ;;  %v1144_v24 = vpop.permute.xlu1 %1143 }
 0x571   :  { %v1140_v27 = vmul.f32 %v1136_v28, %v3907_v5 }
 0x572   :  { %v1181_v33 = vunpack.c.l.bf16 %v1179_v47  ;;  %v1182_v4 = vunpack.c.h.bf16 %v1179_v47  ;;  %v1183_v48 = vunpack.c.l.bf16 %v1180_v40  ;;  %v1184_v23 = vunpack.c.h.bf16 %v1180_v40 }
 0x574   :  { %v1198_v36 = vpop.permute.xlu2 %1197  ;;  %v1185_v30 = vmul.f32 %v1181_v33, %v3730_v6  ;;  %v1186_v9 = vmul.f32 %v1182_v4, %v3849_v32  ;;  %v1187_v63 = vmul.f32 %v1183_v48, %v3871_v21  ;;  %v1188_v37 = vmul.f32 %v1184_v23, %v3877_v14 }
 0x575   :  { %v1199_v54 = vsel %vm249_vm4, %v3074_v1, %v1198_v36  ;;  %v1202_v38 = vsel %vm249_vm4, %v1198_v36, %v1192_v41  ;;  %v1154_v4 = vsel %vm185_vm8, %v4233_v58, %v1144_v24 }
 0x576   :  { %v1203_v29 = vpack.c.bf16 %v1201_v45, %v1202_v38  ;;  %v1204_v57 = vpack.c.bf16 %v1199_v54, %v1200_v19  ;;  %v1189_v15 = vpack.c.bf16 %v1186_v9, %v1185_v30  ;;  %v1190_v20 = vpack.c.bf16 %v1188_v37, %v1187_v63 }
 0x577   :  { %v1142_v30 = vpack.c.bf16 %v1140_v27, %v1139_v62 }
 0x578   :  { %v1205_v3 = vunpack.c.l.bf16 %v1203_v29  ;;  %v1206_v39 = vunpack.c.h.bf16 %v1203_v29  ;;  %v1207_v35 = vunpack.c.l.bf16 %v1204_v57  ;;  %v1208_v47 = vunpack.c.h.bf16 %v1204_v57 }
 0x579   :  { %v1335_v40 = vunpack.c.l.b16 %v1189_v15  ;;  %v1336_v48 = vunpack.c.h.b16 %v1189_v15  ;;  %v1337_v36 = vunpack.c.l.b16 %v1190_v20  ;;  %v1338_v45 = vunpack.c.h.b16 %v1190_v20 }
 0x57a   :  { %v1209_v31 = vmul.f32 %v1205_v3, %v3858_v7  ;;  %v1210_v1 = vmul.f32 %v1206_v39, %v3860_v12  ;;  %v1211_v41 = vmul.f32 %v1207_v35, %v3882_v25  ;;  %v1212_v33 = vmul.f32 %v1208_v47, %v3884_v13 }
 0x57b   :  { %v1339_v37 = vpack.c.b16 %v1335_v40, %v1335_v40  ;;  %v1340_v39 = vpack.c.b16 %v1336_v48, %v1336_v48  ;;  %v1341_v20 = vpack.c.b16 %v1337_v36, %v1337_v36 }
 0x57c   :  { %v3082_v23 = vpop.permute.xlu2 %3081  ;;  %v1213_v2 = vpack.c.bf16 %v1210_v1, %v1209_v31  ;;  %v1214_v28 = vpack.c.bf16 %v1212_v33, %v1211_v41  ;;  %v1342_v31 = vpack.c.b16 %v1338_v45, %v1338_v45 }
 0x57d   :  { %v3084_v9 = vunpack.i.h.bf16 %v3082_v23  ;;  %v3083_v63 = vunpack.i.l.bf16 %v3082_v23 }
 0x57e   :  { %v1345_v19 = vunpack.c.l.b16 %v1213_v2  ;;  %v1346_v54 = vunpack.c.h.b16 %v1213_v2  ;;  %v1347_v38 = vunpack.c.l.b16 %v1214_v28  ;;  %v1348_v29 = vunpack.c.h.b16 %v1214_v28 }
 0x57f   :  { %v1151_v57 = vsel %vm185_vm8, %v3084_v9, %v4233_v58  ;;  %v1152_v15 = vsel %vm185_vm8, %v3083_v63, %v3084_v9  ;;  %v1153_v3 = vsel %vm185_vm8, %v1144_v24, %v3083_v63  ;;  %v1317_v63 = vunpack.c.l.b16 %v1142_v30 }
 0x580   :  { %v1155_v62 = vpack.c.bf16 %v1153_v3, %v1154_v4  ;;  %v1156_v27 = vpack.c.bf16 %v1151_v57, %v1152_v15  ;;  %v1349_v35 = vpack.c.b16 %v1345_v19, %v1345_v19  ;;  %v1350_v47 = vpack.c.b16 %v1346_v54, %v1346_v54 }
 0x581   :  { %v1351_v40 = vpack.c.b16 %v1347_v38, %v1347_v38  ;;  %v1352_v1 = vpack.c.b16 %v1348_v29, %v1348_v29  ;;  %v1318_v54 = vunpack.c.h.b16 %v1142_v30 }
 0x582   :  { %v1157_v41 = vunpack.c.l.bf16 %v1155_v62  ;;  %v1158_v33 = vunpack.c.h.bf16 %v1155_v62  ;;  %v1159_v23 = vunpack.c.l.bf16 %v1156_v27  ;;  %v1160_v2 = vunpack.c.h.bf16 %v1156_v27 }
 0x583   :  { %v1421_v58 = vsel %vm493_vm6, %v1339_v37, %v1349_v35  ;;  %v1425_v28 = vsel %vm493_vm6, %v1340_v39, %v1350_v47  ;;  %v1429_v9 = vsel %vm493_vm6, %v1341_v20, %v1351_v40  ;;  %v1433_v24 = vsel %vm493_vm6, %v1342_v31, %v1352_v1 }
 0x584   :  { %1488 = vmatpush.bf16.msra.mxu0 %v1421_v58  ;;  %1501 = vmatpush.bf16.msra.mxu1 %v1425_v28  ;;  %v1120_v4 = vpop.permute.xlu2 %1119  ;;  %v1163_v48 = vmul.f32 %v1159_v23, %v3840_v59  ;;  %v1164_v36 = vmul.f32 %v1160_v2, %v3842_v60  ;;  %v1161_v45 = vmul.f32 %v1157_v41, %v3824_v43 }
 0x585   :  { %1514 = vmatpush.bf16.msra.mxu2 %v1429_v9  ;;  %1527 = vmatpush.bf16.msra.mxu3 %v1433_v24  ;;  %v1129_v37 = vsel %vm154_vm7, %v1120_v4, %v3078_v42  ;;  %v1130_v19 = vsel %vm154_vm7, %v4216_v44, %v1120_v4  ;;  %v1162_v38 = vmul.f32 %v1158_v33, %v3826_v11  ;;  %v135_v33 = vld [vmem:[%s5043_s5] sm:$0xf]  ;;  %s3508_s5 = smov [#allocation14]  }
 0x586   :  { %v1131_v29 = vpack.c.bf16 %v1129_v37, %v1130_v19  ;;  %v1166_v57 = vpack.c.bf16 %v1164_v36, %v1163_v48  ;;  %v1321_v35 = vpack.c.b16 %v1317_v63, %v1317_v63  ;;  %v1322_v47 = vpack.c.b16 %v1318_v54, %v1318_v54 }
 0x587   :  { %v1165_v15 = vpack.c.bf16 %v1162_v38, %v1161_v45 }
 0x588   :  { %v1133_v3 = vunpack.c.l.bf16 %v1131_v29  ;;  %v1134_v39 = vunpack.c.h.bf16 %v1131_v29  ;;  %v1327_v62 = vunpack.c.l.b16 %v1166_v57  ;;  %v1328_v27 = vunpack.c.h.b16 %v1166_v57 }
 0x589   :  { %v1325_v31 = vunpack.c.l.b16 %v1165_v15  ;;  %v1326_v41 = vunpack.c.h.b16 %v1165_v15 }
 0x58a   :  { %v1137_v8 = vmul.f32 %v1133_v3, %v3886_v26  ;;  %v1138_v42 = vmul.f32 %v1134_v39, %v3888_v46  ;;  %v1331_v20 = vpack.c.b16 %v1327_v62, %v1327_v62  ;;  %v1332_v40 = vpack.c.b16 %v1328_v27, %v1328_v27 }
 0x58b   :  { %v1329_v58 = vpack.c.b16 %v1325_v31, %v1325_v31  ;;  %v1330_v24 = vpack.c.b16 %v1326_v41, %v1326_v41 }
 0x58c   :  { %v1413_v44 = vsel %vm493_vm6, %v1321_v35, %v1331_v20  ;;  %v1417_v30 = vsel %vm493_vm6, %v1322_v47, %v1332_v40  ;;  %v1141_v1 = vpack.c.bf16 %v1138_v42, %v1137_v8 }
 0x58d   :  { %1515 = vmatpush.bf16.msra.mxu2 %v1413_v44  ;;  %1528 = vmatpush.bf16.msra.mxu3 %v1417_v30 }
 0x58e   :  { %v1315_v23 = vunpack.c.l.b16 %v1141_v1  ;;  %v1316_v2 = vunpack.c.h.b16 %v1141_v1 }
 0x590   :  { %2839 = vmatmul.msk.bf16.vlgmr.msra.gmra.mxu2 %vm558_vm9, %v135_v33  ;;  %2840 = vmatmul.msk.bf16.vlgmr.msra.gmra.mxu3 %vm558_vm9, %v135_v33  ;;  %v1319_v28 = vpack.c.b16 %v1315_v23, %v1315_v23  ;;  %v1320_v9 = vpack.c.b16 %v1316_v2, %v1316_v2 }
 0x592   :  { %v1405_v4 = vsel %vm493_vm6, %v1319_v28, %v1329_v58  ;;  %v1409_v48 = vsel %vm493_vm6, %v1320_v9, %v1330_v24 }
 0x593   :  { %1489 = vmatpush.bf16.msra.mxu0 %v1405_v4  ;;  %1502 = vmatpush.bf16.msra.mxu1 %v1409_v48 }
 0x596   :  { %2837 = vmatmul.msk.bf16.vlgmr.msra.gmra.mxu0 %vm558_vm9, %v135_v33  ;;  %2838 = vmatmul.msk.bf16.vlgmr.msra.gmra.mxu1 %vm558_vm9, %v135_v33 }
 0x613   :  { %v4303_v36 = vpop.f32.mrf.mxu0  ;;  %v4305_v63 = vpop.f32.mrf.mxu1 }
 0x614   :  { %5113 = vst [vmem:[#allocation36_spill] sm:$0xff] %v4303_v36  ;;  %v4307_v45 = vpop.f32.mrf.mxu2  ;;  %v4309_v37 = vpop.f32.mrf.mxu3  ;;  %v1630_v47 = vpack.c.bf16 %v4305_v63, %v4303_v36 }
 0x615   :  { %5114 = vst [vmem:[#allocation37_spill] sm:$0xff] %v4305_v63  ;;  %v3090_v19 = vpack.i.bf16 %v4305_v63, %v4309_v37  ;;  %v3095_v54 = vpack.i.bf16 %v4307_v45, %v4303_v36  ;;  %v3125_v3 = vpack.i.bf16 %v4307_v45, %v4305_v63  ;;  %v3130_v39 = vpack.i.bf16 %v4303_v36, %v4309_v37 }
 0x616   :  { %5115 = vst [vmem:[#allocation38_spill] sm:$0xff] %v4307_v45  ;;  %v1631_v8 = vpack.c.bf16 %v4309_v37, %v4307_v45  ;;  %v1770_v31 = vunpack.c.l.b16 %v1630_v47  ;;  %v1771_v44 = vunpack.c.h.b16 %v1630_v47 }
 0x617   :  { %5116 = vst [vmem:[#allocation39_spill] sm:$0xff] %v4309_v37  ;;  %3091 = vrot.lane.b32.xlu2 %v3090_v19, %s3502_s7  ;;  %3096 = vrot.lane.b32.xlu1 %v3095_v54, %s3501_s4 }
 0x618   :  { %3086 = vrot.lane.b32.xlu0 %v3095_v54, %s3502_s7  ;;  %v1772_v30 = vunpack.c.l.b16 %v1631_v8  ;;  %v1773_v1 = vunpack.c.h.b16 %v1631_v8 }
 0x61b   :  { %v1493_v38 = vpop.f32.mrf.mxu0  ;;  %v1506_v29 = vpop.f32.mrf.mxu1 }
 0x61c   :  { %v1519_v57 = vpop.f32.mrf.mxu2  ;;  %v1532_v15 = vpop.f32.mrf.mxu3 }
 0x61d   :  { %v4364_v57 = vpack.c.b16 %v1772_v30, %v1772_v30  ;;  %v4366_v15 = vpack.c.b16 %v1773_v1, %v1773_v1 }
 0x61f   :  { %3106 = vrot.lane.b32.xlu2 %v3095_v54, %s3503_s16  ;;  %3111 = vrot.lane.b32.xlu1 %v3090_v19, %s3503_s16 }
 0x620   :  { %3101 = vrot.lane.b32.xlu0 %v3090_v19, %s3501_s4 }
 0x627   :  { %3121 = vrot.lane.b32.xlu2 %v3090_v19, %s3504_s17  ;;  %3126 = vrot.lane.b32.xlu1 %v3125_v3, %s3505_s18  ;;  %v4360_v19 = vpack.c.b16 %v1770_v31, %v1770_v31 }
 0x628   :  { %3116 = vrot.lane.b32.xlu0 %v3095_v54, %s3504_s17  ;;  %v4362_v54 = vpack.c.b16 %v1771_v44, %v1771_v44 }
 0x62f   :  { %3136 = vrot.lane.b32.xlu2 %v3125_v3, %s3506_s1  ;;  %1612 = vrot.lane.b32.xlu1 %v4309_v37, %s3506_s1 }
 0x630   :  { %3131 = vrot.lane.b32.xlu0 %v3130_v39, %s3505_s18 }
 0x637   :  { %1540 = vrot.lane.b32.xlu2 %v4309_v37, %s3507_s19  ;;  %3146 = vrot.lane.b32.xlu1 %v3125_v3, %s3494_s14 }
 0x638   :  { %3141 = vrot.lane.b32.xlu0 %v3125_v3, %s3507_s19 }
 0x63f   :  { %1606 = vrot.lane.b32.xlu2 %v4303_v36, %s3506_s1  ;;  %1534 = vrot.lane.b32.xlu1 %v4303_v36, %s3507_s19 }
 0x640   :  { %1564 = vrot.lane.b32.xlu0 %v4309_v37, %s3494_s14 }
 0x648   :  { %1558 = vrot.lane.b32.xlu0 %v4303_v36, %s3494_s14 }
 0x671   :  { %v3092_v62 = vpop.permute.xlu2 %3091 }
 0x672   :  { %v3094_v41 = vunpack.i.h.bf16 %v3092_v62  ;;  %v3093_v33 = vunpack.i.l.bf16 %v3092_v62 }
 0x679   :  { %v3107_v27 = vpop.permute.xlu2 %3106 }
 0x67a   :  { %v3109_v38 = vunpack.i.h.bf16 %v3107_v27  ;;  %v3108_v29 = vunpack.i.l.bf16 %v3107_v27 }
 0x681   :  { %v4344_v35 = vpop.permute.xlu2 %3121 }
 0x682   :  { %v3124_v8 = vunpack.i.h.bf16 %v4344_v35 }
 0x689   :  { %v4350_v42 = vpop.permute.xlu2 %3136  ;;  %v3097_v20 = vpop.permute.xlu1 %3096 }
 0x68a   :  { %v3087_v40 = vpop.permute.xlu0 %3086 }
 0x68b   :  { %v3089_v23 = vunpack.i.h.bf16 %v3087_v40  ;;  %v3088_v2 = vunpack.i.l.bf16 %v3087_v40 }
 0x68d   :  { %v1712_v58 = vsel %vm379_vm2, %v3089_v23, %v3093_v33  ;;  %v1713_v28 = vsel %vm379_vm2, %v3094_v41, %v3089_v23  ;;  %v1714_v9 = vsel %vm379_vm2, %v3088_v2, %v3094_v41  ;;  %v1715_v24 = vsel %vm379_vm2, %v3093_v33, %v3088_v2 }
 0x68e   :  { %v1716_v4 = vpack.c.bf16 %v1713_v28, %v1714_v9  ;;  %v1717_v48 = vpack.c.bf16 %v1715_v24, %v1712_v58  ;;  %v3099_v41 = vunpack.i.h.bf16 %v3097_v20  ;;  %v3098_v33 = vunpack.i.l.bf16 %v3097_v20 }
 0x690   :  { %v1718_v3 = vunpack.c.l.bf16 %v1716_v4  ;;  %v1719_v39 = vunpack.c.h.bf16 %v1716_v4  ;;  %v1720_v62 = vunpack.c.l.bf16 %v1717_v48  ;;  %v1721_v47 = vunpack.c.h.bf16 %v1717_v48 }
 0x691   :  { %v3112_v31 = vpop.permute.xlu1 %3111  ;;  %v4370_v23 = vpop.permute.xlu2 %1540 }
 0x692   :  { %v3114_v44 = vunpack.i.h.bf16 %v3112_v31  ;;  %v3113_v2 = vunpack.i.l.bf16 %v3112_v31  ;;  %v3102_v27 = vpop.permute.xlu0 %3101  ;;  %v1722_v30 = vmul.f32 %v1718_v3, %v3643_v49  ;;  %v1723_v1 = vmul.f32 %v1719_v39, %v3645_v50 }
 0x693   :  { %v3104_v58 = vunpack.i.h.bf16 %v3102_v27  ;;  %v3103_v28 = vunpack.i.l.bf16 %v3102_v27  ;;  %v1724_v9 = vmul.f32 %v1720_v62, %v3648_v51  ;;  %v1725_v24 = vmul.f32 %v1721_v47, %v3650_v52 }
 0x694   :  { %v1689_v4 = vsel %vm347_vm0, %v3114_v44, %v3109_v38  ;;  %v1690_v20 = vsel %vm347_vm0, %v3108_v29, %v3114_v44  ;;  %v1688_v48 = vsel %vm347_vm0, %v3109_v38, %v3113_v2  ;;  %v1691_v3 = vsel %vm347_vm0, %v3113_v2, %v3108_v29 }
 0x695   :  { %v1692_v31 = vpack.c.bf16 %v1689_v4, %v1690_v20  ;;  %v4384_v39 = vpack.c.bf16 %v1691_v3, %v1688_v48  ;;  %v1665_v62 = vsel %vm315_vm1, %v3104_v58, %v3099_v41  ;;  %v1666_v47 = vsel %vm315_vm1, %v3098_v33, %v3104_v58 }
 0x696   :  { %v1668_v27 = vpack.c.bf16 %v1665_v62, %v1666_v47  ;;  %v1664_v40 = vsel %vm315_vm1, %v3099_v41, %v3103_v28  ;;  %v1667_v44 = vsel %vm315_vm1, %v3103_v28, %v3098_v33  ;;  %v1726_v38 = vpack.c.bf16 %v1723_v1, %v1722_v30 }
 0x697   :  { %v3123_v29 = vunpack.i.l.bf16 %v4344_v35  ;;  %v1694_v2 = vunpack.c.l.bf16 %v1692_v31  ;;  %v1695_v4 = vunpack.c.h.bf16 %v1692_v31  ;;  %v4397_v48 = vpack.c.bf16 %v1667_v44, %v1664_v40 }
 0x698   :  { %v1810_v3 = vunpack.c.l.b16 %v1726_v38  ;;  %v5117_v58 = vunpack.i.h.bf16 %v4350_v42  ;;  %v5118_v62 = vunpack.i.l.bf16 %v4350_v42  ;;  %v1670_v30 = vunpack.c.l.bf16 %v1668_v27 }
 0x699   :  { %v4406_v1 = vpop.permute.xlu1 %3126  ;;  %v1811_v35 = vunpack.c.h.b16 %v1726_v38  ;;  %v1727_v28 = vpack.c.bf16 %v1725_v24, %v1724_v9  ;;  %v1671_v31 = vunpack.c.h.bf16 %v1668_v27  ;;  %v1698_v44 = vmul.f32 %v1694_v2, %v5109_v18 }
 0x69a   :  { %v1615_v41 = vsel %vm249_vm4, %v5118_v62, %v5117_v58  ;;  %v3117_v40 = vpop.permute.xlu0 %3116  ;;  %v1699_v20 = vmul.f32 %v1695_v4, %v5110_v34  ;;  %v3129_v63 = vunpack.i.h.bf16 %v4406_v1  ;;  %v1814_v58 = vpack.c.b16 %v1810_v3, %v1810_v3  ;;  %v1607_v62 = vpop.permute.xlu2 %1606 }
 0x69b   :  { %v3119_v36 = vunpack.i.h.bf16 %v3117_v40  ;;  %v3118_v37 = vunpack.i.l.bf16 %v3117_v40  ;;  %v3128_v33 = vunpack.i.l.bf16 %v4406_v1  ;;  %v1815_v45 = vpack.c.b16 %v1811_v35, %v1811_v35 }
 0x69c   :  { %v1812_v52 = vunpack.c.l.b16 %v1727_v28  ;;  %v1813_v38 = vunpack.c.h.b16 %v1727_v28  ;;  %v1674_v2 = vmul.f32 %v1670_v30, %v3652_v53  ;;  %v1886_v1 = vsel %vm493_vm6, %v1814_v58, 0 }
 0x69d   :  { %v1640_v9 = vsel %vm283_vm5, %v3119_v36, %v3123_v29  ;;  %v1641_v24 = vsel %vm283_vm5, %v3124_v8, %v3119_v36  ;;  %v1642_v27 = vsel %vm283_vm5, %v3118_v37, %v3124_v8  ;;  %v1643_v4 = vsel %vm283_vm5, %v3123_v29, %v3118_v37  ;;  %1900 = vmatpush.bf16.msrb.mxu0 %v1886_v1 }
 0x69e   :  { %v4422_v3 = vpack.c.bf16 %v1641_v24, %v1642_v27  ;;  %v1889_v35 = vsel %vm493_vm6, %v1815_v45, 0  ;;  %v1673_v28 = vunpack.c.h.bf16 %v4397_v48  ;;  %v5119_v40 = vunpack.i.l.bf16 %v4350_v42 }
 0x69f   :  { %1913 = vmatpush.bf16.msrb.mxu1 %v1889_v35  ;;  %v1816_v8 = vpack.c.b16 %v1812_v52, %v1812_v52  ;;  %v1817_v30 = vpack.c.b16 %v1813_v38, %v1813_v38  ;;  %v1591_v37 = vsel %vm217_vm3, %v3128_v33, %v3129_v63  ;;  %v4433_v29 = vpack.c.bf16 %v1643_v4, %v1640_v9 }
 0x6a0   :  { %v1616_v36 = vsel %vm249_vm4, %v1607_v62, %v5119_v40  ;;  %v1675_v58 = vmul.f32 %v1671_v31, %v3656_v55  ;;  %v1702_v24 = vpack.c.bf16 %v1699_v20, %v1698_v44  ;;  %v1646_v45 = vunpack.c.l.bf16 %v4422_v3 }
 0x6a1   :  { %v1647_v27 = vunpack.c.h.bf16 %v4422_v3  ;;  %v1892_v47 = vsel %vm493_vm6, %v1816_v8, 0  ;;  %v1895_v40 = vsel %vm493_vm6, %v1817_v30, 0  ;;  %v1613_v1 = vpop.permute.xlu1 %1612  ;;  %v5120_v52 = vunpack.i.h.bf16 %v4350_v42 }
 0x6a2   :  { %1926 = vmatpush.bf16.msrb.mxu2 %v1892_v47  ;;  %1939 = vmatpush.bf16.msrb.mxu3 %v1895_v40  ;;  %v1617_v31 = vsel %vm249_vm4, %v1613_v1, %v1607_v62  ;;  %v3132_v20 = vpop.permute.xlu0 %3131  ;;  %v1678_v44 = vpack.c.bf16 %v1675_v58, %v1674_v2  ;;  %v1800_v9 = vunpack.c.l.b16 %v1702_v24  ;;  %v1648_v30 = vunpack.c.l.bf16 %v4433_v29 }
 0x6a3   :  { %v1614_v38 = vsel %vm249_vm4, %v5120_v52, %v1613_v1  ;;  %v1618_v4 = vpack.c.bf16 %v1616_v36, %v1617_v31  ;;  %v3134_v35 = vunpack.i.h.bf16 %v3132_v20  ;;  %v3133_v8 = vunpack.i.l.bf16 %v3132_v20 }
 0x6a4   :  { %v1619_v3 = vpack.c.bf16 %v1614_v38, %v1615_v41  ;;  %v1790_v34 = vunpack.c.l.b16 %v1678_v44  ;;  %v1804_v47 = vpack.c.b16 %v1800_v9, %v1800_v9  ;;  %v1791_v40 = vunpack.c.h.b16 %v1678_v44  ;;  %v5122_v44 = vld [vmem:[#allocation28_spill] sm:$0xff] }
 0x6a5   :  { %v1620_v18 = vunpack.c.l.bf16 %v1618_v4  ;;  %v1621_v42 = vunpack.c.h.bf16 %v1618_v4  ;;  %v1801_v53 = vunpack.c.h.b16 %v1702_v24  ;;  %v1592_v62 = vsel %vm217_vm3, %v3134_v35, %v3128_v33  ;;  %v5123_v4 = vld [vmem:[#allocation22_spill] sm:$0xff] }
 0x6a6   :  { %v1622_v55 = vunpack.c.l.bf16 %v1619_v3  ;;  %v1623_v52 = vunpack.c.h.bf16 %v1619_v3  ;;  %v1593_v2 = vsel %vm217_vm3, %v3133_v8, %v3134_v35  ;;  %v1794_v36 = vpack.c.b16 %v1790_v34, %v1790_v34 }
 0x6a7   :  { %v1649_v41 = vunpack.c.h.bf16 %v4433_v29  ;;  %v4453_v58 = vmul.f32 %v1620_v18, %v3858_v7  ;;  %v4456_v1 = vmul.f32 %v1621_v42, %v3860_v12  ;;  %v1590_v38 = vsel %vm217_vm3, %v3129_v63, %v3133_v8 }
 0x6a8   :  { %v4461_v24 = vmul.f32 %v1622_v55, %v3882_v25  ;;  %v1594_v31 = vpack.c.bf16 %v1592_v62, %v1593_v2  ;;  %v1868_v33 = vsel %vm493_vm6, %v1794_v36, %v1804_v47  ;;  %v1795_v20 = vpack.c.b16 %v1791_v40, %v1791_v40  ;;  %v5125_v62 = vld [vmem:[#allocation23_spill] sm:$0xff] }
 0x6a9   :  { %1901 = vmatpush.bf16.msrb.mxu0 %v1868_v33  ;;  %v1805_v34 = vpack.c.b16 %v1801_v53, %v1801_v53  ;;  %v5121_v29 = vunpack.c.l.bf16 %v4397_v48  ;;  %v1677_v9 = vmul.f32 %v1673_v28, %v5122_v44  ;;  %v5124_v3 = vunpack.c.l.bf16 %v4384_v39  ;;  %v4471_v63 = vpop.permute.xlu1 %3146 }
 0x6aa   :  { %v4474_v55 = vmul.f32 %v1623_v52, %v3884_v13  ;;  %v4476_v8 = vpack.c.bf16 %v1590_v38, %v1591_v37  ;;  %v1596_v47 = vunpack.c.l.bf16 %v1594_v31  ;;  %v1597_v40 = vunpack.c.h.bf16 %v1594_v31  ;;  %v3142_v53 = vpop.permute.xlu0 %3141 }
 0x6ab   :  { %v1676_v18 = vmul.f32 %v5121_v29, %v3658_v56  ;;  %v1700_v35 = vmul.f32 %v5124_v3, %v5123_v4  ;;  %v1872_v42 = vsel %vm493_vm6, %v1795_v20, %v1805_v34  ;;  %v5126_v28 = vunpack.c.h.bf16 %v4384_v39 }
 0x6ac   :  { %v3149_v36 = vunpack.i.h.bf16 %v4471_v63  ;;  %1914 = vmatpush.bf16.msrb.mxu1 %v1872_v42  ;;  %v3144_v29 = vunpack.i.h.bf16 %v3142_v53  ;;  %v3143_v52 = vunpack.i.l.bf16 %v3142_v53  ;;  %v1650_v37 = vmul.f32 %v1646_v45, %v3686_v16 }
 0x6ad   :  { %v1679_v48 = vpack.c.bf16 %v1677_v9, %v1676_v18  ;;  %v1701_v2 = vmul.f32 %v5126_v28, %v5125_v62  ;;  %v1651_v12 = vmul.f32 %v1647_v27, %v3688_v17  ;;  %v1652_v34 = vmul.f32 %v1648_v30, %v3691_v22 }
 0x6ae   :  { %v1542_v20 = vsel %vm154_vm7, %v3144_v29, %v4370_v23  ;;  %v1543_v39 = vsel %vm154_vm7, %v3143_v52, %v3144_v29  ;;  %v1653_v18 = vmul.f32 %v1649_v41, %v3693_v0  ;;  %v5127_v29 = vunpack.i.l.bf16 %v4471_v63 }
 0x6af   :  { %v1703_v38 = vpack.c.bf16 %v1701_v2, %v1700_v35  ;;  %v1792_v3 = vunpack.c.l.b16 %v1679_v48  ;;  %v1793_v31 = vunpack.c.h.b16 %v1679_v48  ;;  %v1598_v35 = vunpack.c.l.bf16 %v4476_v8 }
 0x6b0   :  { %v4494_v48 = vpack.c.bf16 %v1542_v20, %v1543_v39  ;;  %v1654_v27 = vpack.c.bf16 %v1651_v12, %v1650_v37  ;;  %v1655_v28 = vpack.c.bf16 %v1653_v18, %v1652_v34  ;;  %v1599_v2 = vunpack.c.h.bf16 %v4476_v8 }
 0x6b1   :  { %v1796_v9 = vpack.c.b16 %v1792_v3, %v1792_v3  ;;  %v1802_v53 = vunpack.c.l.b16 %v1703_v38  ;;  %v1797_v42 = vpack.c.b16 %v1793_v31, %v1793_v31  ;;  %v1803_v45 = vunpack.c.h.b16 %v1703_v38  ;;  %v1535_v13 = vpop.permute.xlu1 %1534 }
 0x6b2   :  { %v1567_v30 = vsel %vm185_vm8, %v5127_v29, %v3149_v36  ;;  %v1780_v41 = vunpack.c.l.b16 %v1654_v27  ;;  %v1781_v3 = vunpack.c.h.b16 %v1654_v27  ;;  %v1565_v31 = vpop.permute.xlu0 %1564  ;;  %v1600_v38 = vmul.f32 %v1596_v47, %v3730_v6 }
 0x6b3   :  { %v1806_v33 = vpack.c.b16 %v1802_v53, %v1802_v53  ;;  %v1807_v7 = vpack.c.b16 %v1803_v45, %v1803_v45  ;;  %v1601_v20 = vmul.f32 %v1597_v40, %v3849_v32  ;;  %v1782_v8 = vunpack.c.l.b16 %v1655_v28 }
 0x6b4   :  { %v1783_v39 = vunpack.c.h.b16 %v1655_v28  ;;  %v1550_v34 = vunpack.c.l.bf16 %v4494_v48  ;;  %v1784_v18 = vpack.c.b16 %v1780_v41, %v1780_v41  ;;  %v1785_v53 = vpack.c.b16 %v1781_v3, %v1781_v3 }
 0x6b5   :  { %v1876_v12 = vsel %vm493_vm6, %v1796_v9, %v1806_v33  ;;  %v1880_v37 = vsel %vm493_vm6, %v1797_v42, %v1807_v7  ;;  %v1544_v45 = vsel %vm154_vm7, %v1535_v13, %v3143_v52  ;;  %v1786_v27 = vpack.c.b16 %v1782_v8, %v1782_v8 }
 0x6b6   :  { %1927 = vmatpush.bf16.msrb.mxu2 %v1876_v12  ;;  %1940 = vmatpush.bf16.msrb.mxu3 %v1880_v37  ;;  %v1787_v29 = vpack.c.b16 %v1783_v39, %v1783_v39  ;;  %v1545_v47 = vsel %vm154_vm7, %v4370_v23, %v1535_v13  ;;  %v1566_v7 = vsel %vm185_vm8, %v3149_v36, %v1565_v31  ;;  %v1551_v28 = vunpack.c.h.bf16 %v4494_v48 }
 0x6b7   :  { %v1852_v40 = vsel %vm493_vm6, %v4360_v19, %v1784_v18  ;;  %v1856_v33 = vsel %vm493_vm6, %v4362_v54, %v1785_v53  ;;  %v1546_v9 = vpack.c.bf16 %v1544_v45, %v1545_v47  ;;  %v1571_v42 = vpack.c.bf16 %v1566_v7, %v1567_v30 }
 0x6b8   :  { %1902 = vmatpush.bf16.msrb.mxu0 %v1852_v40  ;;  %1915 = vmatpush.bf16.msrb.mxu1 %v1856_v33  ;;  %v1860_v52 = vsel %vm493_vm6, %v4364_v57, %v1786_v27  ;;  %v1864_v13 = vsel %vm493_vm6, %v4366_v15, %v1787_v29  ;;  %v1604_v23 = vpack.c.bf16 %v1601_v20, %v1600_v38 }
 0x6b9   :  { %v1548_v36 = vunpack.c.l.bf16 %v1546_v9  ;;  %v1549_v19 = vunpack.c.h.bf16 %v1546_v9  ;;  %v1574_v41 = vunpack.c.l.bf16 %v1571_v42  ;;  %v1575_v3 = vunpack.c.h.bf16 %v1571_v42 }
 0x6ba   :  { %1928 = vmatpush.bf16.msrb.mxu2 %v1860_v52  ;;  %1941 = vmatpush.bf16.msrb.mxu3 %v1864_v13  ;;  %v1628_v54 = vpack.c.bf16 %v4456_v1, %v4453_v58  ;;  %v1750_v30 = vunpack.c.l.b16 %v1604_v23  ;;  %v1751_v48 = vunpack.c.h.b16 %v1604_v23  ;;  %v1602_v12 = vmul.f32 %v1598_v35, %v3871_v21  ;;  %v1559_v20 = vpop.permute.xlu0 %1558 }
 0x6bb   :  { %v1552_v37 = vmul.f32 %v1548_v36, %v3886_v26  ;;  %v1553_v57 = vmul.f32 %v1549_v19, %v3888_v46  ;;  %v1578_v15 = vmul.f32 %v1574_v41, %v3840_v59  ;;  %v1579_v38 = vmul.f32 %v1575_v3, %v3842_v60 }
 0x6bc   :  { %v1754_v8 = vpack.c.b16 %v1750_v30, %v1750_v30  ;;  %v1760_v39 = vunpack.c.l.b16 %v1628_v54  ;;  %v1755_v18 = vpack.c.b16 %v1751_v48, %v1751_v48  ;;  %v1761_v53 = vunpack.c.h.b16 %v1628_v54 }
 0x6bd   :  { %v1603_v45 = vmul.f32 %v1599_v2, %v3877_v14  ;;  %v1629_v58 = vpack.c.bf16 %v4474_v55, %v4461_v24  ;;  %v5128_v1 = vunpack.i.l.bf16 %v4471_v63  ;;  %v1569_v27 = vsel %vm185_vm8, %v1565_v31, %v1559_v20 }
 0x6be   :  { %v1764_v29 = vpack.c.b16 %v1760_v39, %v1760_v39  ;;  %v1765_v47 = vpack.c.b16 %v1761_v53, %v1761_v53  ;;  %v1554_v40 = vmul.f32 %v1550_v34, %v3905_v61  ;;  %v1555_v2 = vmul.f32 %v1551_v28, %v3907_v5 }
 0x6bf   :  { %v1568_v35 = vsel %vm185_vm8, %v1559_v20, %v5128_v1  ;;  %v1605_v33 = vpack.c.bf16 %v1603_v45, %v1602_v12  ;;  %v1762_v9 = vunpack.c.l.b16 %v1629_v58  ;;  %v1763_v42 = vunpack.c.h.b16 %v1629_v58 }
 0x6c0   :  { %v1570_v7 = vpack.c.bf16 %v1568_v35, %v1569_v27  ;;  %v1836_v24 = vsel %vm493_vm6, %v1754_v8, %v1764_v29  ;;  %v1840_v63 = vsel %vm493_vm6, %v1755_v18, %v1765_v47  ;;  %v1557_v19 = vpack.c.bf16 %v1555_v2, %v1554_v40 }
 0x6c1   :  { %1903 = vmatpush.bf16.msrb.mxu0 %v1836_v24  ;;  %1916 = vmatpush.bf16.msrb.mxu1 %v1840_v63  ;;  %v1752_v13 = vunpack.c.l.b16 %v1605_v33  ;;  %v1766_v31 = vpack.c.b16 %v1762_v9, %v1762_v9  ;;  %v1753_v23 = vunpack.c.h.b16 %v1605_v33  ;;  %v1581_v41 = vpack.c.bf16 %v1579_v38, %v1578_v15  ;;  %v133_v9 = vld [vmem:[#allocation8] sm:$0xf] }
 0x6c2   :  { %v1572_v55 = vunpack.c.l.bf16 %v1570_v7  ;;  %v1573_v52 = vunpack.c.h.bf16 %v1570_v7  ;;  %v1767_v28 = vpack.c.b16 %v1763_v42, %v1763_v42  ;;  %v1556_v30 = vpack.c.bf16 %v1553_v57, %v1552_v37 }
 0x6c3   :  { %v1756_v3 = vpack.c.b16 %v1752_v13, %v1752_v13  ;;  %v1757_v54 = vpack.c.b16 %v1753_v23, %v1753_v23  ;;  %v1732_v48 = vunpack.c.l.b16 %v1557_v19  ;;  %v1742_v12 = vunpack.c.l.b16 %v1581_v41  ;;  %v3285_v13 = vld [vmem:[#allocation2 + $0x8] sm:$0xff] }
 0x6c4   :  { %v1576_v36 = vmul.f32 %v1572_v55, %v3824_v43  ;;  %v1577_v34 = vmul.f32 %v1573_v52, %v3826_v11  ;;  %v1733_v20 = vunpack.c.h.b16 %v1557_v19  ;;  %v1743_v8 = vunpack.c.h.b16 %v1581_v41  ;;  %v3284_v55 = vld [vmem:[#allocation2] sm:$0xff]  ;;  %v3286_v19 = vld [vmem:[#allocation2 + $0x10] sm:$0xff] }
 0x6c5   :  { %v1844_v39 = vsel %vm493_vm6, %v1756_v3, %v1766_v31  ;;  %v1848_v18 = vsel %vm493_vm6, %v1757_v54, %v1767_v28  ;;  %v1730_v45 = vunpack.c.l.b16 %v1556_v30  ;;  %v1736_v58 = vpack.c.b16 %v1732_v48, %v1732_v48  ;;  %v3287_v3 = vld [vmem:[#allocation2 + $0x18] sm:$0xff] }
 0x6c6   :  { %v1580_v53 = vpack.c.bf16 %v1577_v34, %v1576_v36  ;;  %1929 = vmatpush.bf16.msrb.mxu2 %v1844_v39  ;;  %1942 = vmatpush.bf16.msrb.mxu3 %v1848_v18  ;;  %v1746_v1 = vpack.c.b16 %v1742_v12, %v1742_v12  ;;  %v1731_v35 = vunpack.c.h.b16 %v1556_v30  ;;  %v1737_v15 = vpack.c.b16 %v1733_v20, %v1733_v20 }
 0x6c7   :  { %v1747_v38 = vpack.c.b16 %v1743_v8, %v1743_v8  ;;  %v1734_v57 = vpack.c.b16 %v1730_v45, %v1730_v45 }
 0x6c8   :  { %v1740_v27 = vunpack.c.l.b16 %v1580_v53  ;;  %v1741_v29 = vunpack.c.h.b16 %v1580_v53  ;;  %v1828_v37 = vsel %vm493_vm6, %v1736_v58, %v1746_v1  ;;  %v1735_v40 = vpack.c.b16 %v1731_v35, %v1731_v35 }
 0x6c9   :  { %v1832_v47 = vsel %vm493_vm6, %v1737_v15, %v1747_v38 }
 0x6ca   :  { %v1744_v7 = vpack.c.b16 %v1740_v27, %v1740_v27  ;;  %v1745_v33 = vpack.c.b16 %v1741_v29, %v1741_v29  ;;  %1930 = vmatpush.bf16.msrb.mxu2 %v1828_v37  ;;  %1943 = vmatpush.bf16.msrb.mxu3 %v1832_v47 }
 0x6cc   :  { %v1820_v42 = vsel %vm493_vm6, %v1734_v57, %v1744_v7  ;;  %v1824_v2 = vsel %vm493_vm6, %v1735_v40, %v1745_v33 }
 0x6cd   :  { %1904 = vmatpush.bf16.msrb.mxu0 %v1820_v42  ;;  %1917 = vmatpush.bf16.msrb.mxu1 %v1824_v2 }
 0x6ce   :  { %2843 = vmatmul.msk.bf16.vlgmr.msrb.gmra.mxu2 %vm558_vm9, %v133_v9  ;;  %2844 = vmatmul.msk.bf16.vlgmr.msrb.gmra.mxu3 %vm558_vm9, %v133_v9 }
 0x6d0   :  { %2841 = vmatmul.msk.bf16.vlgmr.msrb.gmra.mxu0 %vm558_vm9, %v133_v9  ;;  %2842 = vmatmul.msk.bf16.vlgmr.msrb.gmra.mxu1 %vm558_vm9, %v133_v9 }
 0x74d   :  { %v1906_v24 = vpop.f32.mrf.mxu0  ;;  %v1919_v63 = vpop.f32.mrf.mxu1 }
 0x74e   :  { %v1949_v52 = vsub.f32 %v1906_v24, %v3284_v55  ;;  %v1950_v31 = vsub.f32 %v1919_v63, %v3285_v13 }
 0x750   :  { %v2049_v23 = vpack.c.bf16 %v1950_v31, %v1949_v52 }
 0x751   :  { %v1932_v36 = vpop.f32.mrf.mxu2  ;;  %v1945_v34 = vpop.f32.mrf.mxu3 }
 0x752   :  { %v1951_v41 = vsub.f32 %v1932_v36, %v3286_v19  ;;  %v1952_v54 = vsub.f32 %v1945_v34, %v3287_v3  ;;  %v2189_v35 = vunpack.c.l.b16 %v2049_v23  ;;  %v2190_v15 = vunpack.c.h.b16 %v2049_v23 }
 0x754   :  { %v3155_v28 = vpack.i.bf16 %v1950_v31, %v1952_v54  ;;  %v3160_v30 = vpack.i.bf16 %v1951_v41, %v1949_v52  ;;  %v2050_v20 = vpack.c.bf16 %v1952_v54, %v1951_v41  ;;  %v3190_v18 = vpack.i.bf16 %v1951_v41, %v1950_v31 }
 0x755   :  { %v1908_v48 = vpop.f32.mrf.mxu0  ;;  %v1921_v12 = vpop.f32.mrf.mxu1  ;;  %v3195_v53 = vpack.i.bf16 %v1949_v52, %v1952_v54  ;;  %v4575_v47 = vpack.c.b16 %v2189_v35, %v2189_v35  ;;  %v4577_v7 = vpack.c.b16 %v2190_v15, %v2190_v15 }
 0x756   :  { %3156 = vrot.lane.b32.xlu1 %v3155_v28, %s3502_s7  ;;  %3161 = vrot.lane.b32.xlu0 %v3160_v30, %s3501_s4  ;;  %v2191_v38 = vunpack.c.l.b16 %v2050_v20 }
 0x757   :  { %3151 = vrot.lane.b32.xlu2 %v3160_v30, %s3502_s7 }
 0x758   :  { %v4581_v55 = vpack.c.b16 %v2191_v38, %v2191_v38 }
 0x759   :  { %v1934_v8 = vpop.f32.mrf.mxu2  ;;  %v1947_v39 = vpop.f32.mrf.mxu3 }
 0x75e   :  { %3171 = vrot.lane.b32.xlu1 %v3160_v30, %s3503_s16  ;;  %3176 = vrot.lane.b32.xlu0 %v3155_v28, %s3503_s16 }
 0x75f   :  { %3166 = vrot.lane.b32.xlu2 %v3155_v28, %s3501_s4 }
 0x766   :  { %3186 = vrot.lane.b32.xlu1 %v3155_v28, %s3504_s17  ;;  %3191 = vrot.lane.b32.xlu0 %v3190_v18, %s3505_s18 }
 0x767   :  { %3181 = vrot.lane.b32.xlu2 %v3160_v30, %s3504_s17 }
 0x76e   :  { %3201 = vrot.lane.b32.xlu1 %v3190_v18, %s3506_s1  ;;  %2031 = vrot.lane.b32.xlu0 %v1952_v54, %s3506_s1 }
 0x76f   :  { %3196 = vrot.lane.b32.xlu2 %v3195_v53, %s3505_s18 }
 0x776   :  { %1959 = vrot.lane.b32.xlu1 %v1952_v54, %s3507_s19  ;;  %3211 = vrot.lane.b32.xlu0 %v3190_v18, %s3494_s14 }
 0x777   :  { %3206 = vrot.lane.b32.xlu2 %v3190_v18, %s3507_s19 }
 0x77e   :  { %2025 = vrot.lane.b32.xlu1 %v1949_v52, %s3506_s1  ;;  %1953 = vrot.lane.b32.xlu0 %v1949_v52, %s3507_s19 }
 0x77f   :  { %1983 = vrot.lane.b32.xlu2 %v1952_v54, %s3494_s14 }
 0x787   :  { %1977 = vrot.lane.b32.xlu2 %v1949_v52, %s3494_s14  ;;  %v2192_v52 = vunpack.c.h.b16 %v2050_v20 }
 0x7b1   :  { %v3152_v45 = vpop.permute.xlu2 %3151 }
 0x7b2   :  { %v3154_v27 = vunpack.i.h.bf16 %v3152_v45  ;;  %v3153_v29 = vunpack.i.l.bf16 %v3152_v45 }
 0x7b9   :  { %v3167_v58 = vpop.permute.xlu2 %3166 }
 0x7ba   :  { %v3169_v24 = vunpack.i.h.bf16 %v3167_v58  ;;  %v3168_v63 = vunpack.i.l.bf16 %v3167_v58  ;;  %v4604_v58 = vpack.c.b16 %v2192_v52, %v2192_v52 }
 0x7c1   :  { %v4573_v1 = vpop.permute.xlu2 %3181 }
 0x7c2   :  { %v3184_v18 = vunpack.i.h.bf16 %v4573_v1 }
 0x7c8   :  { %v3157_v37 = vpop.permute.xlu1 %3156  ;;  %v3162_v57 = vpop.permute.xlu0 %3161 }
 0x7c9   :  { %v3159_v40 = vunpack.i.h.bf16 %v3157_v37  ;;  %v3158_v33 = vunpack.i.l.bf16 %v3157_v37  ;;  %v3164_v9 = vunpack.i.h.bf16 %v3162_v57  ;;  %v3163_v42 = vunpack.i.l.bf16 %v3162_v57  ;;  %v4579_v2 = vpop.permute.xlu2 %3196  ;;  %v5129_v37 = vld [vmem:[#allocation24_spill] sm:$0xff] }
 0x7ca   :  { %v5083_v30 = vunpack.i.h.bf16 %v4579_v2  ;;  %v3198_v48 = vunpack.i.l.bf16 %v4579_v2 }
 0x7cb   :  { %v2131_v13 = vsel %vm379_vm2, %v3154_v27, %v3158_v33  ;;  %v2132_v31 = vsel %vm379_vm2, %v3159_v40, %v3154_v27  ;;  %v2133_v23 = vsel %vm379_vm2, %v3153_v29, %v3159_v40  ;;  %v2134_v36 = vsel %vm379_vm2, %v3158_v33, %v3153_v29 }
 0x7cc   :  { %v2135_v34 = vpack.c.bf16 %v2132_v31, %v2133_v23  ;;  %v2136_v19 = vpack.c.bf16 %v2134_v36, %v2131_v13  ;;  %v2083_v41 = vsel %vm315_vm1, %v3164_v9, %v3168_v63  ;;  %v2084_v3 = vsel %vm315_vm1, %v3169_v24, %v3164_v9 }
 0x7cd   :  { %v2085_v54 = vsel %vm315_vm1, %v3163_v42, %v3169_v24  ;;  %v2086_v28 = vsel %vm315_vm1, %v3168_v63, %v3163_v42  ;;  %v3183_v40 = vunpack.i.l.bf16 %v4573_v1  ;;  %v2012_v42 = vsel %vm217_vm3, %v3198_v48, %v5083_v30 }
 0x7ce   :  { %v2137_v12 = vunpack.c.l.bf16 %v2135_v34  ;;  %v2138_v20 = vunpack.c.h.bf16 %v2135_v34  ;;  %v2139_v8 = vunpack.c.l.bf16 %v2136_v19  ;;  %v2140_v39 = vunpack.c.h.bf16 %v2136_v19 }
 0x7cf   :  { %v2087_v53 = vpack.c.bf16 %v2084_v3, %v2085_v54  ;;  %v4602_v45 = vpack.c.bf16 %v2086_v28, %v2083_v41 }
 0x7d0   :  { %v3172_v35 = vpop.permute.xlu1 %3171  ;;  %v3177_v15 = vpop.permute.xlu0 %3176  ;;  %v2141_v38 = vmul.f32 %v2137_v12, %v3643_v49  ;;  %v2142_v27 = vmul.f32 %v2138_v20, %v3645_v50  ;;  %v2143_v29 = vmul.f32 %v2139_v8, %v3648_v51  ;;  %v2144_v57 = vmul.f32 %v2140_v39, %v5129_v37 }
 0x7d1   :  { %v2089_v33 = vunpack.c.l.bf16 %v2087_v53  ;;  %v2090_v9 = vunpack.c.h.bf16 %v2087_v53  ;;  %v4617_v24 = vpop.permute.xlu2 %3206  ;;  %v3174_v63 = vunpack.i.h.bf16 %v3172_v35  ;;  %v3173_v52 = vunpack.i.l.bf16 %v3172_v35 }
 0x7d2   :  { %v3179_v13 = vunpack.i.h.bf16 %v3177_v15  ;;  %v3178_v31 = vunpack.i.l.bf16 %v3177_v15  ;;  %v2145_v1 = vpack.c.bf16 %v2142_v27, %v2141_v38  ;;  %v2146_v34 = vpack.c.bf16 %v2144_v57, %v2143_v29  ;;  %v5130_v29 = vld [vmem:[#allocation25_spill] sm:$0xff] }
 0x7d3   :  { %v2093_v57 = vmul.f32 %v2089_v33, %v5130_v29 }
 0x7d4   :  { %v2108_v19 = vsel %vm347_vm0, %v3179_v13, %v3174_v63  ;;  %v2109_v41 = vsel %vm347_vm0, %v3173_v52, %v3179_v13  ;;  %v2107_v3 = vsel %vm347_vm0, %v3174_v63, %v3178_v31  ;;  %v2110_v54 = vsel %vm347_vm0, %v3178_v31, %v3173_v52  ;;  %v5131_v13 = vld [vmem:[#allocation26_spill] sm:$0xff] }
 0x7d5   :  { %v2111_v28 = vpack.c.bf16 %v2108_v19, %v2109_v41  ;;  %v2229_v20 = vunpack.c.l.b16 %v2145_v1  ;;  %v2230_v8 = vunpack.c.h.b16 %v2145_v1  ;;  %v4630_v39 = vpack.c.bf16 %v2110_v54, %v2107_v3 }
 0x7d6   :  { %v2231_v35 = vunpack.c.l.b16 %v2146_v34  ;;  %v2232_v15 = vunpack.c.h.b16 %v2146_v34  ;;  %v2094_v63 = vmul.f32 %v2090_v9, %v5131_v13 }
 0x7d7   :  { %v2113_v38 = vunpack.c.l.bf16 %v2111_v28  ;;  %v2114_v27 = vunpack.c.h.bf16 %v2111_v28  ;;  %v2233_v52 = vpack.c.b16 %v2229_v20, %v2229_v20  ;;  %v2234_v31 = vpack.c.b16 %v2230_v8, %v2230_v8 }
 0x7d8   :  { %v3187_v36 = vpop.permute.xlu1 %3186  ;;  %v3192_v23 = vpop.permute.xlu0 %3191  ;;  %v2235_v19 = vpack.c.b16 %v2231_v35, %v2231_v35  ;;  %v2236_v41 = vpack.c.b16 %v2232_v15, %v2232_v15 }
 0x7d9   :  { %v3189_v12 = vunpack.i.h.bf16 %v3187_v36  ;;  %v3188_v1 = vunpack.i.l.bf16 %v3187_v36  ;;  %v3194_v3 = vunpack.i.h.bf16 %v3192_v23  ;;  %v3193_v54 = vunpack.i.l.bf16 %v3192_v23  ;;  %v4635_v30 = vpop.permute.xlu2 %1983 }
 0x7da   :  { %v2302_v34 = vsel %vm493_vm6, %v2233_v52, 0  ;;  %v2305_v28 = vsel %vm493_vm6, %v2234_v31, 0  ;;  %v2308_v33 = vsel %vm493_vm6, %v2235_v19, 0  ;;  %v2311_v9 = vsel %vm493_vm6, %v2236_v41, 0 }
 0x7db   :  { %v2059_v20 = vsel %vm283_vm5, %v3184_v18, %v3188_v1  ;;  %v2060_v8 = vsel %vm283_vm5, %v3189_v12, %v3184_v18  ;;  %v2061_v36 = vsel %vm283_vm5, %v3183_v40, %v3189_v12  ;;  %v2062_v23 = vsel %vm283_vm5, %v3188_v1, %v3183_v40  ;;  %2316 = vmatpush.bf16.msra.mxu0 %v2302_v34 }
 0x7dc   :  { %v2063_v35 = vpack.c.bf16 %v2060_v8, %v2061_v36  ;;  %v4649_v15 = vpack.c.bf16 %v2062_v23, %v2059_v20  ;;  %v2009_v52 = vsel %vm217_vm3, %v3194_v3, %v3198_v48  ;;  %v2010_v31 = vsel %vm217_vm3, %v3193_v54, %v3194_v3  ;;  %2329 = vmatpush.bf16.msra.mxu1 %v2305_v28  ;;  %v5133_v8 = vld [vmem:[#allocation20_spill] sm:$0xff] }
 0x7dd   :  { %v2115_v18 = vunpack.c.l.bf16 %v4630_v39  ;;  %v5132_v12 = vunpack.i.h.bf16 %v4579_v2  ;;  %v4662_v19 = vpack.c.bf16 %v2009_v52, %v2010_v31  ;;  %2342 = vmatpush.bf16.msra.mxu2 %v2308_v33  ;;  %2355 = vmatpush.bf16.msra.mxu3 %v2311_v9  ;;  %v2097_v41 = vpack.c.bf16 %v2094_v63, %v2093_v57  ;;  %v5134_v57 = vld [vmem:[#allocation21_spill] sm:$0xff] }
 0x7de   :  { %v2116_v1 = vunpack.c.h.bf16 %v4630_v39  ;;  %v2065_v34 = vunpack.c.l.bf16 %v2063_v35  ;;  %v2066_v48 = vunpack.c.h.bf16 %v2063_v35  ;;  %v2117_v36 = vmul.f32 %v2113_v38, %v5133_v8 }
 0x7df   :  { %v2011_v40 = vsel %vm217_vm3, %v5132_v12, %v3193_v54  ;;  %v2118_v39 = vmul.f32 %v2114_v27, %v5134_v57  ;;  %v2209_v63 = vunpack.c.l.b16 %v2097_v41  ;;  %v2210_v9 = vunpack.c.h.b16 %v2097_v41 }
 0x7e0   :  { %v4667_v28 = vpack.c.bf16 %v2011_v40, %v2012_v42  ;;  %v4672_v23 = vpop.permute.xlu1 %3201  ;;  %v4674_v33 = vpop.permute.xlu0 %2031  ;;  %v5135_v38 = vunpack.c.l.bf16 %v4602_v45  ;;  %v5136_v3 = vunpack.c.h.bf16 %v4602_v45  ;;  %v2119_v20 = vmul.f32 %v2115_v18, %v5123_v4 }
 0x7e1   :  { %v3204_v52 = vunpack.i.h.bf16 %v4672_v23  ;;  %v5085_v42 = vunpack.i.l.bf16 %v4672_v23  ;;  %v1978_v31 = vpop.permute.xlu2 %1977  ;;  %v2121_v54 = vpack.c.bf16 %v2118_v39, %v2117_v36  ;;  %v2213_v2 = vpack.c.b16 %v2209_v63, %v2209_v63 }
 0x7e2   :  { %v2095_v12 = vmul.f32 %v5135_v38, %v3658_v56  ;;  %v1988_v40 = vsel %vm185_vm8, %v4635_v30, %v1978_v31  ;;  %v2214_v27 = vpack.c.b16 %v2210_v9, %v2210_v9  ;;  %v2096_v38 = vmul.f32 %v5136_v3, %v5122_v44 }
 0x7e3   :  { %v2034_v41 = vsel %vm249_vm4, %v5085_v42, %v3204_v52  ;;  %v2033_v35 = vsel %vm249_vm4, %v3204_v52, %v4674_v33  ;;  %v2219_v56 = vunpack.c.l.b16 %v2121_v54  ;;  %v2220_v36 = vunpack.c.h.b16 %v2121_v54 }
 0x7e4   :  { %v2038_v53 = vpack.c.bf16 %v2033_v35, %v2034_v41  ;;  %v2120_v39 = vmul.f32 %v2116_v1, %v5125_v62  ;;  %v2098_v63 = vpack.c.bf16 %v2096_v38, %v2095_v12  ;;  %v5137_v9 = vunpack.i.h.bf16 %v4617_v24  ;;  %v5139_v38 = vld [vmem:[#allocation31_spill] sm:$0xff] }
 0x7e5   :  { %v5138_v42 = vunpack.i.l.bf16 %v4617_v24  ;;  %v2069_v52 = vmul.f32 %v2065_v34, %v3686_v16  ;;  %v2070_v45 = vmul.f32 %v2066_v48, %v3688_v17  ;;  %v2223_v18 = vpack.c.b16 %v2219_v56, %v2219_v56 }
 0x7e6   :  { %v2041_v3 = vunpack.c.l.bf16 %v2038_v53  ;;  %v2042_v44 = vunpack.c.h.bf16 %v2038_v53  ;;  %v2224_v35 = vpack.c.b16 %v2220_v36, %v2220_v36  ;;  %v2122_v41 = vpack.c.bf16 %v2120_v39, %v2119_v20 }
 0x7e7   :  { %v1962_v57 = vsel %vm154_vm7, %v5138_v42, %v5137_v9  ;;  %v2211_v54 = vunpack.c.l.b16 %v2098_v63  ;;  %v2212_v4 = vunpack.c.h.b16 %v2098_v63  ;;  %v2073_v1 = vpack.c.bf16 %v2070_v45, %v2069_v52 }
 0x7e8   :  { %v2045_v12 = vmul.f32 %v2041_v3, %v3882_v25  ;;  %v2046_v62 = vmul.f32 %v2042_v44, %v5139_v38  ;;  %v2287_v13 = vsel %vm493_vm6, %v2213_v2, %v2223_v18  ;;  %v2291_v42 = vsel %vm493_vm6, %v2214_v27, %v2224_v35  ;;  %v1960_v9 = vpop.permute.xlu1 %1959  ;;  %v3212_v34 = vpop.permute.xlu0 %3211 }
 0x7e9   :  { %2317 = vmatpush.bf16.msra.mxu0 %v2287_v13  ;;  %2330 = vmatpush.bf16.msra.mxu1 %v2291_v42  ;;  %v2215_v48 = vpack.c.b16 %v2211_v54, %v2211_v54  ;;  %v2221_v53 = vunpack.c.l.b16 %v2122_v41  ;;  %v2216_v56 = vpack.c.b16 %v2212_v4, %v2212_v4  ;;  %v2222_v36 = vunpack.c.h.b16 %v2122_v41 }
 0x7ea   :  { %v5140_v20 = vunpack.i.h.bf16 %v4617_v24  ;;  %v3214_v63 = vunpack.i.h.bf16 %v3212_v34  ;;  %v3213_v52 = vunpack.i.l.bf16 %v3212_v34  ;;  %v2199_v44 = vunpack.c.l.b16 %v2073_v1 }
 0x7eb   :  { %v2225_v45 = vpack.c.b16 %v2221_v53, %v2221_v53  ;;  %v2226_v2 = vpack.c.b16 %v2222_v36, %v2222_v36  ;;  %v2200_v27 = vunpack.c.h.b16 %v2073_v1 }
 0x7ec   :  { %v1961_v39 = vsel %vm154_vm7, %v5140_v20, %v1960_v9  ;;  %v1985_v13 = vsel %vm185_vm8, %v3214_v63, %v4635_v30  ;;  %v1986_v4 = vsel %vm185_vm8, %v3213_v52, %v3214_v63  ;;  %v1987_v18 = vsel %vm185_vm8, %v1978_v31, %v3213_v52 }
 0x7ed   :  { %v1966_v3 = vpack.c.bf16 %v1961_v39, %v1962_v57  ;;  %v2203_v35 = vpack.c.b16 %v2199_v44, %v2199_v44  ;;  %v2295_v41 = vsel %vm493_vm6, %v2215_v48, %v2225_v45  ;;  %v2299_v54 = vsel %vm493_vm6, %v2216_v56, %v2226_v2 }
 0x7ee   :  { %v2016_v57 = vunpack.c.h.bf16 %v4667_v28  ;;  %2343 = vmatpush.bf16.msra.mxu2 %v2295_v41  ;;  %2356 = vmatpush.bf16.msra.mxu3 %v2299_v54  ;;  %v4724_v1 = vpack.c.bf16 %v1987_v18, %v1988_v40  ;;  %v1990_v30 = vpack.c.bf16 %v1985_v13, %v1986_v4  ;;  %v2204_v48 = vpack.c.b16 %v2200_v27, %v2200_v27 }
 0x7ef   :  { %v1969_v42 = vunpack.c.l.bf16 %v1966_v3  ;;  %v1970_v34 = vunpack.c.h.bf16 %v1966_v3  ;;  %v2271_v53 = vsel %vm493_vm6, %v4575_v47, %v2203_v35  ;;  %v5141_v56 = vunpack.c.l.bf16 %v4649_v15 }
 0x7f0   :  { %2318 = vmatpush.bf16.msra.mxu0 %v2271_v53  ;;  %v1991_v39 = vunpack.c.l.bf16 %v4724_v1  ;;  %v1992_v63 = vunpack.c.h.bf16 %v4724_v1  ;;  %v1993_v40 = vunpack.c.l.bf16 %v1990_v30  ;;  %v1994_v52 = vunpack.c.h.bf16 %v1990_v30  ;;  %v2026_v44 = vpop.permute.xlu1 %2025  ;;  %v1954_v45 = vpop.permute.xlu0 %1953 }
 0x7f1   :  { %v1973_v36 = vmul.f32 %v1969_v42, %v3905_v61  ;;  %v1974_v31 = vmul.f32 %v1970_v34, %v3907_v5  ;;  %v2071_v20 = vmul.f32 %v5141_v56, %v3691_v22  ;;  %v2275_v47 = vsel %vm493_vm6, %v4577_v7, %v2204_v48 }
 0x7f2   :  { %v5142_v2 = vunpack.c.h.bf16 %v4649_v15  ;;  %v5143_v27 = vunpack.i.l.bf16 %v4672_v23  ;;  %v2036_v4 = vsel %vm249_vm4, %v4674_v33, %v2026_v44  ;;  %2331 = vmatpush.bf16.msra.mxu1 %v2275_v47  ;;  %v5144_v35 = vunpack.i.l.bf16 %v4617_v24 }
 0x7f3   :  { %v1964_v15 = vsel %vm154_vm7, %v1960_v9, %v1954_v45  ;;  %v5145_v23 = vunpack.c.l.bf16 %v4662_v19  ;;  %v5146_v34 = vunpack.c.h.bf16 %v4662_v19  ;;  %v2048_v30 = vpack.c.bf16 %v2046_v62, %v2045_v12 }
 0x7f4   :  { %v2072_v3 = vmul.f32 %v5142_v2, %v3693_v0  ;;  %v2035_v13 = vsel %vm249_vm4, %v2026_v44, %v5143_v27  ;;  %v1963_v7 = vsel %vm154_vm7, %v1954_v45, %v5144_v35  ;;  %v1976_v24 = vpack.c.bf16 %v1974_v31, %v1973_v36  ;;  %v5147_v45 = vld [vmem:[#allocation29_spill] sm:$0xff] }
 0x7f5   :  { %v2037_v18 = vpack.c.bf16 %v2035_v13, %v2036_v4  ;;  %v2021_v41 = vmul.f32 %v5145_v23, %v3871_v21  ;;  %v1965_v42 = vpack.c.bf16 %v1963_v7, %v1964_v15  ;;  %v2022_v33 = vmul.f32 %v5146_v34, %v3877_v14  ;;  %v5148_v13 = vld [vmem:[#allocation30_spill] sm:$0xff] }
 0x7f6   :  { %v2074_v54 = vpack.c.bf16 %v2072_v3, %v2071_v20  ;;  %v1997_v56 = vmul.f32 %v1993_v40, %v3840_v59  ;;  %v2181_v3 = vunpack.c.l.b16 %v2048_v30  ;;  %v2182_v40 = vunpack.c.h.b16 %v2048_v30 }
 0x7f7   :  { %v2039_v53 = vunpack.c.l.bf16 %v2037_v18  ;;  %v2040_v48 = vunpack.c.h.bf16 %v2037_v18  ;;  %v1967_v2 = vunpack.c.l.bf16 %v1965_v42  ;;  %v1968_v9 = vunpack.c.h.bf16 %v1965_v42 }
 0x7f8   :  { %v2201_v44 = vunpack.c.l.b16 %v2074_v54  ;;  %v2202_v47 = vunpack.c.h.b16 %v2074_v54  ;;  %v2024_v20 = vpack.c.bf16 %v2022_v33, %v2021_v41  ;;  %v2185_v36 = vpack.c.b16 %v2181_v3, %v2181_v3 }
 0x7f9   :  { %v2043_v27 = vmul.f32 %v2039_v53, %v5147_v45  ;;  %v2044_v4 = vmul.f32 %v2040_v48, %v5148_v13  ;;  %v1971_v19 = vmul.f32 %v1967_v2, %v3886_v26  ;;  %v1972_v62 = vmul.f32 %v1968_v9, %v3888_v46 }
 0x7fa   :  { %v2205_v35 = vpack.c.b16 %v2201_v44, %v2201_v44  ;;  %v2206_v7 = vpack.c.b16 %v2202_v47, %v2202_v47  ;;  %v2171_v12 = vunpack.c.l.b16 %v2024_v20  ;;  %v2172_v31 = vunpack.c.h.b16 %v2024_v20 }
 0x7fb   :  { %v1998_v23 = vmul.f32 %v1994_v52, %v3842_v60  ;;  %v2151_v41 = vunpack.c.l.b16 %v1976_v24  ;;  %v2186_v34 = vpack.c.b16 %v2182_v40, %v2182_v40  ;;  %v2152_v33 = vunpack.c.h.b16 %v1976_v24 }
 0x7fc   :  { %v2279_v18 = vsel %vm493_vm6, %v4581_v55, %v2205_v35  ;;  %v2283_v15 = vsel %vm493_vm6, %v4604_v58, %v2206_v7  ;;  %v2175_v54 = vpack.c.b16 %v2171_v12, %v2171_v12  ;;  %v2176_v42 = vpack.c.b16 %v2172_v31, %v2172_v31 }
 0x7fd   :  { %2344 = vmatpush.bf16.msra.mxu2 %v2279_v18  ;;  %2357 = vmatpush.bf16.msra.mxu3 %v2283_v15  ;;  %v2000_v53 = vpack.c.bf16 %v1998_v23, %v1997_v56  ;;  %v2155_v48 = vpack.c.b16 %v2151_v41, %v2151_v41  ;;  %v5149_v30 = vunpack.c.l.bf16 %v4667_v28  ;;  %v2020_v55 = vmul.f32 %v2016_v57, %v3849_v32 }
 0x7fe   :  { %v2263_v58 = vsel %vm493_vm6, %v2175_v54, %v2185_v36  ;;  %v2267_v52 = vsel %vm493_vm6, %v2176_v42, %v2186_v34  ;;  %v2156_v47 = vpack.c.b16 %v2152_v33, %v2152_v33  ;;  %v2047_v2 = vpack.c.bf16 %v2044_v4, %v2043_v27  ;;  %v3288_v33 = vld [vmem:[#allocation7] sm:$0xf] }
 0x7ff   :  { %v2019_v44 = vmul.f32 %v5149_v30, %v3730_v6  ;;  %v2161_v9 = vunpack.c.l.b16 %v2000_v53  ;;  %v2162_v20 = vunpack.c.h.b16 %v2000_v53  ;;  %v1975_v24 = vpack.c.bf16 %v1972_v62, %v1971_v19 }
 0x800   :  { %v2179_v56 = vunpack.c.l.b16 %v2047_v2  ;;  %v2180_v35 = vunpack.c.h.b16 %v2047_v2  ;;  %v1995_v7 = vmul.f32 %v1991_v39, %v3824_v43  ;;  %v1996_v28 = vmul.f32 %v1992_v63, %v3826_v11  ;;  %v5150_v2 = vld [vmem:[#allocation38_spill] sm:$0xff] }
 0x801   :  { %v2023_v3 = vpack.c.bf16 %v2020_v55, %v2019_v44  ;;  %2345 = vmatpush.bf16.msra.mxu2 %v2263_v58  ;;  %2358 = vmatpush.bf16.msra.mxu3 %v2267_v52  ;;  %v2165_v57 = vpack.c.b16 %v2161_v9, %v2161_v9  ;;  %v2166_v12 = vpack.c.b16 %v2162_v20, %v2162_v20  ;;  %v2149_v19 = vunpack.c.l.b16 %v1975_v24  ;;  %v138_v55 = vld [vmem:[#allocation11 + $0x10] sm:$0xff]  ;;  %v139_v52 = vld [vmem:[#allocation11 + $0x18] sm:$0xff] }
 0x802   :  { %v2183_v4 = vpack.c.b16 %v2179_v56, %v2179_v56  ;;  %v2184_v31 = vpack.c.b16 %v2180_v35, %v2180_v35  ;;  %v1999_v40 = vpack.c.bf16 %v1996_v28, %v1995_v7  ;;  %v2150_v41 = vunpack.c.h.b16 %v1975_v24  ;;  %v5151_v20 = vld [vmem:[#allocation39_spill] sm:$0xff]  ;;  %v136_v24 = vld [vmem:[#allocation11] sm:$0xff]  ;;  %v137_v35 = vld [vmem:[#allocation11 + $0x8] sm:$0xff] }
 0x803   :  { %v2169_v36 = vunpack.c.l.b16 %v2023_v3  ;;  %v2170_v27 = vunpack.c.h.b16 %v2023_v3  ;;  %v2247_v62 = vsel %vm493_vm6, %v2155_v48, %v2165_v57  ;;  %v2251_v18 = vsel %vm493_vm6, %v2156_v47, %v2166_v12  ;;  %v5152_v28 = vld [vmem:[#allocation36_spill] sm:$0xff]  ;;  %v5153_v12 = vld [vmem:[#allocation37_spill] sm:$0xff] }
 0x804   :  { %v2159_v39 = vunpack.c.l.b16 %v1999_v40  ;;  %v2160_v1 = vunpack.c.h.b16 %v1999_v40  ;;  %v2153_v42 = vpack.c.b16 %v2149_v19, %v2149_v19  ;;  %v2154_v34 = vpack.c.b16 %v2150_v41, %v2150_v41 }
 0x805   :  { %v2173_v15 = vpack.c.b16 %v2169_v36, %v2169_v36  ;;  %v2174_v23 = vpack.c.b16 %v2170_v27, %v2170_v27  ;;  %2346 = vmatpush.bf16.msra.mxu2 %v2247_v62  ;;  %2359 = vmatpush.bf16.msra.mxu3 %v2251_v18 }
 0x806   :  { %v2163_v53 = vpack.c.b16 %v2159_v39, %v2159_v39  ;;  %v2164_v48 = vpack.c.b16 %v2160_v1, %v2160_v1 }
 0x807   :  { %v2255_v63 = vsel %vm493_vm6, %v2173_v15, %v2183_v4  ;;  %v2259_v54 = vsel %vm493_vm6, %v2174_v23, %v2184_v31 }
 0x808   :  { %2319 = vmatpush.bf16.msra.mxu0 %v2255_v63  ;;  %2332 = vmatpush.bf16.msra.mxu1 %v2259_v54  ;;  %v2239_v30 = vsel %vm493_vm6, %v2153_v42, %v2163_v53  ;;  %v2243_v44 = vsel %vm493_vm6, %v2154_v34, %v2164_v48 }
 0x809   :  { %2847 = vmatmul.msk.bf16.vlgmr.msra.gmra.mxu2 %vm558_vm9, %v3288_v33  ;;  %2848 = vmatmul.msk.bf16.vlgmr.msra.gmra.mxu3 %vm558_vm9, %v3288_v33 }
 0x80c   :  { %2320 = vmatpush.bf16.msra.mxu0 %v2239_v30  ;;  %2333 = vmatpush.bf16.msra.mxu1 %v2243_v44 }
 0x80f   :  { %2845 = vmatmul.msk.bf16.vlgmr.msra.gmra.mxu0 %vm558_vm9, %v3288_v33  ;;  %2846 = vmatmul.msk.bf16.vlgmr.msra.gmra.mxu1 %vm558_vm9, %v3288_v33 }
 0x88c   :  { %v2348_v58 = vpop.f32.mrf.mxu2  ;;  %v2361_v47 = vpop.f32.mrf.mxu3 }
 0x88d   :  { %v2367_v9 = vsub.f32 %v5150_v2, %v2348_v58  ;;  %v2368_v3 = vsub.f32 %v5151_v20, %v2361_v47  ;;  %v2322_v56 = vpop.f32.mrf.mxu0  ;;  %v2335_v7 = vpop.f32.mrf.mxu1 }
 0x88e   :  { %v2365_v57 = vsub.f32 %v5152_v28, %v2322_v56  ;;  %v2366_v36 = vsub.f32 %v5153_v12, %v2335_v7 }
 0x88f   :  { %v2371_v27 = vadd.f32 %v2367_v9, %v138_v55  ;;  %v2372_v4 = vadd.f32 %v2368_v3, %v139_v52 }
 0x890   :  { %v2369_v31 = vadd.f32 %v2365_v57, %v136_v24  ;;  %v2370_v40 = vadd.f32 %v2366_v36, %v137_v35 }
 0x891   :  { %v2375_v19 = vmax.f32 %v2371_v27, 0.0  ;;  %v2376_v62 = vmax.f32 %v2372_v4, 0.0 }
 0x892   :  { %v2373_v18 = vmax.f32 %v2369_v31, 0.0  ;;  %v2374_v15 = vmax.f32 %v2370_v40, 0.0 }
 0x893   :  { %v2379_v23 = vsub.f32 %v5150_v2, %v2375_v19  ;;  %v2380_v39 = vsub.f32 %v5151_v20, %v2376_v62 }
 0x894   :  { %v2377_v41 = vsub.f32 %v5152_v28, %v2373_v18  ;;  %v2378_v1 = vsub.f32 %v5153_v12, %v2374_v15  ;;  %v2350_v63 = vpop.f32.mrf.mxu2  ;;  %v2363_v54 = vpop.f32.mrf.mxu3 }
 0x895   :  { %v2324_v42 = vpop.f32.mrf.mxu0  ;;  %v2337_v34 = vpop.f32.mrf.mxu1  ;;  %v2478_v33 = vpack.c.bf16 %v2380_v39, %v2379_v23 }
 0x896   :  { %v3220_v53 = vpack.i.bf16 %v2378_v1, %v2380_v39  ;;  %v3225_v48 = vpack.i.bf16 %v2379_v23, %v2377_v41  ;;  %v2477_v30 = vpack.c.bf16 %v2378_v1, %v2377_v41  ;;  %v3255_v44 = vpack.i.bf16 %v2379_v23, %v2378_v1 }
 0x897   :  { %v3260_v55 = vpack.i.bf16 %v2377_v41, %v2380_v39  ;;  %v2619_v7 = vunpack.c.l.b16 %v2478_v33  ;;  %v2620_v28 = vunpack.c.h.b16 %v2478_v33 }
 0x898   :  { %3221 = vrot.lane.b32.xlu0 %v3220_v53, %s3502_s7  ;;  %3226 = vrot.lane.b32.xlu2 %v3225_v48, %s3501_s4  ;;  %v2617_v57 = vunpack.c.l.b16 %v2477_v30  ;;  %v2618_v12 = vunpack.c.h.b16 %v2477_v30 }
 0x899   :  { %3216 = vrot.lane.b32.xlu1 %v3225_v48, %s3502_s7  ;;  %v4834_v18 = vpack.c.b16 %v2619_v7, %v2619_v7  ;;  %v4836_v15 = vpack.c.b16 %v2620_v28, %v2620_v28 }
 0x89a   :  { %v4838_v1 = vpack.c.b16 %v2617_v57, %v2617_v57  ;;  %v4840_v33 = vpack.c.b16 %v2618_v12, %v2618_v12 }
 0x8a0   :  { %3236 = vrot.lane.b32.xlu0 %v3225_v48, %s3503_s16  ;;  %3241 = vrot.lane.b32.xlu2 %v3220_v53, %s3503_s16 }
 0x8a1   :  { %3231 = vrot.lane.b32.xlu1 %v3220_v53, %s3501_s4 }
 0x8a8   :  { %3251 = vrot.lane.b32.xlu0 %v3220_v53, %s3504_s17  ;;  %3256 = vrot.lane.b32.xlu2 %v3255_v44, %s3505_s18 }
 0x8a9   :  { %3246 = vrot.lane.b32.xlu1 %v3225_v48, %s3504_s17 }
 0x8b0   :  { %3266 = vrot.lane.b32.xlu0 %v3255_v44, %s3506_s1  ;;  %2459 = vrot.lane.b32.xlu2 %v2380_v39, %s3506_s1 }
 0x8b1   :  { %3261 = vrot.lane.b32.xlu1 %v3260_v55, %s3505_s18 }
 0x8b8   :  { %2387 = vrot.lane.b32.xlu0 %v2380_v39, %s3507_s19  ;;  %3276 = vrot.lane.b32.xlu2 %v3255_v44, %s3494_s14 }
 0x8b9   :  { %3271 = vrot.lane.b32.xlu1 %v3255_v44, %s3507_s19 }
 0x8c0   :  { %2453 = vrot.lane.b32.xlu0 %v2377_v41, %s3506_s1  ;;  %2381 = vrot.lane.b32.xlu2 %v2377_v41, %s3507_s19 }
 0x8c1   :  { %2411 = vrot.lane.b32.xlu1 %v2380_v39, %s3494_s14 }
 0x8c9   :  { %2405 = vrot.lane.b32.xlu1 %v2377_v41, %s3494_s14  ;;  %s2814_s14 = sshll.u32 %s3508_s5, 4  ;;  %s2815_s14 = int_to_ptr.vmem [resolvable:$true] %s2814_s14 }
 0x8f2   :  { %v3227_v58 = vpop.permute.xlu2 %3226 }
 0x8f3   :  { %v3229_v63 = vunpack.i.h.bf16 %v3227_v58  ;;  %v3228_v54 = vunpack.i.l.bf16 %v3227_v58 }
 0x8fa   :  { %v3242_v52 = vpop.permute.xlu2 %3241 }
 0x8fb   :  { %v3244_v42 = vunpack.i.h.bf16 %v3242_v52  ;;  %v3243_v53 = vunpack.i.l.bf16 %v3242_v52 }
 0x902   :  { %v4820_v47 = vpop.permute.xlu2 %3256 }
 0x903   :  { %v3259_v40 = vunpack.i.h.bf16 %v4820_v47  ;;  %v3258_v19 = vunpack.i.l.bf16 %v4820_v47 }
 0x905   :  { %v4848_v48 = vsel %vm217_vm3, %v3258_v19, %v3259_v40 }
 0x90a   :  { %v3222_v2 = vpop.permute.xlu0 %3221  ;;  %v4822_v9 = vpop.permute.xlu2 %2459 }
 0x90b   :  { %v3224_v20 = vunpack.i.h.bf16 %v3222_v2  ;;  %v3223_v3 = vunpack.i.l.bf16 %v3222_v2  ;;  %v3217_v24 = vpop.permute.xlu1 %3216 }
 0x90c   :  { %v3219_v56 = vunpack.i.h.bf16 %v3217_v24  ;;  %v3218_v35 = vunpack.i.l.bf16 %v3217_v24 }
 0x90e   :  { %v2559_v36 = vsel %vm379_vm2, %v3219_v56, %v3223_v3  ;;  %v2560_v27 = vsel %vm379_vm2, %v3224_v20, %v3219_v56  ;;  %v2561_v4 = vsel %vm379_vm2, %v3218_v35, %v3224_v20  ;;  %v2562_v31 = vsel %vm379_vm2, %v3223_v3, %v3218_v35 }
 0x90f   :  { %v2563_v62 = vpack.c.bf16 %v2560_v27, %v2561_v4  ;;  %v2564_v23 = vpack.c.bf16 %v2562_v31, %v2559_v36 }
 0x911   :  { %v2565_v39 = vunpack.c.l.bf16 %v2563_v62  ;;  %v2566_v41 = vunpack.c.h.bf16 %v2563_v62  ;;  %v2567_v52 = vunpack.c.l.bf16 %v2564_v23  ;;  %v2568_v56 = vunpack.c.h.bf16 %v2564_v23  ;;  %v5155_v62 = vld [vmem:[#allocation21_spill] sm:$0xff] }
 0x912   :  { %v3237_v34 = vpop.permute.xlu0 %3236  ;;  %v4850_v55 = vpop.permute.xlu2 %3276 }
 0x913   :  { %v3239_v30 = vunpack.i.h.bf16 %v3237_v34  ;;  %v3238_v44 = vunpack.i.l.bf16 %v3237_v34  ;;  %v3232_v2 = vpop.permute.xlu1 %3231  ;;  %v2569_v3 = vmul.f32 %v2565_v39, %v3643_v49  ;;  %v2570_v24 = vmul.f32 %v2566_v41, %v3645_v50 }
 0x914   :  { %v3234_v20 = vunpack.i.h.bf16 %v3232_v2  ;;  %v3233_v58 = vunpack.i.l.bf16 %v3232_v2  ;;  %v3279_v57 = vunpack.i.h.bf16 %v4850_v55 }
 0x915   :  { %v2536_v35 = vsel %vm347_vm0, %v3244_v42, %v3239_v30  ;;  %v2537_v7 = vsel %vm347_vm0, %v3238_v44, %v3244_v42  ;;  %v2535_v49 = vsel %vm347_vm0, %v3239_v30, %v3243_v53  ;;  %v2538_v50 = vsel %vm347_vm0, %v3243_v53, %v3238_v44 }
 0x916   :  { %v2539_v28 = vpack.c.bf16 %v2536_v35, %v2537_v7  ;;  %v2512_v12 = vsel %vm315_vm1, %v3234_v20, %v3229_v63  ;;  %v2513_v36 = vsel %vm315_vm1, %v3228_v54, %v3234_v20  ;;  %v2573_v4 = vpack.c.bf16 %v2570_v24, %v2569_v3 }
 0x917   :  { %v2515_v27 = vpack.c.bf16 %v2512_v12, %v2513_v36  ;;  %v2511_v23 = vsel %vm315_vm1, %v3229_v63, %v3233_v58  ;;  %v2514_v39 = vsel %vm315_vm1, %v3233_v58, %v3228_v54  ;;  %v4872_v20 = vpack.c.bf16 %v2538_v50, %v2535_v49  ;;  %v5154_v50 = vld [vmem:[#allocation26_spill] sm:$0xff] }
 0x918   :  { %v2541_v31 = vunpack.c.l.bf16 %v2539_v28  ;;  %v2542_v41 = vunpack.c.h.bf16 %v2539_v28  ;;  %v2657_v2 = vunpack.c.l.b16 %v2573_v4  ;;  %v2658_v35 = vunpack.c.h.b16 %v2573_v4 }
 0x919   :  { %v2517_v42 = vunpack.c.l.bf16 %v2515_v27  ;;  %v2518_v34 = vunpack.c.h.bf16 %v2515_v27  ;;  %v2571_v53 = vmul.f32 %v2567_v52, %v3648_v51  ;;  %v2572_v44 = vmul.f32 %v2568_v56, %v5129_v37 }
 0x91a   :  { %v3252_v30 = vpop.permute.xlu0 %3251  ;;  %v4876_v3 = vpack.c.bf16 %v2514_v39, %v2511_v23  ;;  %v2545_v12 = vmul.f32 %v2541_v31, %v5133_v8  ;;  %v2661_v28 = vpack.c.b16 %v2657_v2, %v2657_v2  ;;  %v2662_v36 = vpack.c.b16 %v2658_v35, %v2658_v35 }
 0x91b   :  { %v3254_v24 = vunpack.i.h.bf16 %v3252_v30  ;;  %v3253_v7 = vunpack.i.l.bf16 %v3252_v30  ;;  %v3247_v63 = vpop.permute.xlu1 %3246  ;;  %v2574_v27 = vpack.c.bf16 %v2572_v44, %v2571_v53  ;;  %v2521_v49 = vmul.f32 %v2517_v42, %v5130_v29 }
 0x91c   :  { %v3249_v54 = vunpack.i.h.bf16 %v3247_v63  ;;  %v3248_v58 = vunpack.i.l.bf16 %v3247_v63  ;;  %v2522_v4 = vmul.f32 %v2518_v34, %v5154_v50  ;;  %v2546_v51 = vmul.f32 %v2542_v41, %v5155_v62 }
 0x91d   :  { %v2543_v31 = vunpack.c.l.bf16 %v4872_v20  ;;  %v2544_v29 = vunpack.c.h.bf16 %v4872_v20  ;;  %v2730_v23 = vsel %vm493_vm6, %v2661_v28, 0  ;;  %v2733_v62 = vsel %vm493_vm6, %v2662_v36, 0 }
 0x91e   :  { %v2487_v37 = vsel %vm283_vm5, %v3249_v54, %v3253_v7  ;;  %v2488_v52 = vsel %vm283_vm5, %v3254_v24, %v3249_v54  ;;  %v2489_v8 = vsel %vm283_vm5, %v3248_v58, %v3254_v24  ;;  %v2490_v56 = vsel %vm283_vm5, %v3253_v7, %v3248_v58  ;;  %2744 = vmatpush.bf16.msrb.mxu0 %v2730_v23 }
 0x91f   :  { %2757 = vmatpush.bf16.msrb.mxu1 %v2733_v62  ;;  %v2659_v39 = vunpack.c.l.b16 %v2574_v27  ;;  %v2660_v41 = vunpack.c.h.b16 %v2574_v27  ;;  %v2525_v42 = vpack.c.bf16 %v2522_v4, %v2521_v49  ;;  %v2549_v34 = vpack.c.bf16 %v2546_v51, %v2545_v12 }
 0x920   :  { %v2519_v2 = vunpack.c.l.bf16 %v4876_v3  ;;  %v2520_v30 = vunpack.c.h.bf16 %v4876_v3  ;;  %v2491_v35 = vpack.c.bf16 %v2488_v52, %v2489_v8  ;;  %v2492_v53 = vpack.c.bf16 %v2490_v56, %v2487_v37 }
 0x921   :  { %v2663_v44 = vpack.c.b16 %v2659_v39, %v2659_v39  ;;  %v2664_v24 = vpack.c.b16 %v2660_v41, %v2660_v41  ;;  %v2637_v20 = vunpack.c.l.b16 %v2525_v42  ;;  %v2647_v63 = vunpack.c.l.b16 %v2549_v34 }
 0x922   :  { %v4896_v7 = vpop.permute.xlu0 %3266  ;;  %v2638_v36 = vunpack.c.h.b16 %v2525_v42  ;;  %v2648_v27 = vunpack.c.h.b16 %v2549_v34  ;;  %v2493_v4 = vunpack.c.l.bf16 %v2491_v35 }
 0x923   :  { %v3269_v54 = vunpack.i.h.bf16 %v4896_v7  ;;  %v3268_v58 = vunpack.i.l.bf16 %v4896_v7  ;;  %v3262_v28 = vpop.permute.xlu1 %3261  ;;  %v2736_v12 = vsel %vm493_vm6, %v2663_v44, 0  ;;  %v2739_v49 = vsel %vm493_vm6, %v2664_v24, 0 }
 0x924   :  { %v3264_v3 = vunpack.i.h.bf16 %v3262_v28  ;;  %v3263_v50 = vunpack.i.l.bf16 %v3262_v28  ;;  %2770 = vmatpush.bf16.msrb.mxu2 %v2736_v12  ;;  %2783 = vmatpush.bf16.msrb.mxu3 %v2739_v49  ;;  %v2641_v52 = vpack.c.b16 %v2637_v20, %v2637_v20  ;;  %v2651_v42 = vpack.c.b16 %v2647_v63, %v2647_v63  ;;  %v5158_v63 = vld [vmem:[#allocation22_spill] sm:$0xff] }
 0x925   :  { %v2461_v51 = vsel %vm249_vm4, %v3269_v54, %v4822_v9  ;;  %v2462_v37 = vsel %vm249_vm4, %v3268_v58, %v3269_v54  ;;  %v2642_v34 = vpack.c.b16 %v2638_v36, %v2638_v36  ;;  %v2494_v44 = vunpack.c.h.bf16 %v2491_v35  ;;  %v5156_v54 = vld [vmem:[#allocation27_spill] sm:$0xff] }
 0x926   :  { %v4909_v8 = vpack.c.bf16 %v2461_v51, %v2462_v37  ;;  %v2439_v56 = vsel %vm217_vm3, %v3264_v3, %v3258_v19  ;;  %v2437_v23 = vsel %vm217_vm3, %v3259_v40, %v3263_v50  ;;  %v2440_v62 = vsel %vm217_vm3, %v3263_v50, %v3264_v3 }
 0x927   :  { %v4921_v39 = vpack.c.bf16 %v2439_v56, %v2440_v62  ;;  %v4924_v41 = vpack.c.bf16 %v2437_v23, %v4848_v48  ;;  %v2495_v24 = vunpack.c.l.bf16 %v2492_v53  ;;  %v2652_v20 = vpack.c.b16 %v2648_v27, %v2648_v27  ;;  %v5157_v48 = vld [vmem:[#allocation28_spill] sm:$0xff]  ;;  %v2382_v23 = vpop.permute.xlu2 %2381 }
 0x928   :  { %v2523_v19 = vmul.f32 %v2519_v2, %v5156_v54  ;;  %v2496_v28 = vunpack.c.h.bf16 %v2492_v53  ;;  %v2469_v47 = vunpack.c.l.bf16 %v4909_v8  ;;  %v2470_v40 = vunpack.c.h.bf16 %v4909_v8  ;;  %v5159_v53 = vld [vmem:[#allocation23_spill] sm:$0xff] }
 0x929   :  { %v2443_v12 = vunpack.c.l.bf16 %v4921_v39  ;;  %v2715_v49 = vsel %vm493_vm6, %v2641_v52, %v2651_v42  ;;  %v2719_v3 = vsel %vm493_vm6, %v2642_v34, %v2652_v20  ;;  %v2524_v50 = vmul.f32 %v2520_v30, %v5157_v48 }
 0x92a   :  { %v2547_v36 = vmul.f32 %v2543_v31, %v5158_v63  ;;  %v2388_v35 = vpop.permute.xlu0 %2387  ;;  %v2444_v27 = vunpack.c.h.bf16 %v4921_v39  ;;  %v2445_v2 = vunpack.c.l.bf16 %v4924_v41  ;;  %2745 = vmatpush.bf16.msrb.mxu0 %v2715_v49  ;;  %2758 = vmatpush.bf16.msrb.mxu1 %v2719_v3  ;;  %v2548_v51 = vmul.f32 %v2544_v29, %v5159_v53 }
 0x92b   :  { %v3272_v37 = vpop.permute.xlu1 %3271  ;;  %v2497_v56 = vmul.f32 %v2493_v4, %v3686_v16  ;;  %v2526_v52 = vpack.c.bf16 %v2524_v50, %v2523_v19  ;;  %v2498_v30 = vmul.f32 %v2494_v44, %v3688_v17  ;;  %v2392_v31 = vsel %vm154_vm7, %v2388_v35, %v2382_v23 }
 0x92c   :  { %v3274_v62 = vunpack.i.h.bf16 %v3272_v37  ;;  %v3273_v42 = vunpack.i.l.bf16 %v3272_v37  ;;  %v2550_v34 = vpack.c.bf16 %v2548_v51, %v2547_v36  ;;  %v2499_v20 = vmul.f32 %v2495_v24, %v3691_v22 }
 0x92d   :  { %v2500_v54 = vmul.f32 %v2496_v28, %v3693_v0  ;;  %v2639_v49 = vunpack.c.l.b16 %v2526_v52  ;;  %v2640_v3 = vunpack.c.h.b16 %v2526_v52  ;;  %v2501_v0 = vpack.c.bf16 %v2498_v30, %v2497_v56 }
 0x92e   :  { %v2389_v29 = vsel %vm154_vm7, %v3274_v62, %v2388_v35  ;;  %v2390_v16 = vsel %vm154_vm7, %v3273_v42, %v3274_v62  ;;  %v2649_v4 = vunpack.c.l.b16 %v2550_v34  ;;  %v2650_v19 = vunpack.c.h.b16 %v2550_v34 }
 0x92f   :  { %v2391_v17 = vsel %vm154_vm7, %v2382_v23, %v3273_v42  ;;  %v4949_v44 = vpack.c.bf16 %v2389_v29, %v2390_v16  ;;  %v2643_v48 = vpack.c.b16 %v2639_v49, %v2639_v49  ;;  %v2644_v50 = vpack.c.b16 %v2640_v3, %v2640_v3 }
 0x930   :  { %v4951_v22 = vpack.c.bf16 %v2391_v17, %v2392_v31  ;;  %v2446_v24 = vunpack.c.h.bf16 %v4924_v41  ;;  %v2653_v28 = vpack.c.b16 %v2649_v4, %v2649_v4  ;;  %v2654_v63 = vpack.c.b16 %v2650_v19, %v2650_v19 }
 0x931   :  { %v5160_v36 = vunpack.i.l.bf16 %v4850_v55  ;;  %v2397_v53 = vunpack.c.l.bf16 %v4949_v44  ;;  %v2398_v51 = vunpack.c.h.bf16 %v4949_v44  ;;  %v2627_v37 = vunpack.c.l.b16 %v2501_v0 }
 0x932   :  { %v2628_v23 = vunpack.c.h.b16 %v2501_v0  ;;  %v2454_v52 = vpop.permute.xlu0 %2453  ;;  %v2723_v56 = vsel %vm493_vm6, %v2643_v48, %v2653_v28  ;;  %v2727_v41 = vsel %vm493_vm6, %v2644_v50, %v2654_v63  ;;  %v2502_v62 = vpack.c.bf16 %v2500_v54, %v2499_v20 }
 0x933   :  { %v2414_v35 = vsel %vm185_vm8, %v5160_v36, %v3279_v57  ;;  %v2463_v42 = vsel %vm249_vm4, %v2454_v52, %v3268_v58  ;;  %v2412_v30 = vpop.permute.xlu1 %2411  ;;  %2771 = vmatpush.bf16.msrb.mxu2 %v2723_v56  ;;  %2784 = vmatpush.bf16.msrb.mxu3 %v2727_v41  ;;  %v2395_v34 = vunpack.c.l.bf16 %v4951_v22  ;;  %v2631_v31 = vpack.c.b16 %v2627_v37, %v2627_v37 }
 0x934   :  { %v2632_v49 = vpack.c.b16 %v2628_v23, %v2628_v23  ;;  %v2464_v3 = vsel %vm249_vm4, %v4822_v9, %v2454_v52  ;;  %v2629_v29 = vunpack.c.l.b16 %v2502_v62  ;;  %v2630_v16 = vunpack.c.h.b16 %v2502_v62 }
 0x935   :  { %v2465_v4 = vpack.c.bf16 %v2463_v42, %v2464_v3  ;;  %v2413_v7 = vsel %vm185_vm8, %v3279_v57, %v2412_v30  ;;  %v2699_v58 = vsel %vm493_vm6, %v4838_v1, %v2631_v31  ;;  %v2449_v19 = vmul.f32 %v2445_v2, %v3871_v21 }
 0x936   :  { %v2703_v20 = vsel %vm493_vm6, %v4840_v33, %v2632_v49  ;;  %v2418_v54 = vpack.c.bf16 %v2413_v7, %v2414_v35  ;;  %2746 = vmatpush.bf16.msrb.mxu0 %v2699_v58  ;;  %v2633_v9 = vpack.c.b16 %v2629_v29, %v2629_v29  ;;  %v2634_v17 = vpack.c.b16 %v2630_v16, %v2630_v16 }
 0x937   :  { %2759 = vmatpush.bf16.msrb.mxu1 %v2703_v20  ;;  %v2467_v48 = vunpack.c.l.bf16 %v2465_v4  ;;  %v2468_v50 = vunpack.c.h.bf16 %v2465_v4  ;;  %v2450_v63 = vmul.f32 %v2446_v24, %v3877_v14  ;;  %v2473_v1 = vmul.f32 %v2469_v47, %v3882_v25 }
 0x938   :  { %v2421_v0 = vunpack.c.l.bf16 %v2418_v54  ;;  %v2422_v28 = vunpack.c.h.bf16 %v2418_v54  ;;  %v2707_v33 = vsel %vm493_vm6, %v4834_v18, %v2633_v9  ;;  %v2711_v21 = vsel %vm493_vm6, %v4836_v15, %v2634_v17 }
 0x939   :  { %v2471_v57 = vmul.f32 %v2467_v48, %v5147_v45  ;;  %v2472_v2 = vmul.f32 %v2468_v50, %v5148_v13  ;;  %v2396_v36 = vunpack.c.h.bf16 %v4951_v22  ;;  %2772 = vmatpush.bf16.msrb.mxu2 %v2707_v33  ;;  %2785 = vmatpush.bf16.msrb.mxu3 %v2711_v21  ;;  %v2452_v35 = vpack.c.bf16 %v2450_v63, %v2449_v19 }
 0x93a   :  { %v2425_v14 = vmul.f32 %v2421_v0, %v3840_v59  ;;  %v2426_v24 = vmul.f32 %v2422_v28, %v3842_v60  ;;  %v2474_v25 = vmul.f32 %v2470_v40, %v5139_v38  ;;  %v2447_v45 = vmul.f32 %v2443_v12, %v3730_v6 }
 0x93b   :  { %v2406_v18 = vpop.permute.xlu1 %2405  ;;  %v2448_v13 = vmul.f32 %v2444_v27, %v3849_v32  ;;  %v2475_v15 = vpack.c.bf16 %v2472_v2, %v2471_v57  ;;  %v2599_v47 = vunpack.c.l.b16 %v2452_v35  ;;  %v2600_v37 = vunpack.c.h.b16 %v2452_v35  ;;  %v3289_v35 = vld [vmem:[#allocation10] sm:$0xf] }
 0x93c   :  { %v5161_v59 = vunpack.i.l.bf16 %v4850_v55  ;;  %v2416_v38 = vsel %vm185_vm8, %v2412_v30, %v2406_v18  ;;  %v2476_v8 = vpack.c.bf16 %v2474_v25, %v2473_v1  ;;  %v2401_v32 = vmul.f32 %v2397_v53, %v3905_v61  ;;  %v140_v25 = vld [vmem:[#allocation13] sm:$0xff] }
 0x93d   :  { %v2451_v23 = vpack.c.bf16 %v2448_v13, %v2447_v45  ;;  %v2607_v52 = vunpack.c.l.b16 %v2475_v15  ;;  %v2603_v6 = vpack.c.b16 %v2599_v47, %v2599_v47  ;;  %v2604_v12 = vpack.c.b16 %v2600_v37, %v2600_v37  ;;  %v5162_v45 = vld [vmem:[#allocation32_spill] sm:$0xff]  ;;  %v5163_v37 = vld [vmem:[#allocation33_spill] sm:$0xff] }
 0x93e   :  { %v2415_v60 = vsel %vm185_vm8, %v2406_v18, %v5161_v59  ;;  %v2608_v56 = vunpack.c.h.b16 %v2475_v15  ;;  %v2609_v39 = vunpack.c.l.b16 %v2476_v8  ;;  %v2610_v27 = vunpack.c.h.b16 %v2476_v8  ;;  %v141_v15 = vld [vmem:[#allocation13 + $0x8] sm:$0xff]  ;;  %v142_v8 = vld [vmem:[#allocation13 + $0x10] sm:$0xff] }
 0x93f   :  { %v2417_v40 = vpack.c.bf16 %v2415_v60, %v2416_v38  ;;  %v2597_v55 = vunpack.c.l.b16 %v2451_v23  ;;  %v2611_v42 = vpack.c.b16 %v2607_v52, %v2607_v52  ;;  %v2598_v31 = vunpack.c.h.b16 %v2451_v23  ;;  %v143_v23 = vld [vmem:[#allocation13 + $0x18] sm:$0xff] }
 0x940   :  { %v2612_v49 = vpack.c.b16 %v2608_v56, %v2608_v56  ;;  %v2613_v3 = vpack.c.b16 %v2609_v39, %v2609_v39  ;;  %v2614_v10 = vpack.c.b16 %v2610_v27, %v2610_v27  ;;  %v2402_v61 = vmul.f32 %v2398_v51, %v3907_v5 }
 0x941   :  { %v2419_v41 = vunpack.c.l.bf16 %v2417_v40  ;;  %v2420_v62 = vunpack.c.h.bf16 %v2417_v40  ;;  %v2601_v16 = vpack.c.b16 %v2597_v55, %v2597_v55  ;;  %v2602_v4 = vpack.c.b16 %v2598_v31, %v2598_v31 }
 0x942   :  { %v2428_v53 = vpack.c.bf16 %v2426_v24, %v2425_v14  ;;  %v2691_v7 = vsel %vm493_vm6, %v2603_v6, %v2613_v3  ;;  %v2695_v58 = vsel %vm493_vm6, %v2604_v12, %v2614_v10  ;;  %v2399_v20 = vmul.f32 %v2395_v34, %v3886_v26  ;;  %v5164_v12 = vld [vmem:[#allocation34_spill] sm:$0xff] }
 0x943   :  { %v2423_v30 = vmul.f32 %v2419_v41, %v3824_v43  ;;  %v2424_v29 = vmul.f32 %v2420_v62, %v3826_v11  ;;  %v2400_v54 = vmul.f32 %v2396_v36, %v3888_v46  ;;  %2773 = vmatpush.bf16.msrb.mxu2 %v2691_v7  ;;  %2786 = vmatpush.bf16.msrb.mxu3 %v2695_v58 }
 0x944   :  { %v2683_v43 = vsel %vm493_vm6, %v2601_v16, %v2611_v42  ;;  %v2687_v11 = vsel %vm493_vm6, %v2602_v4, %v2612_v49  ;;  %v2404_v19 = vpack.c.bf16 %v2402_v61, %v2401_v32  ;;  %v2589_v44 = vunpack.c.l.b16 %v2428_v53  ;;  %v5165_v32 = vld [vmem:[#allocation35_spill] sm:$0xff] }
 0x945   :  { %2747 = vmatpush.bf16.msrb.mxu0 %v2683_v43  ;;  %2760 = vmatpush.bf16.msrb.mxu1 %v2687_v11  ;;  %v2590_v5 = vunpack.c.h.b16 %v2428_v53  ;;  %v2403_v51 = vpack.c.bf16 %v2400_v54, %v2399_v20  ;;  %v2427_v9 = vpack.c.bf16 %v2424_v29, %v2423_v30 }
 0x946   :  { %v2579_v17 = vunpack.c.l.b16 %v2404_v19  ;;  %v2593_v48 = vpack.c.b16 %v2589_v44, %v2589_v44  ;;  %v2580_v50 = vunpack.c.h.b16 %v2404_v19 }
 0x947   :  { %v2594_v22 = vpack.c.b16 %v2590_v5, %v2590_v5  ;;  %v2577_v26 = vunpack.c.l.b16 %v2403_v51  ;;  %v2587_v34 = vunpack.c.l.b16 %v2427_v9  ;;  %v2578_v46 = vunpack.c.h.b16 %v2403_v51 }
 0x948   :  { %v2583_v0 = vpack.c.b16 %v2579_v17, %v2579_v17  ;;  %v2584_v28 = vpack.c.b16 %v2580_v50, %v2580_v50  ;;  %v2588_v63 = vunpack.c.h.b16 %v2427_v9 }
 0x949   :  { %v2581_v1 = vpack.c.b16 %v2577_v26, %v2577_v26  ;;  %v2591_v33 = vpack.c.b16 %v2587_v34, %v2587_v34  ;;  %v2582_v2 = vpack.c.b16 %v2578_v46, %v2578_v46 }
 0x94a   :  { %v2675_v21 = vsel %vm493_vm6, %v2583_v0, %v2593_v48  ;;  %v2679_v57 = vsel %vm493_vm6, %v2584_v28, %v2594_v22  ;;  %v2592_v36 = vpack.c.b16 %v2588_v63, %v2588_v63 }
 0x94b   :  { %2774 = vmatpush.bf16.msrb.mxu2 %v2675_v21  ;;  %2787 = vmatpush.bf16.msrb.mxu3 %v2679_v57  ;;  %v2667_v14 = vsel %vm493_vm6, %v2581_v1, %v2591_v33 }
 0x94c   :  { %2748 = vmatpush.bf16.msrb.mxu0 %v2667_v14  ;;  %v2671_v24 = vsel %vm493_vm6, %v2582_v2, %v2592_v36 }
 0x94d   :  { %2761 = vmatpush.bf16.msrb.mxu1 %v2671_v24 }
 0x94e   :  { %2851 = vmatmul.msk.bf16.vlgmr.msrb.gmra.mxu2 %vm558_vm9, %v3289_v35  ;;  %2852 = vmatmul.msk.bf16.vlgmr.msrb.gmra.mxu3 %vm558_vm9, %v3289_v35 }
 0x94f   :  { %2849 = vmatmul.msk.bf16.vlgmr.msrb.gmra.mxu0 %vm558_vm9, %v3289_v35 }
 0x950   :  { %2850 = vmatmul.msk.bf16.vlgmr.msrb.gmra.mxu1 %vm558_vm9, %v3289_v35 }
 0x9cc   :  { %v2750_v18 = vpop.f32.mrf.mxu0 }
 0x9cd   :  { %v2793_v13 = vsub.f32 %v5162_v45, %v2750_v18  ;;  %v2763_v47 = vpop.f32.mrf.mxu1 }
 0x9ce   :  { %v2794_v59 = vsub.f32 %v5163_v37, %v2763_v47 }
 0x9cf   :  { %v2797_v60 = vadd.f32 %v2793_v13, %v140_v25 }
 0x9d0   :  { %v2798_v38 = vadd.f32 %v2794_v59, %v141_v15 }
 0x9d1   :  { %v2776_v40 = vpop.f32.mrf.mxu2  ;;  %v2789_v52 = vpop.f32.mrf.mxu3  ;;  %v2801_v6 = vmax.f32 %v2797_v60, 0.0 }
 0x9d2   :  { %v2795_v56 = vsub.f32 %v5164_v12, %v2776_v40  ;;  %v2796_v39 = vsub.f32 %v5165_v32, %v2789_v52  ;;  %v2802_v27 = vmax.f32 %v2798_v38, 0.0 }
 0x9d3   :  { %2805 = vst [vmem:[#allocation14] sm:$0xff] %v2801_v6 }
 0x9d4   :  { %v2799_v41 = vadd.f32 %v2795_v56, %v142_v8  ;;  %v2800_v62 = vadd.f32 %v2796_v39, %v143_v23  ;;  %2806 = vst [vmem:[#allocation14 + $0x8] sm:$0xff] %v2802_v27  ;;  %v2752_v55 = vpop.f32.mrf.mxu0 }
 0x9d5   :  { %v2765_v42 = vpop.f32.mrf.mxu1 }
 0x9d6   :  { %v2803_v31 = vmax.f32 %v2799_v41, 0.0  ;;  %v2804_v49 = vmax.f32 %v2800_v62, 0.0 }
 0x9d8   :  { %2807 = vst [vmem:[#allocation14 + $0x10] sm:$0xff] %v2803_v31 }
 0x9d9   :  { %2808 = vst [vmem:[#allocation14 + $0x18] sm:$0xff] %v2804_v49  ;;  %v2778_v3 = vpop.f32.mrf.mxu2  ;;  %v2791_v10 = vpop.f32.mrf.mxu3 }
 0x9da   :  { %2819 = dma.vmem_to_hbm [thread:$0]  %s2815_s14, 512, %s2817_s23, [#allocation4]  }
 0x9db   :  { %3490 = dma.done.wait [#allocation4], 512  }
 0x9dc   :  { %3491 = vsyncadd [#allocation4], 4294966784 }
 0x9dd   :  { %2824 = vsyncpa [#allocation3], 1 }
 0x9de   :  { %2825 = vsyncpa [#allocation6], 1 }
 0x9df   :  { %2826 = vsyncpa [#allocation9], 1 }
 0x9e0   :  { %2827 = vsyncpa [#allocation12], 1 }
 0x9e1   :  { %2828 = vsyncpa [#allocation4], 1 }

</bundles_post_ra>
